<compile_context>
chip_gen: v5e
topology: v5e:2x2
jax: 0.10.0
libtpu: 0.0.40
codegen_flags: <defaults>
</compile_context>

<pallas_src>
import math

import jax
import jax.numpy as jnp
from jax.experimental import pallas as pl
from jax.experimental.pallas import tpu as pltpu

EPS = 1e-5  # nn.LayerNorm / nn.BatchNorm1d default eps

# --------------------------------------------------------------------------
# Model hyper-parameters (consistent with the module constructor)
# --------------------------------------------------------------------------
RAW_FEAT_DIM = 11                                   # `input_dim` ctor arg
POS_EMB_DIM = 4
N_POSITIONS = 19
F_DIM = RAW_FEAT_DIM + POS_EMB_DIM                  # 15
MODEL_DIM = 32
NUM_LAYERS = 2
DIM_FF = MODEL_DIM * 4                              # 128
NUM_HEADS = min(16, max(2, 2 * round(MODEL_DIM / 64)))   # = 2
HEAD_DIM = MODEL_DIM // NUM_HEADS                   # 16
Z_INPUT_DIM = 6
Z_DIM = 8
CAT_DIM = MODEL_DIM + Z_DIM                         # 40
DEC_DIM = CAT_DIM // 4                              # 10
OUTPUT_DIM = 1

B = 2
S = 12                                              # seq len (>= 11; output slices [:, :11])
BS = B * S                                          # 24 flattened token rows
ATT_ROWS = NUM_HEADS * BS                           # 48 stacked (head, batch, seq) rows
ACT_COLS = RAW_FEAT_DIM + 1 + Z_INPUT_DIM           # 18: [x_raw | pos_id | z]

# --------------------------------------------------------------------------
# Packed slab layouts (all offsets static / compile-time)
# --------------------------------------------------------------------------
# m32 slab: (M32_ROWS, 32) — all <=32-lane weight matrices, 8-aligned row blocks
M_FWR = 0                                           # (11, 32) BN-folded raw feat weights
M_POST = 16                                         # (19, 32) BN-folded pos-emb table
M_LAYER_BASE = 40
MW_Q0, MW_Q1 = 0, 32                                # (32, 16) per-head Q weights (pre-scaled)
MW_K0, MW_K1 = 64, 96                               # (32, 16) per-head K weights (bias dropped)
MW_V0, MW_V1 = 128, 160                             # (32, 16) per-head V weights (bias folded)
MW_WO = 192                                         # (32, 32) attention out proj
MW_W2 = 224                                         # (128, 32) FFN second weight
M_LAYER_STRIDE = 352                                # 6*32 + 32 + 128
M_ZW = M_LAYER_BASE + NUM_LAYERS * M_LAYER_STRIDE   # 744: (6, 8) play-embed weight
M_DWH = M_ZW + 8                                    # 752: (32, 10) decoder (h part)
M_DWZ = M_DWH + MODEL_DIM                           # 784: (8, 10) decoder (z part)
M32_ROWS = M_DWZ + 8                                # 792

# m128 slab: (NUM_LAYERS*32, 128) — FFN first weights w1
M128_ROWS = NUM_LAYERS * MODEL_DIM                  # 64

# vec slab: (VEC_ROWS, 128) — every bias / LN gain as one row, lanes [0:width)
V_FB, V_FLG, V_FLB = 0, 1, 2
V_LAYER_BASE = 3
VO_BQ0, VO_BQ1, VO_BO, VO_L1G, VO_L1B, VO_B1, VO_B2, VO_L2G, VO_L2B = range(9)
V_LAYER_STRIDE = 9
V_ZL0G, V_ZL0B, V_ZB, V_ZL1G, V_ZL1B = 21, 22, 23, 24, 25
V_DB, V_DLG, V_DLB = 26, 27, 28
V_FCW, V_FCB = 29, 30
VEC_ROWS = 32


# --------------------------------------------------------------------------
# In-kernel helper
# --------------------------------------------------------------------------
def _layernorm(x, g, b, eps=EPS):
    mu = jnp.mean(x, axis=-1, keepdims=True)
    var = jnp.mean((x - mu) ** 2, axis=-1, keepdims=True)
    return (x - mu) * jax.lax.rsqrt(var + eps) * g + b


# --------------------------------------------------------------------------
# Single fused forward kernel (grid=(1,), everything VMEM-resident, 4 DMAs)
# --------------------------------------------------------------------------
def fused_forward_kernel(act_ref, m32_ref, m128_ref, vec_ref, o_ref):
    act = act_ref[...]                                                    # (24, 18)
    x_raw = act[:, 0:RAW_FEAT_DIM]                                        # (24, 11)
    ids = act[:, RAW_FEAT_DIM:RAW_FEAT_DIM + 1].astype(jnp.int32)         # (24, 1)
    zin = act[:, RAW_FEAT_DIM + 1:ACT_COLS]                               # (24, 6)

    def vrow(r, w):                                                       # (1, w) vector row
        return vec_ref[r:r + 1, 0:w]

    # ---- feat embedding: BN + pos-emb already folded into slab weights ----
    iota = jax.lax.broadcasted_iota(jnp.int32, (BS, N_POSITIONS), 1)
    onehot = (iota == ids).astype(jnp.float32)                            # (24, 19)
    h = (jnp.dot(x_raw, m32_ref[M_FWR:M_FWR + RAW_FEAT_DIM, :],
                 preferred_element_type=jnp.float32)
         + jnp.dot(onehot, m32_ref[M_POST:M_POST + N_POSITIONS, :],
                   preferred_element_type=jnp.float32)
         + vrow(V_FB, MODEL_DIM))
    h = jnp.maximum(h, 0.0)
    h = _layernorm(h, vrow(V_FLG, MODEL_DIM), vrow(V_FLB, MODEL_DIM))     # (24, 32)

    # ---- block-diagonal (head, batch) additive mask built in-kernel ----
    ri = jax.lax.broadcasted_iota(jnp.int32, (ATT_ROWS, ATT_ROWS), 0)
    ci = jax.lax.broadcasted_iota(jnp.int32, (ATT_ROWS, ATT_ROWS), 1)
    rb = ((ri >= S).astype(jnp.int32) + (ri >= 2 * S).astype(jnp.int32)
          + (ri >= 3 * S).astype(jnp.int32))
    cb = ((ci >= S).astype(jnp.int32) + (ci >= 2 * S).astype(jnp.int32)
          + (ci >= 3 * S).astype(jnp.int32))
    attn_mask = jnp.where(rb == cb, 0.0, -1e30)                           # (48, 48)

    # ---- transformer encoder (post-norm), layers unrolled ----
    for l in range(NUM_LAYERS):
        mb = M_LAYER_BASE + l * M_LAYER_STRIDE
        vb = V_LAYER_BASE + l * V_LAYER_STRIDE

        def hw(off, _mb=mb):                                              # (32, 16) head weight
            return m32_ref[_mb + off:_mb + off + MODEL_DIM, 0:HEAD_DIM]

        # per-head Q/K/V straight out of the matmul (no lane slicing);
        # Q weights/bias pre-scaled by 1/sqrt(hd); K bias softmax-invariant
        # (dropped); V bias folded into bo at pack time.
        q0 = jnp.dot(h, hw(MW_Q0), preferred_element_type=jnp.float32) + vrow(vb + VO_BQ0, HEAD_DIM)
        q1 = jnp.dot(h, hw(MW_Q1), preferred_element_type=jnp.float32) + vrow(vb + VO_BQ1, HEAD_DIM)
        k0 = jnp.dot(h, hw(MW_K0), preferred_element_type=jnp.float32)
        k1 = jnp.dot(h, hw(MW_K1), preferred_element_type=jnp.float32)
        v0 = jnp.dot(h, hw(MW_V0), preferred_element_type=jnp.float32)
        v1 = jnp.dot(h, hw(MW_V1), preferred_element_type=jnp.float32)
        qs = jnp.concatenate([q0, q1], axis=0)                            # (48, 16) vreg-aligned
        ks = jnp.concatenate([k0, k1], axis=0)
        vs = jnp.concatenate([v0, v1], axis=0)

        s_mat = jax.lax.dot_general(qs, ks, (((1,), (1,)), ((), ())),
                                    preferred_element_type=jnp.float32)   # (48, 48)
        s_mat = s_mat + attn_mask
        s_mat = s_mat - jnp.max(s_mat, axis=-1, keepdims=True)
        p = jnp.exp(s_mat)
        p = p * pl.reciprocal(jnp.sum(p, axis=-1, keepdims=True), approx=True)
        ctx = jnp.dot(p, vs, preferred_element_type=jnp.float32)          # (48, 16)

        # head recombination via row-split wo (no VMEM scratch round-trip)
        attn = (jnp.dot(ctx[0:BS, :],
                        m32_ref[mb + MW_WO:mb + MW_WO + HEAD_DIM, :],
                        preferred_element_type=jnp.float32)
                + jnp.dot(ctx[BS:2 * BS, :],
                          m32_ref[mb + MW_WO + HEAD_DIM:mb + MW_WO + MODEL_DIM, :],
                          preferred_element_type=jnp.float32)
                + vrow(vb + VO_BO, MODEL_DIM))
        x1 = _layernorm(h + attn, vrow(vb + VO_L1G, MODEL_DIM), vrow(vb + VO_L1B, MODEL_DIM))

        ff = jnp.maximum(
            jnp.dot(x1, m128_ref[l * MODEL_DIM:(l + 1) * MODEL_DIM, :],
                    preferred_element_type=jnp.float32) + vrow(vb + VO_B1, DIM_FF), 0.0)
        ff = jnp.dot(ff, m32_ref[mb + MW_W2:mb + MW_W2 + DIM_FF, :],
                     preferred_element_type=jnp.float32) + vrow(vb + VO_B2, MODEL_DIM)
        h = _layernorm(x1 + ff, vrow(vb + VO_L2G, MODEL_DIM), vrow(vb + VO_L2B, MODEL_DIM))

    # ---- play_embedding_layer: LN -> Linear -> ReLU -> LN ----
    ze = _layernorm(zin, vrow(V_ZL0G, Z_INPUT_DIM), vrow(V_ZL0B, Z_INPUT_DIM))
    ze = jnp.maximum(
        jnp.dot(ze, m32_ref[M_ZW:M_ZW + Z_INPUT_DIM, 0:Z_DIM],
                preferred_element_type=jnp.float32) + vrow(V_ZB, Z_DIM), 0.0)
    ze = _layernorm(ze, vrow(V_ZL1G, Z_DIM), vrow(V_ZL1B, Z_DIM))         # (24, 8)

    # ---- decoder: concat(h, ze) @ dec_w == h @ dec_w[:32] + ze @ dec_w[32:]
    dcd = (jnp.dot(h, m32_ref[M_DWH:M_DWH + MODEL_DIM, 0:DEC_DIM],
                   preferred_element_type=jnp.float32)
           + jnp.dot(ze, m32_ref[M_DWZ:M_DWZ + Z_DIM, 0:DEC_DIM],
                     preferred_element_type=jnp.float32)
           + vrow(V_DB, DEC_DIM))
    dcd = jnp.maximum(dcd, 0.0)
    dcd = _layernorm(dcd, vrow(V_DLG, DEC_DIM), vrow(V_DLB, DEC_DIM))     # (24, 10)

    # ---- fc_out + sigmoid, emitted lane-dense as (1, BS) ----
    logits_t = jax.lax.dot_general(vrow(V_FCW, DEC_DIM), dcd,
                                   (((1,), (1,)), ((), ())),
                                   preferred_element_type=jnp.float32)    # (1, 24)
    o_ref[...] = jax.nn.sigmoid(logits_t + vrow(V_FCB, 1))


# --------------------------------------------------------------------------
# One-time parameter packing (BN/pos-emb fold, bias folds, slab packing)
# --------------------------------------------------------------------------
def pack_params(p):
    scale = 1.0 / math.sqrt(HEAD_DIM)

    # BatchNorm1d eval -> per-feature scale/shift, split raw / pos-emb groups
    bn_scale = p["bn_g"] * jax.lax.rsqrt(p["bn_v"] + EPS)                 # (1, 15)
    bn_shift = p["bn_b"] - p["bn_m"] * bn_scale
    bns_r, bns_p = bn_scale[:, :RAW_FEAT_DIM], bn_scale[:, RAW_FEAT_DIM:]
    bnb_r, bnb_p = bn_shift[:, :RAW_FEAT_DIM], bn_shift[:, RAW_FEAT_DIM:]

    fw_r = p["feat_w"][:RAW_FEAT_DIM]                                     # (11, 32)
    fw_p = p["feat_w"][RAW_FEAT_DIM:]                                     # (4, 32)
    fw_r_fold = bns_r.T * fw_r                                            # diag(bns_r) @ fw_r
    pos_tab = (p["pos_emb"] * bns_p + bnb_p) @ fw_p                       # (19, 32) folded table
    fb_fold = p["feat_b"] + bnb_r @ fw_r                                  # (1, 32)

    m32 = jnp.zeros((M32_ROWS, MODEL_DIM), jnp.float32)
    m128 = jnp.zeros((M128_ROWS, DIM_FF), jnp.float32)
    vec = jnp.zeros((VEC_ROWS, DIM_FF), jnp.float32)

    m32 = m32.at[M_FWR:M_FWR + RAW_FEAT_DIM, :].set(fw_r_fold)
    m32 = m32.at[M_POST:M_POST + N_POSITIONS, :].set(pos_tab)
    vec = vec.at[V_FB, :MODEL_DIM].set(fb_fold[0])
    vec = vec.at[V_FLG, :MODEL_DIM].set(p["feat_ln_g"][0])
    vec = vec.at[V_FLB, :MODEL_DIM].set(p["feat_ln_b"][0])

    for l, lyr in enumerate(p["layers"]):
        mb = M_LAYER_BASE + l * M_LAYER_STRIDE
        vb = V_LAYER_BASE + l * V_LAYER_STRIDE
        wq = lyr["wqkv"][:, 0:MODEL_DIM] * scale                          # Q pre-scaled
        wk = lyr["wqkv"][:, MODEL_DIM:2 * MODEL_DIM]
        wv = lyr["wqkv"][:, 2 * MODEL_DIM:]
        bq = lyr["bqkv"][:, 0:MODEL_DIM] * scale
        bv = lyr["bqkv"][:, 2 * MODEL_DIM:]
        wo = lyr["wo"]
        # V bias folded into the attention output bias (softmax rows sum to 1);
        # K bias is softmax-invariant and dropped.
        bo_fold = (lyr["bo"] + bv[:, :HEAD_DIM] @ wo[:HEAD_DIM]
                   + bv[:, HEAD_DIM:] @ wo[HEAD_DIM:])

        m32 = m32.at[mb + MW_Q0:mb + MW_Q0 + MODEL_DIM, :HEAD_DIM].set(wq[:, :HEAD_DIM])
        m32 = m32.at[mb + MW_Q1:mb + MW_Q1 + MODEL_DIM, :HEAD_DIM].set(wq[:, HEAD_DIM:])
        m32 = m32.at[mb + MW_K0:mb + MW_K0 + MODEL_DIM, :HEAD_DIM].set(wk[:, :HEAD_DIM])
        m32 = m32.at[mb + MW_K1:mb + MW_K1 + MODEL_DIM, :HEAD_DIM].set(wk[:, HEAD_DIM:])
        m32 = m32.at[mb + MW_V0:mb + MW_V0 + MODEL_DIM, :HEAD_DIM].set(wv[:, :HEAD_DIM])
        m32 = m32.at[mb + MW_V1:mb + MW_V1 + MODEL_DIM, :HEAD_DIM].set(wv[:, HEAD_DIM:])
        m32 = m32.at[mb + MW_WO:mb + MW_WO + MODEL_DIM, :].set(wo)
        m32 = m32.at[mb + MW_W2:mb + MW_W2 + DIM_FF, :].set(lyr["w2"])
        m128 = m128.at[l * MODEL_DIM:(l + 1) * MODEL_DIM, :].set(lyr["w1"])

        vec = vec.at[vb + VO_BQ0, :HEAD_DIM].set(bq[0, :HEAD_DIM])
        vec = vec.at[vb + VO_BQ1, :HEAD_DIM].set(bq[0, HEAD_DIM:])
        vec = vec.at[vb + VO_BO, :MODEL_DIM].set(bo_fold[0])
        vec = vec.at[vb + VO_L1G, :MODEL_DIM].set(lyr["ln1_g"][0])
        vec = vec.at[vb + VO_L1B, :MODEL_DIM].set(lyr["ln1_b"][0])
        vec = vec.at[vb + VO_B1, :DIM_FF].set(lyr["b1"][0])
        vec = vec.at[vb + VO_B2, :MODEL_DIM].set(lyr["b2"][0])
        vec = vec.at[vb + VO_L2G, :MODEL_DIM].set(lyr["ln2_g"][0])
        vec = vec.at[vb + VO_L2B, :MODEL_DIM].set(lyr["ln2_b"][0])

    m32 = m32.at[M_ZW:M_ZW + Z_INPUT_DIM, :Z_DIM].set(p["z_w"])
    m32 = m32.at[M_DWH:M_DWH + MODEL_DIM, :DEC_DIM].set(p["dec_w"][:MODEL_DIM])
    m32 = m32.at[M_DWZ:M_DWZ + Z_DIM, :DEC_DIM].set(p["dec_w"][MODEL_DIM:])

    vec = vec.at[V_ZL0G, :Z_INPUT_DIM].set(p["z_ln0_g"][0])
    vec = vec.at[V_ZL0B, :Z_INPUT_DIM].set(p["z_ln0_b"][0])
    vec = vec.at[V_ZB, :Z_DIM].set(p["z_b"][0])
    vec = vec.at[V_ZL1G, :Z_DIM].set(p["z_ln1_g"][0])
    vec = vec.at[V_ZL1B, :Z_DIM].set(p["z_ln1_b"][0])
    vec = vec.at[V_DB, :DEC_DIM].set(p["dec_b"][0])
    vec = vec.at[V_DLG, :DEC_DIM].set(p["dec_ln_g"][0])
    vec = vec.at[V_DLB, :DEC_DIM].set(p["dec_ln_b"][0])
    vec = vec.at[V_FCW, :DEC_DIM].set(p["fc_w"][:, 0])
    vec = vec.at[V_FCB, :1].set(p["fc_b"][0])
    return m32, m128, vec


# --------------------------------------------------------------------------
# Forward: one pallas_call, grid=(1,), 4 input DMAs, no scratch
# --------------------------------------------------------------------------
@jax.jit
def forward(m32, m128, vec, x, z):
    b, s, _ = x.shape
    bs = b * s
    x_raw = x[:, :, :RAW_FEAT_DIM].reshape(bs, RAW_FEAT_DIM)
    pos = x[:, :, RAW_FEAT_DIM:RAW_FEAT_DIM + 1].reshape(bs, 1)           # float pos ids
    z_flat = z.reshape(bs, Z_INPUT_DIM)
    act = jnp.concatenate([x_raw, pos, z_flat], axis=1)                   # (24, 18) activation slab

    out = pl.pallas_call(
        fused_forward_kernel,
        out_shape=jax.ShapeDtypeStruct((1, bs), jnp.float32),
        grid=(1,),
        in_specs=[
            pl.BlockSpec((bs, ACT_COLS), lambda i: (0, 0)),
            pl.BlockSpec((M32_ROWS, MODEL_DIM), lambda i: (0, 0)),
            pl.BlockSpec((M128_ROWS, DIM_FF), lambda i: (0, 0)),
            pl.BlockSpec((VEC_ROWS, DIM_FF), lambda i: (0, 0)),
        ],
        out_specs=pl.BlockSpec((1, bs), lambda i: (0, 0)),
        compiler_params=pltpu.CompilerParams(dimension_semantics=("arbitrary",)),
    )(act, m32, m128, vec)

    # squeeze -> [:, :11] (sigmoid already applied in-kernel; commutes with slicing)
    return out.reshape(b, s)[:, :11]


# --------------------------------------------------------------------------
# Deterministic parameter init (synthetic; mirrors the module's shapes)
# --------------------------------------------------------------------------
def init_params(key):
    def nrm(k, shape, scale=0.1):
        return scale * jax.random.normal(k, shape, dtype=jnp.float32)

    keys = iter(jax.random.split(key, 64))
    p = {}
    p["pos_emb"] = nrm(next(keys), (N_POSITIONS, POS_EMB_DIM), 0.5)

    p["bn_g"] = 1.0 + nrm(next(keys), (1, F_DIM), 0.05)
    p["bn_b"] = nrm(next(keys), (1, F_DIM), 0.05)
    p["bn_m"] = nrm(next(keys), (1, F_DIM), 0.1)
    p["bn_v"] = 1.0 + 0.3 * jax.random.uniform(next(keys), (1, F_DIM), dtype=jnp.float32)

    p["feat_w"] = nrm(next(keys), (F_DIM, MODEL_DIM))
    p["feat_b"] = nrm(next(keys), (1, MODEL_DIM))
    p["feat_ln_g"] = 1.0 + nrm(next(keys), (1, MODEL_DIM), 0.05)
    p["feat_ln_b"] = nrm(next(keys), (1, MODEL_DIM), 0.05)

    layers = []
    for _ in range(NUM_LAYERS):
        layers.append({
            "wqkv": nrm(next(keys), (MODEL_DIM, 3 * MODEL_DIM)),
            "bqkv": nrm(next(keys), (1, 3 * MODEL_DIM)),
            "wo": nrm(next(keys), (MODEL_DIM, MODEL_DIM)),
            "bo": nrm(next(keys), (1, MODEL_DIM)),
            "ln1_g": 1.0 + nrm(next(keys), (1, MODEL_DIM), 0.05),
            "ln1_b": nrm(next(keys), (1, MODEL_DIM), 0.05),
            "w1": nrm(next(keys), (MODEL_DIM, DIM_FF)),
            "b1": nrm(next(keys), (1, DIM_FF)),
            "w2": nrm(next(keys), (DIM_FF, MODEL_DIM)),
            "b2": nrm(next(keys), (1, MODEL_DIM)),
            "ln2_g": 1.0 + nrm(next(keys), (1, MODEL_DIM), 0.05),
            "ln2_b": nrm(next(keys), (1, MODEL_DIM), 0.05),
        })
    p["layers"] = layers

    p["z_ln0_g"] = 1.0 + nrm(next(keys), (1, Z_INPUT_DIM), 0.05)
    p["z_ln0_b"] = nrm(next(keys), (1, Z_INPUT_DIM), 0.05)
    p["z_w"] = nrm(next(keys), (Z_INPUT_DIM, Z_DIM))
    p["z_b"] = nrm(next(keys), (1, Z_DIM))
    p["z_ln1_g"] = 1.0 + nrm(next(keys), (1, Z_DIM), 0.05)
    p["z_ln1_b"] = nrm(next(keys), (1, Z_DIM), 0.05)

    p["dec_w"] = nrm(next(keys), (CAT_DIM, DEC_DIM))
    p["dec_b"] = nrm(next(keys), (1, DEC_DIM))
    p["dec_ln_g"] = 1.0 + nrm(next(keys), (1, DEC_DIM), 0.05)
    p["dec_ln_b"] = nrm(next(keys), (1, DEC_DIM), 0.05)
    p["fc_w"] = nrm(next(keys), (DEC_DIM, OUTPUT_DIM))
    p["fc_b"] = nrm(next(keys), (1, OUTPUT_DIM))
    return p


# --------------------------------------------------------------------------
# Pure-JAX reference (same math, un-fused, un-folded) for the self-check
# --------------------------------------------------------------------------
def _ln_ref(x, g, b):
    mu = jnp.mean(x, axis=-1, keepdims=True)
    var = jnp.mean((x - mu) ** 2, axis=-1, keepdims=True)
    return (x - mu) * jax.lax.rsqrt(var + EPS) * g + b


def forward_ref(p, x, z):
    pos_ids = x[:, :, -1].astype(jnp.int32)
    pos_embs = jnp.take(p["pos_emb"], pos_ids, axis=0)
    h = jnp.concatenate([x[:, :, :-1], pos_embs], axis=2)
    h = (h - p["bn_m"]) * jax.lax.rsqrt(p["bn_v"] + EPS) * p["bn_g"] + p["bn_b"]
    h = _ln_ref(jnp.maximum(h @ p["feat_w"] + p["feat_b"], 0.0), p["feat_ln_g"], p["feat_ln_b"])
    for lyr in p["layers"]:
        qkv = h @ lyr["wqkv"] + lyr["bqkv"]
        q, k, v = jnp.split(qkv, 3, axis=-1)

        def heads(t):
            return t.reshape(B, S, NUM_HEADS, HEAD_DIM).transpose(0, 2, 1, 3)

        qh, kh, vh = heads(q), heads(k), heads(v)
        sc = jnp.einsum("bhqd,bhkd->bhqk", qh, kh) / math.sqrt(HEAD_DIM)
        a = jax.nn.softmax(sc, axis=-1)
        ctx = jnp.einsum("bhqk,bhkd->bhqd", a, vh).transpose(0, 2, 1, 3).reshape(B, S, MODEL_DIM)
        x1 = _ln_ref(h + ctx @ lyr["wo"] + lyr["bo"], lyr["ln1_g"], lyr["ln1_b"])
        ff = jnp.maximum(x1 @ lyr["w1"] + lyr["b1"], 0.0) @ lyr["w2"] + lyr["b2"]
        h = _ln_ref(x1 + ff, lyr["ln2_g"], lyr["ln2_b"])
    ze = _ln_ref(z, p["z_ln0_g"], p["z_ln0_b"])
    ze = _ln_ref(jnp.maximum(ze @ p["z_w"] + p["z_b"], 0.0), p["z_ln1_g"], p["z_ln1_b"])
    cat = jnp.concatenate([h, ze], axis=2)
    d = _ln_ref(jnp.maximum(cat @ p["dec_w"] + p["dec_b"], 0.0), p["dec_ln_g"], p["dec_ln_b"])
    logits = (d @ p["fc_w"] + p["fc_b"])[..., 0]
    return jax.nn.sigmoid(logits[:, :11])


# --------------------------------------------------------------------------
if __name__ == "__main__":
    key = jax.random.PRNGKey(0)
    k_feat, k_pos, k_z, k_param = jax.random.split(key, 4)

    feats = jax.random.normal(k_feat, (B, S, RAW_FEAT_DIM), dtype=jnp.float32)
    pos_col = jax.random.randint(k_pos, (B, S, 1), 0, N_POSITIONS).astype(jnp.float32)
    x = jnp.concatenate([feats, pos_col], axis=2)          # (2, 12, 12): 11 feats + pos id
    z = jax.random.normal(k_z, (B, S, Z_INPUT_DIM), dtype=jnp.float32)

    params = init_params(k_param)
    m32, m128, vec = pack_params(params)                   # one-time weight packing

    out = jax.block_until_ready(forward(m32, m128, vec, x, z))
    ref = jax.block_until_ready(forward_ref(params, x, z))

    assert out.shape == (B, 11), out.shape
    assert bool(jnp.all(jnp.isfinite(out)))
    max_err = float(jnp.max(jnp.abs(out - ref)))
    assert max_err < 5e-3, max_err

    print("KERNEL_OK")
</pallas_src>

<mosaic_0001>
module attributes {stable_mosaic.version = 11 : i64} {
  func.func @fused_forward_kernel(%arg0: i32, %arg1: memref<24x18xf32, #tpu.memory_space<vmem>>, %arg2: memref<792x32xf32, #tpu.memory_space<vmem>>, %arg3: memref<64x128xf32, #tpu.memory_space<vmem>>, %arg4: memref<32x128xf32, #tpu.memory_space<vmem>>, %arg5: memref<1x24xf32, #tpu.memory_space<vmem>>) attributes {dimension_semantics = [#tpu.dimension_semantics<arbitrary>], iteration_bounds = array<i64: 1>, scalar_prefetch = 0 : i64, scratch_operands = 0 : i64, tpu.core_type = #tpu.core_type<tc>, window_params = [{pipeline_mode = #tpu.pipeline_mode<synchronous>, transform_indices = @transform_0, window_bounds = array<i64: 24, 18>}, {pipeline_mode = #tpu.pipeline_mode<synchronous>, transform_indices = @transform_1, window_bounds = array<i64: 792, 32>}, {pipeline_mode = #tpu.pipeline_mode<synchronous>, transform_indices = @transform_2, window_bounds = array<i64: 64, 128>}, {pipeline_mode = #tpu.pipeline_mode<synchronous>, transform_indices = @transform_3, window_bounds = array<i64: 32, 128>}, {pipeline_mode = #tpu.pipeline_mode<synchronous>, transform_indices = @transform_4, window_bounds = array<i64: 1, 24>}]} {
    %c0 = arith.constant 0 : index
    %c0_0 = arith.constant 0 : index
    %0 = vector.load %arg1[%c0, %c0_0] : memref<24x18xf32, #tpu.memory_space<vmem>>, vector<24x18xf32>
    %1 = vector.extract_strided_slice %0 {offsets = [0, 0], sizes = [24, 11], strides = [1, 1]} : vector<24x18xf32> to vector<24x11xf32>
    %2 = vector.extract_strided_slice %0 {offsets = [0, 11], sizes = [24, 1], strides = [1, 1]} : vector<24x18xf32> to vector<24x1xf32>
    %3 = arith.fptosi %2 : vector<24x1xf32> to vector<24x1xi32>
    %4 = vector.extract_strided_slice %0 {offsets = [0, 12], sizes = [24, 6], strides = [1, 1]} : vector<24x18xf32> to vector<24x6xf32>
    %5 = tpu.iota {dimensions = array<i32: 1>} : vector<24x19xi32>
    %6 = vector.broadcast %3 : vector<24x1xi32> to vector<24x19xi32>
    %7 = arith.cmpi eq, %5, %6 : vector<24x19xi32>
    %8 = arith.extui %7 : vector<24x19xi1> to vector<24x19xi32>
    %9 = arith.sitofp %8 : vector<24x19xi32> to vector<24x19xf32>
    %c0_1 = arith.constant 0 : index
    %c0_2 = arith.constant 0 : index
    %10 = vector.load %arg2[%c0_1, %c0_2] : memref<792x32xf32, #tpu.memory_space<vmem>>, vector<11x32xf32>
    %cst = arith.constant dense<0.000000e+00> : vector<24x32xf32>
    %11 = tpu.matmul %1, %10, %cst {dimension_numbers = #tpu.dot_dimension_numbers<[1], [0], [0], [1], [0, 0, 1, 1], [], []>} : vector<24x11xf32>, vector<11x32xf32>, vector<24x32xf32> -> vector<24x32xf32>
    %c16 = arith.constant 16 : index
    %c0_3 = arith.constant 0 : index
    %12 = vector.load %arg2[%c16, %c0_3] : memref<792x32xf32, #tpu.memory_space<vmem>>, vector<19x32xf32>
    %cst_4 = arith.constant dense<0.000000e+00> : vector<24x32xf32>
    %13 = tpu.matmul %9, %12, %cst_4 {dimension_numbers = #tpu.dot_dimension_numbers<[1], [0], [0], [1], [0, 0, 1, 1], [], []>} : vector<24x19xf32>, vector<19x32xf32>, vector<24x32xf32> -> vector<24x32xf32>
    %14 = arith.addf %11, %13 : vector<24x32xf32>
    %c0_5 = arith.constant 0 : index
    %c0_6 = arith.constant 0 : index
    %15 = vector.load %arg4[%c0_5, %c0_6] : memref<32x128xf32, #tpu.memory_space<vmem>>, vector<1x32xf32>
    %16 = vector.broadcast %15 : vector<1x32xf32> to vector<24x32xf32>
    %17 = arith.addf %14, %16 : vector<24x32xf32>
    %cst_7 = arith.constant 0.000000e+00 : f32
    %18 = vector.broadcast %cst_7 : f32 to vector<24x32xf32>
    %19 = arith.maximumf %17, %18 : vector<24x32xf32>
    %c1 = arith.constant 1 : index
    %c0_8 = arith.constant 0 : index
    %20 = vector.load %arg4[%c1, %c0_8] : memref<32x128xf32, #tpu.memory_space<vmem>>, vector<1x32xf32>
    %c2 = arith.constant 2 : index
    %c0_9 = arith.constant 0 : index
    %21 = vector.load %arg4[%c2, %c0_9] : memref<32x128xf32, #tpu.memory_space<vmem>>, vector<1x32xf32>
    %cst_10 = arith.constant dense<0.000000e+00> : vector<24xf32>
    %22 = vector.multi_reduction <add>, %19, %cst_10 [1] : vector<24x32xf32> to vector<24xf32>
    %23 = vector.shape_cast %22 : vector<24xf32> to vector<24x1xf32>
    %cst_11 = arith.constant 3.200000e+01 : f32
    %24 = vector.broadcast %cst_11 : f32 to vector<24x1xf32>
    %25 = arith.divf %23, %24 : vector<24x1xf32>
    %26 = vector.broadcast %25 : vector<24x1xf32> to vector<24x32xf32>
    %27 = arith.subf %19, %26 : vector<24x32xf32>
    %28 = arith.mulf %27, %27 : vector<24x32xf32>
    %cst_12 = arith.constant dense<0.000000e+00> : vector<24xf32>
    %29 = vector.multi_reduction <add>, %28, %cst_12 [1] : vector<24x32xf32> to vector<24xf32>
    %30 = vector.shape_cast %29 : vector<24xf32> to vector<24x1xf32>
    %cst_13 = arith.constant 3.200000e+01 : f32
    %31 = vector.broadcast %cst_13 : f32 to vector<24x1xf32>
    %32 = arith.divf %30, %31 : vector<24x1xf32>
    %33 = vector.broadcast %25 : vector<24x1xf32> to vector<24x32xf32>
    %34 = arith.subf %19, %33 : vector<24x32xf32>
    %cst_14 = arith.constant 9.99999974E-6 : f32
    %35 = vector.broadcast %cst_14 : f32 to vector<24x1xf32>
    %36 = arith.addf %32, %35 : vector<24x1xf32>
    %37 = math.rsqrt %36 : vector<24x1xf32>
    %38 = vector.broadcast %37 : vector<24x1xf32> to vector<24x32xf32>
    %39 = arith.mulf %34, %38 : vector<24x32xf32>
    %40 = vector.broadcast %20 : vector<1x32xf32> to vector<24x32xf32>
    %41 = arith.mulf %39, %40 : vector<24x32xf32>
    %42 = vector.broadcast %21 : vector<1x32xf32> to vector<24x32xf32>
    %43 = arith.addf %41, %42 : vector<24x32xf32>
    %44 = tpu.iota {dimensions = array<i32: 0>} : vector<48x48xi32>
    %45 = tpu.iota {dimensions = array<i32: 1>} : vector<48x48xi32>
    %c12_i32 = arith.constant 12 : i32
    %46 = vector.broadcast %c12_i32 : i32 to vector<48x48xi32>
    %47 = arith.cmpi sge, %44, %46 : vector<48x48xi32>
    %48 = arith.extui %47 : vector<48x48xi1> to vector<48x48xi32>
    %c24_i32 = arith.constant 24 : i32
    %49 = vector.broadcast %c24_i32 : i32 to vector<48x48xi32>
    %50 = arith.cmpi sge, %44, %49 : vector<48x48xi32>
    %51 = arith.extui %50 : vector<48x48xi1> to vector<48x48xi32>
    %52 = arith.addi %48, %51 : vector<48x48xi32>
    %c36_i32 = arith.constant 36 : i32
    %53 = vector.broadcast %c36_i32 : i32 to vector<48x48xi32>
    %54 = arith.cmpi sge, %44, %53 : vector<48x48xi32>
    %55 = arith.extui %54 : vector<48x48xi1> to vector<48x48xi32>
    %56 = arith.addi %52, %55 : vector<48x48xi32>
    %c12_i32_15 = arith.constant 12 : i32
    %57 = vector.broadcast %c12_i32_15 : i32 to vector<48x48xi32>
    %58 = arith.cmpi sge, %45, %57 : vector<48x48xi32>
    %59 = arith.extui %58 : vector<48x48xi1> to vector<48x48xi32>
    %c24_i32_16 = arith.constant 24 : i32
    %60 = vector.broadcast %c24_i32_16 : i32 to vector<48x48xi32>
    %61 = arith.cmpi sge, %45, %60 : vector<48x48xi32>
    %62 = arith.extui %61 : vector<48x48xi1> to vector<48x48xi32>
    %63 = arith.addi %59, %62 : vector<48x48xi32>
    %c36_i32_17 = arith.constant 36 : i32
    %64 = vector.broadcast %c36_i32_17 : i32 to vector<48x48xi32>
    %65 = arith.cmpi sge, %45, %64 : vector<48x48xi32>
    %66 = arith.extui %65 : vector<48x48xi1> to vector<48x48xi32>
    %67 = arith.addi %63, %66 : vector<48x48xi32>
    %68 = arith.cmpi eq, %56, %67 : vector<48x48xi32>
    %cst_18 = arith.constant 0.000000e+00 : f32
    %cst_19 = arith.constant -1.000000e+30 : f32
    %69 = vector.broadcast %cst_18 : f32 to vector<48x48xf32>
    %70 = vector.broadcast %cst_19 : f32 to vector<48x48xf32>
    %71 = arith.select %68, %69, %70 : vector<48x48xi1>, vector<48x48xf32>
    %c40 = arith.constant 40 : index
    %c0_20 = arith.constant 0 : index
    %72 = vector.load %arg2[%c40, %c0_20] : memref<792x32xf32, #tpu.memory_space<vmem>>, vector<32x16xf32>
    %cst_21 = arith.constant dense<0.000000e+00> : vector<24x16xf32>
    %73 = tpu.matmul %43, %72, %cst_21 {dimension_numbers = #tpu.dot_dimension_numbers<[1], [0], [0], [1], [0, 0, 1, 1], [], []>} : vector<24x32xf32>, vector<32x16xf32>, vector<24x16xf32> -> vector<24x16xf32>
    %c3 = arith.constant 3 : index
    %c0_22 = arith.constant 0 : index
    %74 = vector.load %arg4[%c3, %c0_22] : memref<32x128xf32, #tpu.memory_space<vmem>>, vector<1x16xf32>
    %75 = vector.broadcast %74 : vector<1x16xf32> to vector<24x16xf32>
    %76 = arith.addf %73, %75 : vector<24x16xf32>
    %c72 = arith.constant 72 : index
    %c0_23 = arith.constant 0 : index
    %77 = vector.load %arg2[%c72, %c0_23] : memref<792x32xf32, #tpu.memory_space<vmem>>, vector<32x16xf32>
    %cst_24 = arith.constant dense<0.000000e+00> : vector<24x16xf32>
    %78 = tpu.matmul %43, %77, %cst_24 {dimension_numbers = #tpu.dot_dimension_numbers<[1], [0], [0], [1], [0, 0, 1, 1], [], []>} : vector<24x32xf32>, vector<32x16xf32>, vector<24x16xf32> -> vector<24x16xf32>
    %c4 = arith.constant 4 : index
    %c0_25 = arith.constant 0 : index
    %79 = vector.load %arg4[%c4, %c0_25] : memref<32x128xf32, #tpu.memory_space<vmem>>, vector<1x16xf32>
    %80 = vector.broadcast %79 : vector<1x16xf32> to vector<24x16xf32>
    %81 = arith.addf %78, %80 : vector<24x16xf32>
    %c104 = arith.constant 104 : index
    %c0_26 = arith.constant 0 : index
    %82 = vector.load %arg2[%c104, %c0_26] : memref<792x32xf32, #tpu.memory_space<vmem>>, vector<32x16xf32>
    %cst_27 = arith.constant dense<0.000000e+00> : vector<24x16xf32>
    %83 = tpu.matmul %43, %82, %cst_27 {dimension_numbers = #tpu.dot_dimension_numbers<[1], [0], [0], [1], [0, 0, 1, 1], [], []>} : vector<24x32xf32>, vector<32x16xf32>, vector<24x16xf32> -> vector<24x16xf32>
    %c136 = arith.constant 136 : index
    %c0_28 = arith.constant 0 : index
    %84 = vector.load %arg2[%c136, %c0_28] : memref<792x32xf32, #tpu.memory_space<vmem>>, vector<32x16xf32>
    %cst_29 = arith.constant dense<0.000000e+00> : vector<24x16xf32>
    %85 = tpu.matmul %43, %84, %cst_29 {dimension_numbers = #tpu.dot_dimension_numbers<[1], [0], [0], [1], [0, 0, 1, 1], [], []>} : vector<24x32xf32>, vector<32x16xf32>, vector<24x16xf32> -> vector<24x16xf32>
    %c168 = arith.constant 168 : index
    %c0_30 = arith.constant 0 : index
    %86 = vector.load %arg2[%c168, %c0_30] : memref<792x32xf32, #tpu.memory_space<vmem>>, vector<32x16xf32>
    %cst_31 = arith.constant dense<0.000000e+00> : vector<24x16xf32>
    %87 = tpu.matmul %43, %86, %cst_31 {dimension_numbers = #tpu.dot_dimension_numbers<[1], [0], [0], [1], [0, 0, 1, 1], [], []>} : vector<24x32xf32>, vector<32x16xf32>, vector<24x16xf32> -> vector<24x16xf32>
    %c200 = arith.constant 200 : index
    %c0_32 = arith.constant 0 : index
    %88 = vector.load %arg2[%c200, %c0_32] : memref<792x32xf32, #tpu.memory_space<vmem>>, vector<32x16xf32>
    %cst_33 = arith.constant dense<0.000000e+00> : vector<24x16xf32>
    %89 = tpu.matmul %43, %88, %cst_33 {dimension_numbers = #tpu.dot_dimension_numbers<[1], [0], [0], [1], [0, 0, 1, 1], [], []>} : vector<24x32xf32>, vector<32x16xf32>, vector<24x16xf32> -> vector<24x16xf32>
    %90 = tpu.concatenate %76, %81 in 0 : vector<24x16xf32>, vector<24x16xf32> -> vector<48x16xf32>
    %91 = tpu.concatenate %83, %85 in 0 : vector<24x16xf32>, vector<24x16xf32> -> vector<48x16xf32>
    %92 = tpu.concatenate %87, %89 in 0 : vector<24x16xf32>, vector<24x16xf32> -> vector<48x16xf32>
    %cst_34 = arith.constant dense<0.000000e+00> : vector<48x48xf32>
    %93 = tpu.matmul %90, %91, %cst_34 {dimension_numbers = #tpu.dot_dimension_numbers<[1], [1], [0], [0], [0, 0, 1, 0], [], []>} : vector<48x16xf32>, vector<48x16xf32>, vector<48x48xf32> -> vector<48x48xf32>
    %94 = arith.addf %93, %71 : vector<48x48xf32>
    %cst_35 = arith.constant dense<0xFF800000> : vector<48xf32>
    %95 = vector.multi_reduction <maximumf>, %94, %cst_35 [1] : vector<48x48xf32> to vector<48xf32>
    %96 = vector.shape_cast %95 : vector<48xf32> to vector<48x1xf32>
    %97 = vector.broadcast %96 : vector<48x1xf32> to vector<48x48xf32>
    %98 = arith.subf %94, %97 : vector<48x48xf32>
    %99 = math.exp %98 : vector<48x48xf32>
    %cst_36 = arith.constant dense<0.000000e+00> : vector<48xf32>
    %100 = vector.multi_reduction <add>, %99, %cst_36 [1] : vector<48x48xf32> to vector<48xf32>
    %101 = vector.shape_cast %100 : vector<48xf32> to vector<48x1xf32>
    %102 = tpu.reciprocal %101 {approx = true} : vector<48x1xf32> -> vector<48x1xf32>
    %103 = vector.broadcast %102 : vector<48x1xf32> to vector<48x48xf32>
    %104 = arith.mulf %99, %103 : vector<48x48xf32>
    %cst_37 = arith.constant dense<0.000000e+00> : vector<48x16xf32>
    %105 = tpu.matmul %104, %92, %cst_37 {dimension_numbers = #tpu.dot_dimension_numbers<[1], [0], [0], [1], [0, 0, 1, 1], [], []>} : vector<48x48xf32>, vector<48x16xf32>, vector<48x16xf32> -> vector<48x16xf32>
    %106 = vector.extract_strided_slice %105 {offsets = [0, 0], sizes = [24, 16], strides = [1, 1]} : vector<48x16xf32> to vector<24x16xf32>
    %c232 = arith.constant 232 : index
    %c0_38 = arith.constant 0 : index
    %107 = vector.load %arg2[%c232, %c0_38] : memref<792x32xf32, #tpu.memory_space<vmem>>, vector<16x32xf32>
    %cst_39 = arith.constant dense<0.000000e+00> : vector<24x32xf32>
    %108 = tpu.matmul %106, %107, %cst_39 {dimension_numbers = #tpu.dot_dimension_numbers<[1], [0], [0], [1], [0, 0, 1, 1], [], []>} : vector<24x16xf32>, vector<16x32xf32>, vector<24x32xf32> -> vector<24x32xf32>
    %109 = vector.extract_strided_slice %105 {offsets = [24, 0], sizes = [24, 16], strides = [1, 1]} : vector<48x16xf32> to vector<24x16xf32>
    %c248 = arith.constant 248 : index
    %c0_40 = arith.constant 0 : index
    %110 = vector.load %arg2[%c248, %c0_40] : memref<792x32xf32, #tpu.memory_space<vmem>>, vector<16x32xf32>
    %cst_41 = arith.constant dense<0.000000e+00> : vector<24x32xf32>
    %111 = tpu.matmul %109, %110, %cst_41 {dimension_numbers = #tpu.dot_dimension_numbers<[1], [0], [0], [1], [0, 0, 1, 1], [], []>} : vector<24x16xf32>, vector<16x32xf32>, vector<24x32xf32> -> vector<24x32xf32>
    %112 = arith.addf %108, %111 : vector<24x32xf32>
    %c5 = arith.constant 5 : index
    %c0_42 = arith.constant 0 : index
    %113 = vector.load %arg4[%c5, %c0_42] : memref<32x128xf32, #tpu.memory_space<vmem>>, vector<1x32xf32>
    %114 = vector.broadcast %113 : vector<1x32xf32> to vector<24x32xf32>
    %115 = arith.addf %112, %114 : vector<24x32xf32>
    %116 = arith.addf %43, %115 : vector<24x32xf32>
    %c6 = arith.constant 6 : index
    %c0_43 = arith.constant 0 : index
    %117 = vector.load %arg4[%c6, %c0_43] : memref<32x128xf32, #tpu.memory_space<vmem>>, vector<1x32xf32>
    %c7 = arith.constant 7 : index
    %c0_44 = arith.constant 0 : index
    %118 = vector.load %arg4[%c7, %c0_44] : memref<32x128xf32, #tpu.memory_space<vmem>>, vector<1x32xf32>
    %cst_45 = arith.constant dense<0.000000e+00> : vector<24xf32>
    %119 = vector.multi_reduction <add>, %116, %cst_45 [1] : vector<24x32xf32> to vector<24xf32>
    %120 = vector.shape_cast %119 : vector<24xf32> to vector<24x1xf32>
    %cst_46 = arith.constant 3.200000e+01 : f32
    %121 = vector.broadcast %cst_46 : f32 to vector<24x1xf32>
    %122 = arith.divf %120, %121 : vector<24x1xf32>
    %123 = vector.broadcast %122 : vector<24x1xf32> to vector<24x32xf32>
    %124 = arith.subf %116, %123 : vector<24x32xf32>
    %125 = arith.mulf %124, %124 : vector<24x32xf32>
    %cst_47 = arith.constant dense<0.000000e+00> : vector<24xf32>
    %126 = vector.multi_reduction <add>, %125, %cst_47 [1] : vector<24x32xf32> to vector<24xf32>
    %127 = vector.shape_cast %126 : vector<24xf32> to vector<24x1xf32>
    %cst_48 = arith.constant 3.200000e+01 : f32
    %128 = vector.broadcast %cst_48 : f32 to vector<24x1xf32>
    %129 = arith.divf %127, %128 : vector<24x1xf32>
    %130 = vector.broadcast %122 : vector<24x1xf32> to vector<24x32xf32>
    %131 = arith.subf %116, %130 : vector<24x32xf32>
    %cst_49 = arith.constant 9.99999974E-6 : f32
    %132 = vector.broadcast %cst_49 : f32 to vector<24x1xf32>
    %133 = arith.addf %129, %132 : vector<24x1xf32>
    %134 = math.rsqrt %133 : vector<24x1xf32>
    %135 = vector.broadcast %134 : vector<24x1xf32> to vector<24x32xf32>
    %136 = arith.mulf %131, %135 : vector<24x32xf32>
    %137 = vector.broadcast %117 : vector<1x32xf32> to vector<24x32xf32>
    %138 = arith.mulf %136, %137 : vector<24x32xf32>
    %139 = vector.broadcast %118 : vector<1x32xf32> to vector<24x32xf32>
    %140 = arith.addf %138, %139 : vector<24x32xf32>
    %c0_50 = arith.constant 0 : index
    %c0_51 = arith.constant 0 : index
    %141 = vector.load %arg3[%c0_50, %c0_51] : memref<64x128xf32, #tpu.memory_space<vmem>>, vector<32x128xf32>
    %cst_52 = arith.constant dense<0.000000e+00> : vector<24x128xf32>
    %142 = tpu.matmul %140, %141, %cst_52 {dimension_numbers = #tpu.dot_dimension_numbers<[1], [0], [0], [1], [0, 0, 1, 1], [], []>} : vector<24x32xf32>, vector<32x128xf32>, vector<24x128xf32> -> vector<24x128xf32>
    %c8 = arith.constant 8 : index
    %c0_53 = arith.constant 0 : index
    %143 = vector.load %arg4[%c8, %c0_53] : memref<32x128xf32, #tpu.memory_space<vmem>>, vector<1x128xf32>
    %144 = vector.broadcast %143 : vector<1x128xf32> to vector<24x128xf32>
    %145 = arith.addf %142, %144 : vector<24x128xf32>
    %cst_54 = arith.constant 0.000000e+00 : f32
    %146 = vector.broadcast %cst_54 : f32 to vector<24x128xf32>
    %147 = arith.maximumf %145, %146 : vector<24x128xf32>
    %c264 = arith.constant 264 : index
    %c0_55 = arith.constant 0 : index
    %148 = vector.load %arg2[%c264, %c0_55] : memref<792x32xf32, #tpu.memory_space<vmem>>, vector<128x32xf32>
    %cst_56 = arith.constant dense<0.000000e+00> : vector<24x32xf32>
    %149 = tpu.matmul %147, %148, %cst_56 {dimension_numbers = #tpu.dot_dimension_numbers<[1], [0], [0], [1], [0, 0, 1, 1], [], []>} : vector<24x128xf32>, vector<128x32xf32>, vector<24x32xf32> -> vector<24x32xf32>
    %c9 = arith.constant 9 : index
    %c0_57 = arith.constant 0 : index
    %150 = vector.load %arg4[%c9, %c0_57] : memref<32x128xf32, #tpu.memory_space<vmem>>, vector<1x32xf32>
    %151 = vector.broadcast %150 : vector<1x32xf32> to vector<24x32xf32>
    %152 = arith.addf %149, %151 : vector<24x32xf32>
    %153 = arith.addf %140, %152 : vector<24x32xf32>
    %c10 = arith.constant 10 : index
    %c0_58 = arith.constant 0 : index
    %154 = vector.load %arg4[%c10, %c0_58] : memref<32x128xf32, #tpu.memory_space<vmem>>, vector<1x32xf32>
    %c11 = arith.constant 11 : index
    %c0_59 = arith.constant 0 : index
    %155 = vector.load %arg4[%c11, %c0_59] : memref<32x128xf32, #tpu.memory_space<vmem>>, vector<1x32xf32>
    %cst_60 = arith.constant dense<0.000000e+00> : vector<24xf32>
    %156 = vector.multi_reduction <add>, %153, %cst_60 [1] : vector<24x32xf32> to vector<24xf32>
    %157 = vector.shape_cast %156 : vector<24xf32> to vector<24x1xf32>
    %cst_61 = arith.constant 3.200000e+01 : f32
    %158 = vector.broadcast %cst_61 : f32 to vector<24x1xf32>
    %159 = arith.divf %157, %158 : vector<24x1xf32>
    %160 = vector.broadcast %159 : vector<24x1xf32> to vector<24x32xf32>
    %161 = arith.subf %153, %160 : vector<24x32xf32>
    %162 = arith.mulf %161, %161 : vector<24x32xf32>
    %cst_62 = arith.constant dense<0.000000e+00> : vector<24xf32>
    %163 = vector.multi_reduction <add>, %162, %cst_62 [1] : vector<24x32xf32> to vector<24xf32>
    %164 = vector.shape_cast %163 : vector<24xf32> to vector<24x1xf32>
    %cst_63 = arith.constant 3.200000e+01 : f32
    %165 = vector.broadcast %cst_63 : f32 to vector<24x1xf32>
    %166 = arith.divf %164, %165 : vector<24x1xf32>
    %167 = vector.broadcast %159 : vector<24x1xf32> to vector<24x32xf32>
    %168 = arith.subf %153, %167 : vector<24x32xf32>
    %cst_64 = arith.constant 9.99999974E-6 : f32
    %169 = vector.broadcast %cst_64 : f32 to vector<24x1xf32>
    %170 = arith.addf %166, %169 : vector<24x1xf32>
    %171 = math.rsqrt %170 : vector<24x1xf32>
    %172 = vector.broadcast %171 : vector<24x1xf32> to vector<24x32xf32>
    %173 = arith.mulf %168, %172 : vector<24x32xf32>
    %174 = vector.broadcast %154 : vector<1x32xf32> to vector<24x32xf32>
    %175 = arith.mulf %173, %174 : vector<24x32xf32>
    %176 = vector.broadcast %155 : vector<1x32xf32> to vector<24x32xf32>
    %177 = arith.addf %175, %176 : vector<24x32xf32>
    %c392 = arith.constant 392 : index
    %c0_65 = arith.constant 0 : index
    %178 = vector.load %arg2[%c392, %c0_65] : memref<792x32xf32, #tpu.memory_space<vmem>>, vector<32x16xf32>
    %cst_66 = arith.constant dense<0.000000e+00> : vector<24x16xf32>
    %179 = tpu.matmul %177, %178, %cst_66 {dimension_numbers = #tpu.dot_dimension_numbers<[1], [0], [0], [1], [0, 0, 1, 1], [], []>} : vector<24x32xf32>, vector<32x16xf32>, vector<24x16xf32> -> vector<24x16xf32>
    %c12 = arith.constant 12 : index
    %c0_67 = arith.constant 0 : index
    %180 = vector.load %arg4[%c12, %c0_67] : memref<32x128xf32, #tpu.memory_space<vmem>>, vector<1x16xf32>
    %181 = vector.broadcast %180 : vector<1x16xf32> to vector<24x16xf32>
    %182 = arith.addf %179, %181 : vector<24x16xf32>
    %c424 = arith.constant 424 : index
    %c0_68 = arith.constant 0 : index
    %183 = vector.load %arg2[%c424, %c0_68] : memref<792x32xf32, #tpu.memory_space<vmem>>, vector<32x16xf32>
    %cst_69 = arith.constant dense<0.000000e+00> : vector<24x16xf32>
    %184 = tpu.matmul %177, %183, %cst_69 {dimension_numbers = #tpu.dot_dimension_numbers<[1], [0], [0], [1], [0, 0, 1, 1], [], []>} : vector<24x32xf32>, vector<32x16xf32>, vector<24x16xf32> -> vector<24x16xf32>
    %c13 = arith.constant 13 : index
    %c0_70 = arith.constant 0 : index
    %185 = vector.load %arg4[%c13, %c0_70] : memref<32x128xf32, #tpu.memory_space<vmem>>, vector<1x16xf32>
    %186 = vector.broadcast %185 : vector<1x16xf32> to vector<24x16xf32>
    %187 = arith.addf %184, %186 : vector<24x16xf32>
    %c456 = arith.constant 456 : index
    %c0_71 = arith.constant 0 : index
    %188 = vector.load %arg2[%c456, %c0_71] : memref<792x32xf32, #tpu.memory_space<vmem>>, vector<32x16xf32>
    %cst_72 = arith.constant dense<0.000000e+00> : vector<24x16xf32>
    %189 = tpu.matmul %177, %188, %cst_72 {dimension_numbers = #tpu.dot_dimension_numbers<[1], [0], [0], [1], [0, 0, 1, 1], [], []>} : vector<24x32xf32>, vector<32x16xf32>, vector<24x16xf32> -> vector<24x16xf32>
    %c488 = arith.constant 488 : index
    %c0_73 = arith.constant 0 : index
    %190 = vector.load %arg2[%c488, %c0_73] : memref<792x32xf32, #tpu.memory_space<vmem>>, vector<32x16xf32>
    %cst_74 = arith.constant dense<0.000000e+00> : vector<24x16xf32>
    %191 = tpu.matmul %177, %190, %cst_74 {dimension_numbers = #tpu.dot_dimension_numbers<[1], [0], [0], [1], [0, 0, 1, 1], [], []>} : vector<24x32xf32>, vector<32x16xf32>, vector<24x16xf32> -> vector<24x16xf32>
    %c520 = arith.constant 520 : index
    %c0_75 = arith.constant 0 : index
    %192 = vector.load %arg2[%c520, %c0_75] : memref<792x32xf32, #tpu.memory_space<vmem>>, vector<32x16xf32>
    %cst_76 = arith.constant dense<0.000000e+00> : vector<24x16xf32>
    %193 = tpu.matmul %177, %192, %cst_76 {dimension_numbers = #tpu.dot_dimension_numbers<[1], [0], [0], [1], [0, 0, 1, 1], [], []>} : vector<24x32xf32>, vector<32x16xf32>, vector<24x16xf32> -> vector<24x16xf32>
    %c552 = arith.constant 552 : index
    %c0_77 = arith.constant 0 : index
    %194 = vector.load %arg2[%c552, %c0_77] : memref<792x32xf32, #tpu.memory_space<vmem>>, vector<32x16xf32>
    %cst_78 = arith.constant dense<0.000000e+00> : vector<24x16xf32>
    %195 = tpu.matmul %177, %194, %cst_78 {dimension_numbers = #tpu.dot_dimension_numbers<[1], [0], [0], [1], [0, 0, 1, 1], [], []>} : vector<24x32xf32>, vector<32x16xf32>, vector<24x16xf32> -> vector<24x16xf32>
    %196 = tpu.concatenate %182, %187 in 0 : vector<24x16xf32>, vector<24x16xf32> -> vector<48x16xf32>
    %197 = tpu.concatenate %189, %191 in 0 : vector<24x16xf32>, vector<24x16xf32> -> vector<48x16xf32>
    %198 = tpu.concatenate %193, %195 in 0 : vector<24x16xf32>, vector<24x16xf32> -> vector<48x16xf32>
    %cst_79 = arith.constant dense<0.000000e+00> : vector<48x48xf32>
    %199 = tpu.matmul %196, %197, %cst_79 {dimension_numbers = #tpu.dot_dimension_numbers<[1], [1], [0], [0], [0, 0, 1, 0], [], []>} : vector<48x16xf32>, vector<48x16xf32>, vector<48x48xf32> -> vector<48x48xf32>
    %200 = arith.addf %199, %71 : vector<48x48xf32>
    %cst_80 = arith.constant dense<0xFF800000> : vector<48xf32>
    %201 = vector.multi_reduction <maximumf>, %200, %cst_80 [1] : vector<48x48xf32> to vector<48xf32>
    %202 = vector.shape_cast %201 : vector<48xf32> to vector<48x1xf32>
    %203 = vector.broadcast %202 : vector<48x1xf32> to vector<48x48xf32>
    %204 = arith.subf %200, %203 : vector<48x48xf32>
    %205 = math.exp %204 : vector<48x48xf32>
    %cst_81 = arith.constant dense<0.000000e+00> : vector<48xf32>
    %206 = vector.multi_reduction <add>, %205, %cst_81 [1] : vector<48x48xf32> to vector<48xf32>
    %207 = vector.shape_cast %206 : vector<48xf32> to vector<48x1xf32>
    %208 = tpu.reciprocal %207 {approx = true} : vector<48x1xf32> -> vector<48x1xf32>
    %209 = vector.broadcast %208 : vector<48x1xf32> to vector<48x48xf32>
    %210 = arith.mulf %205, %209 : vector<48x48xf32>
    %cst_82 = arith.constant dense<0.000000e+00> : vector<48x16xf32>
    %211 = tpu.matmul %210, %198, %cst_82 {dimension_numbers = #tpu.dot_dimension_numbers<[1], [0], [0], [1], [0, 0, 1, 1], [], []>} : vector<48x48xf32>, vector<48x16xf32>, vector<48x16xf32> -> vector<48x16xf32>
    %212 = vector.extract_strided_slice %211 {offsets = [0, 0], sizes = [24, 16], strides = [1, 1]} : vector<48x16xf32> to vector<24x16xf32>
    %c584 = arith.constant 584 : index
    %c0_83 = arith.constant 0 : index
    %213 = vector.load %arg2[%c584, %c0_83] : memref<792x32xf32, #tpu.memory_space<vmem>>, vector<16x32xf32>
    %cst_84 = arith.constant dense<0.000000e+00> : vector<24x32xf32>
    %214 = tpu.matmul %212, %213, %cst_84 {dimension_numbers = #tpu.dot_dimension_numbers<[1], [0], [0], [1], [0, 0, 1, 1], [], []>} : vector<24x16xf32>, vector<16x32xf32>, vector<24x32xf32> -> vector<24x32xf32>
    %215 = vector.extract_strided_slice %211 {offsets = [24, 0], sizes = [24, 16], strides = [1, 1]} : vector<48x16xf32> to vector<24x16xf32>
    %c600 = arith.constant 600 : index
    %c0_85 = arith.constant 0 : index
    %216 = vector.load %arg2[%c600, %c0_85] : memref<792x32xf32, #tpu.memory_space<vmem>>, vector<16x32xf32>
    %cst_86 = arith.constant dense<0.000000e+00> : vector<24x32xf32>
    %217 = tpu.matmul %215, %216, %cst_86 {dimension_numbers = #tpu.dot_dimension_numbers<[1], [0], [0], [1], [0, 0, 1, 1], [], []>} : vector<24x16xf32>, vector<16x32xf32>, vector<24x32xf32> -> vector<24x32xf32>
    %218 = arith.addf %214, %217 : vector<24x32xf32>
    %c14 = arith.constant 14 : index
    %c0_87 = arith.constant 0 : index
    %219 = vector.load %arg4[%c14, %c0_87] : memref<32x128xf32, #tpu.memory_space<vmem>>, vector<1x32xf32>
    %220 = vector.broadcast %219 : vector<1x32xf32> to vector<24x32xf32>
    %221 = arith.addf %218, %220 : vector<24x32xf32>
    %222 = arith.addf %177, %221 : vector<24x32xf32>
    %c15 = arith.constant 15 : index
    %c0_88 = arith.constant 0 : index
    %223 = vector.load %arg4[%c15, %c0_88] : memref<32x128xf32, #tpu.memory_space<vmem>>, vector<1x32xf32>
    %c16_89 = arith.constant 16 : index
    %c0_90 = arith.constant 0 : index
    %224 = vector.load %arg4[%c16_89, %c0_90] : memref<32x128xf32, #tpu.memory_space<vmem>>, vector<1x32xf32>
    %cst_91 = arith.constant dense<0.000000e+00> : vector<24xf32>
    %225 = vector.multi_reduction <add>, %222, %cst_91 [1] : vector<24x32xf32> to vector<24xf32>
    %226 = vector.shape_cast %225 : vector<24xf32> to vector<24x1xf32>
    %cst_92 = arith.constant 3.200000e+01 : f32
    %227 = vector.broadcast %cst_92 : f32 to vector<24x1xf32>
    %228 = arith.divf %226, %227 : vector<24x1xf32>
    %229 = vector.broadcast %228 : vector<24x1xf32> to vector<24x32xf32>
    %230 = arith.subf %222, %229 : vector<24x32xf32>
    %231 = arith.mulf %230, %230 : vector<24x32xf32>
    %cst_93 = arith.constant dense<0.000000e+00> : vector<24xf32>
    %232 = vector.multi_reduction <add>, %231, %cst_93 [1] : vector<24x32xf32> to vector<24xf32>
    %233 = vector.shape_cast %232 : vector<24xf32> to vector<24x1xf32>
    %cst_94 = arith.constant 3.200000e+01 : f32
    %234 = vector.broadcast %cst_94 : f32 to vector<24x1xf32>
    %235 = arith.divf %233, %234 : vector<24x1xf32>
    %236 = vector.broadcast %228 : vector<24x1xf32> to vector<24x32xf32>
    %237 = arith.subf %222, %236 : vector<24x32xf32>
    %cst_95 = arith.constant 9.99999974E-6 : f32
    %238 = vector.broadcast %cst_95 : f32 to vector<24x1xf32>
    %239 = arith.addf %235, %238 : vector<24x1xf32>
    %240 = math.rsqrt %239 : vector<24x1xf32>
    %241 = vector.broadcast %240 : vector<24x1xf32> to vector<24x32xf32>
    %242 = arith.mulf %237, %241 : vector<24x32xf32>
    %243 = vector.broadcast %223 : vector<1x32xf32> to vector<24x32xf32>
    %244 = arith.mulf %242, %243 : vector<24x32xf32>
    %245 = vector.broadcast %224 : vector<1x32xf32> to vector<24x32xf32>
    %246 = arith.addf %244, %245 : vector<24x32xf32>
    %c32 = arith.constant 32 : index
    %c0_96 = arith.constant 0 : index
    %247 = vector.load %arg3[%c32, %c0_96] : memref<64x128xf32, #tpu.memory_space<vmem>>, vector<32x128xf32>
    %cst_97 = arith.constant dense<0.000000e+00> : vector<24x128xf32>
    %248 = tpu.matmul %246, %247, %cst_97 {dimension_numbers = #tpu.dot_dimension_numbers<[1], [0], [0], [1], [0, 0, 1, 1], [], []>} : vector<24x32xf32>, vector<32x128xf32>, vector<24x128xf32> -> vector<24x128xf32>
    %c17 = arith.constant 17 : index
    %c0_98 = arith.constant 0 : index
    %249 = vector.load %arg4[%c17, %c0_98] : memref<32x128xf32, #tpu.memory_space<vmem>>, vector<1x128xf32>
    %250 = vector.broadcast %249 : vector<1x128xf32> to vector<24x128xf32>
    %251 = arith.addf %248, %250 : vector<24x128xf32>
    %cst_99 = arith.constant 0.000000e+00 : f32
    %252 = vector.broadcast %cst_99 : f32 to vector<24x128xf32>
    %253 = arith.maximumf %251, %252 : vector<24x128xf32>
    %c616 = arith.constant 616 : index
    %c0_100 = arith.constant 0 : index
    %254 = vector.load %arg2[%c616, %c0_100] : memref<792x32xf32, #tpu.memory_space<vmem>>, vector<128x32xf32>
    %cst_101 = arith.constant dense<0.000000e+00> : vector<24x32xf32>
    %255 = tpu.matmul %253, %254, %cst_101 {dimension_numbers = #tpu.dot_dimension_numbers<[1], [0], [0], [1], [0, 0, 1, 1], [], []>} : vector<24x128xf32>, vector<128x32xf32>, vector<24x32xf32> -> vector<24x32xf32>
    %c18 = arith.constant 18 : index
    %c0_102 = arith.constant 0 : index
    %256 = vector.load %arg4[%c18, %c0_102] : memref<32x128xf32, #tpu.memory_space<vmem>>, vector<1x32xf32>
    %257 = vector.broadcast %256 : vector<1x32xf32> to vector<24x32xf32>
    %258 = arith.addf %255, %257 : vector<24x32xf32>
    %259 = arith.addf %246, %258 : vector<24x32xf32>
    %c19 = arith.constant 19 : index
    %c0_103 = arith.constant 0 : index
    %260 = vector.load %arg4[%c19, %c0_103] : memref<32x128xf32, #tpu.memory_space<vmem>>, vector<1x32xf32>
    %c20 = arith.constant 20 : index
    %c0_104 = arith.constant 0 : index
    %261 = vector.load %arg4[%c20, %c0_104] : memref<32x128xf32, #tpu.memory_space<vmem>>, vector<1x32xf32>
    %cst_105 = arith.constant dense<0.000000e+00> : vector<24xf32>
    %262 = vector.multi_reduction <add>, %259, %cst_105 [1] : vector<24x32xf32> to vector<24xf32>
    %263 = vector.shape_cast %262 : vector<24xf32> to vector<24x1xf32>
    %cst_106 = arith.constant 3.200000e+01 : f32
    %264 = vector.broadcast %cst_106 : f32 to vector<24x1xf32>
    %265 = arith.divf %263, %264 : vector<24x1xf32>
    %266 = vector.broadcast %265 : vector<24x1xf32> to vector<24x32xf32>
    %267 = arith.subf %259, %266 : vector<24x32xf32>
    %268 = arith.mulf %267, %267 : vector<24x32xf32>
    %cst_107 = arith.constant dense<0.000000e+00> : vector<24xf32>
    %269 = vector.multi_reduction <add>, %268, %cst_107 [1] : vector<24x32xf32> to vector<24xf32>
    %270 = vector.shape_cast %269 : vector<24xf32> to vector<24x1xf32>
    %cst_108 = arith.constant 3.200000e+01 : f32
    %271 = vector.broadcast %cst_108 : f32 to vector<24x1xf32>
    %272 = arith.divf %270, %271 : vector<24x1xf32>
    %273 = vector.broadcast %265 : vector<24x1xf32> to vector<24x32xf32>
    %274 = arith.subf %259, %273 : vector<24x32xf32>
    %cst_109 = arith.constant 9.99999974E-6 : f32
    %275 = vector.broadcast %cst_109 : f32 to vector<24x1xf32>
    %276 = arith.addf %272, %275 : vector<24x1xf32>
    %277 = math.rsqrt %276 : vector<24x1xf32>
    %278 = vector.broadcast %277 : vector<24x1xf32> to vector<24x32xf32>
    %279 = arith.mulf %274, %278 : vector<24x32xf32>
    %280 = vector.broadcast %260 : vector<1x32xf32> to vector<24x32xf32>
    %281 = arith.mulf %279, %280 : vector<24x32xf32>
    %282 = vector.broadcast %261 : vector<1x32xf32> to vector<24x32xf32>
    %283 = arith.addf %281, %282 : vector<24x32xf32>
    %c21 = arith.constant 21 : index
    %c0_110 = arith.constant 0 : index
    %284 = vector.load %arg4[%c21, %c0_110] : memref<32x128xf32, #tpu.memory_space<vmem>>, vector<1x6xf32>
    %c22 = arith.constant 22 : index
    %c0_111 = arith.constant 0 : index
    %285 = vector.load %arg4[%c22, %c0_111] : memref<32x128xf32, #tpu.memory_space<vmem>>, vector<1x6xf32>
    %cst_112 = arith.constant dense<0.000000e+00> : vector<24xf32>
    %286 = vector.multi_reduction <add>, %4, %cst_112 [1] : vector<24x6xf32> to vector<24xf32>
    %287 = vector.shape_cast %286 : vector<24xf32> to vector<24x1xf32>
    %cst_113 = arith.constant 6.000000e+00 : f32
    %288 = vector.broadcast %cst_113 : f32 to vector<24x1xf32>
    %289 = arith.divf %287, %288 : vector<24x1xf32>
    %290 = vector.broadcast %289 : vector<24x1xf32> to vector<24x6xf32>
    %291 = arith.subf %4, %290 : vector<24x6xf32>
    %292 = arith.mulf %291, %291 : vector<24x6xf32>
    %cst_114 = arith.constant dense<0.000000e+00> : vector<24xf32>
    %293 = vector.multi_reduction <add>, %292, %cst_114 [1] : vector<24x6xf32> to vector<24xf32>
    %294 = vector.shape_cast %293 : vector<24xf32> to vector<24x1xf32>
    %cst_115 = arith.constant 6.000000e+00 : f32
    %295 = vector.broadcast %cst_115 : f32 to vector<24x1xf32>
    %296 = arith.divf %294, %295 : vector<24x1xf32>
    %297 = vector.broadcast %289 : vector<24x1xf32> to vector<24x6xf32>
    %298 = arith.subf %4, %297 : vector<24x6xf32>
    %cst_116 = arith.constant 9.99999974E-6 : f32
    %299 = vector.broadcast %cst_116 : f32 to vector<24x1xf32>
    %300 = arith.addf %296, %299 : vector<24x1xf32>
    %301 = math.rsqrt %300 : vector<24x1xf32>
    %302 = vector.broadcast %301 : vector<24x1xf32> to vector<24x6xf32>
    %303 = arith.mulf %298, %302 : vector<24x6xf32>
    %304 = vector.broadcast %284 : vector<1x6xf32> to vector<24x6xf32>
    %305 = arith.mulf %303, %304 : vector<24x6xf32>
    %306 = vector.broadcast %285 : vector<1x6xf32> to vector<24x6xf32>
    %307 = arith.addf %305, %306 : vector<24x6xf32>
    %c744 = arith.constant 744 : index
    %c0_117 = arith.constant 0 : index
    %308 = vector.load %arg2[%c744, %c0_117] : memref<792x32xf32, #tpu.memory_space<vmem>>, vector<6x8xf32>
    %cst_118 = arith.constant dense<0.000000e+00> : vector<24x8xf32>
    %309 = tpu.matmul %307, %308, %cst_118 {dimension_numbers = #tpu.dot_dimension_numbers<[1], [0], [0], [1], [0, 0, 1, 1], [], []>} : vector<24x6xf32>, vector<6x8xf32>, vector<24x8xf32> -> vector<24x8xf32>
    %c23 = arith.constant 23 : index
    %c0_119 = arith.constant 0 : index
    %310 = vector.load %arg4[%c23, %c0_119] : memref<32x128xf32, #tpu.memory_space<vmem>>, vector<1x8xf32>
    %311 = vector.broadcast %310 : vector<1x8xf32> to vector<24x8xf32>
    %312 = arith.addf %309, %311 : vector<24x8xf32>
    %cst_120 = arith.constant 0.000000e+00 : f32
    %313 = vector.broadcast %cst_120 : f32 to vector<24x8xf32>
    %314 = arith.maximumf %312, %313 : vector<24x8xf32>
    %c24 = arith.constant 24 : index
    %c0_121 = arith.constant 0 : index
    %315 = vector.load %arg4[%c24, %c0_121] : memref<32x128xf32, #tpu.memory_space<vmem>>, vector<1x8xf32>
    %c25 = arith.constant 25 : index
    %c0_122 = arith.constant 0 : index
    %316 = vector.load %arg4[%c25, %c0_122] : memref<32x128xf32, #tpu.memory_space<vmem>>, vector<1x8xf32>
    %cst_123 = arith.constant dense<0.000000e+00> : vector<24xf32>
    %317 = vector.multi_reduction <add>, %314, %cst_123 [1] : vector<24x8xf32> to vector<24xf32>
    %318 = vector.shape_cast %317 : vector<24xf32> to vector<24x1xf32>
    %cst_124 = arith.constant 8.000000e+00 : f32
    %319 = vector.broadcast %cst_124 : f32 to vector<24x1xf32>
    %320 = arith.divf %318, %319 : vector<24x1xf32>
    %321 = vector.broadcast %320 : vector<24x1xf32> to vector<24x8xf32>
    %322 = arith.subf %314, %321 : vector<24x8xf32>
    %323 = arith.mulf %322, %322 : vector<24x8xf32>
    %cst_125 = arith.constant dense<0.000000e+00> : vector<24xf32>
    %324 = vector.multi_reduction <add>, %323, %cst_125 [1] : vector<24x8xf32> to vector<24xf32>
    %325 = vector.shape_cast %324 : vector<24xf32> to vector<24x1xf32>
    %cst_126 = arith.constant 8.000000e+00 : f32
    %326 = vector.broadcast %cst_126 : f32 to vector<24x1xf32>
    %327 = arith.divf %325, %326 : vector<24x1xf32>
    %328 = vector.broadcast %320 : vector<24x1xf32> to vector<24x8xf32>
    %329 = arith.subf %314, %328 : vector<24x8xf32>
    %cst_127 = arith.constant 9.99999974E-6 : f32
    %330 = vector.broadcast %cst_127 : f32 to vector<24x1xf32>
    %331 = arith.addf %327, %330 : vector<24x1xf32>
    %332 = math.rsqrt %331 : vector<24x1xf32>
    %333 = vector.broadcast %332 : vector<24x1xf32> to vector<24x8xf32>
    %334 = arith.mulf %329, %333 : vector<24x8xf32>
    %335 = vector.broadcast %315 : vector<1x8xf32> to vector<24x8xf32>
    %336 = arith.mulf %334, %335 : vector<24x8xf32>
    %337 = vector.broadcast %316 : vector<1x8xf32> to vector<24x8xf32>
    %338 = arith.addf %336, %337 : vector<24x8xf32>
    %c752 = arith.constant 752 : index
    %c0_128 = arith.constant 0 : index
    %339 = vector.load %arg2[%c752, %c0_128] : memref<792x32xf32, #tpu.memory_space<vmem>>, vector<32x10xf32>
    %cst_129 = arith.constant dense<0.000000e+00> : vector<24x10xf32>
    %340 = tpu.matmul %283, %339, %cst_129 {dimension_numbers = #tpu.dot_dimension_numbers<[1], [0], [0], [1], [0, 0, 1, 1], [], []>} : vector<24x32xf32>, vector<32x10xf32>, vector<24x10xf32> -> vector<24x10xf32>
    %c784 = arith.constant 784 : index
    %c0_130 = arith.constant 0 : index
    %341 = vector.load %arg2[%c784, %c0_130] : memref<792x32xf32, #tpu.memory_space<vmem>>, vector<8x10xf32>
    %cst_131 = arith.constant dense<0.000000e+00> : vector<24x10xf32>
    %342 = tpu.matmul %338, %341, %cst_131 {dimension_numbers = #tpu.dot_dimension_numbers<[1], [0], [0], [1], [0, 0, 1, 1], [], []>} : vector<24x8xf32>, vector<8x10xf32>, vector<24x10xf32> -> vector<24x10xf32>
    %343 = arith.addf %340, %342 : vector<24x10xf32>
    %c26 = arith.constant 26 : index
    %c0_132 = arith.constant 0 : index
    %344 = vector.load %arg4[%c26, %c0_132] : memref<32x128xf32, #tpu.memory_space<vmem>>, vector<1x10xf32>
    %345 = vector.broadcast %344 : vector<1x10xf32> to vector<24x10xf32>
    %346 = arith.addf %343, %345 : vector<24x10xf32>
    %cst_133 = arith.constant 0.000000e+00 : f32
    %347 = vector.broadcast %cst_133 : f32 to vector<24x10xf32>
    %348 = arith.maximumf %346, %347 : vector<24x10xf32>
    %c27 = arith.constant 27 : index
    %c0_134 = arith.constant 0 : index
    %349 = vector.load %arg4[%c27, %c0_134] : memref<32x128xf32, #tpu.memory_space<vmem>>, vector<1x10xf32>
    %c28 = arith.constant 28 : index
    %c0_135 = arith.constant 0 : index
    %350 = vector.load %arg4[%c28, %c0_135] : memref<32x128xf32, #tpu.memory_space<vmem>>, vector<1x10xf32>
    %cst_136 = arith.constant dense<0.000000e+00> : vector<24xf32>
    %351 = vector.multi_reduction <add>, %348, %cst_136 [1] : vector<24x10xf32> to vector<24xf32>
    %352 = vector.shape_cast %351 : vector<24xf32> to vector<24x1xf32>
    %cst_137 = arith.constant 1.000000e+01 : f32
    %353 = vector.broadcast %cst_137 : f32 to vector<24x1xf32>
    %354 = arith.divf %352, %353 : vector<24x1xf32>
    %355 = vector.broadcast %354 : vector<24x1xf32> to vector<24x10xf32>
    %356 = arith.subf %348, %355 : vector<24x10xf32>
    %357 = arith.mulf %356, %356 : vector<24x10xf32>
    %cst_138 = arith.constant dense<0.000000e+00> : vector<24xf32>
    %358 = vector.multi_reduction <add>, %357, %cst_138 [1] : vector<24x10xf32> to vector<24xf32>
    %359 = vector.shape_cast %358 : vector<24xf32> to vector<24x1xf32>
    %cst_139 = arith.constant 1.000000e+01 : f32
    %360 = vector.broadcast %cst_139 : f32 to vector<24x1xf32>
    %361 = arith.divf %359, %360 : vector<24x1xf32>
    %362 = vector.broadcast %354 : vector<24x1xf32> to vector<24x10xf32>
    %363 = arith.subf %348, %362 : vector<24x10xf32>
    %cst_140 = arith.constant 9.99999974E-6 : f32
    %364 = vector.broadcast %cst_140 : f32 to vector<24x1xf32>
    %365 = arith.addf %361, %364 : vector<24x1xf32>
    %366 = math.rsqrt %365 : vector<24x1xf32>
    %367 = vector.broadcast %366 : vector<24x1xf32> to vector<24x10xf32>
    %368 = arith.mulf %363, %367 : vector<24x10xf32>
    %369 = vector.broadcast %349 : vector<1x10xf32> to vector<24x10xf32>
    %370 = arith.mulf %368, %369 : vector<24x10xf32>
    %371 = vector.broadcast %350 : vector<1x10xf32> to vector<24x10xf32>
    %372 = arith.addf %370, %371 : vector<24x10xf32>
    %c29 = arith.constant 29 : index
    %c0_141 = arith.constant 0 : index
    %373 = vector.load %arg4[%c29, %c0_141] : memref<32x128xf32, #tpu.memory_space<vmem>>, vector<1x10xf32>
    %cst_142 = arith.constant dense<0.000000e+00> : vector<1x24xf32>
    %374 = tpu.matmul %373, %372, %cst_142 {dimension_numbers = #tpu.dot_dimension_numbers<[1], [1], [0], [0], [0, 0, 1, 0], [], []>} : vector<1x10xf32>, vector<24x10xf32>, vector<1x24xf32> -> vector<1x24xf32>
    %c30 = arith.constant 30 : index
    %c0_143 = arith.constant 0 : index
    %375 = vector.load %arg4[%c30, %c0_143] : memref<32x128xf32, #tpu.memory_space<vmem>>, vector<1x1xf32>
    %376 = vector.broadcast %375 : vector<1x1xf32> to vector<1x24xf32>
    %377 = arith.addf %374, %376 : vector<1x24xf32>
    %378 = arith.negf %377 : vector<1x24xf32>
    %379 = math.exp %378 : vector<1x24xf32>
    %cst_144 = arith.constant 1.000000e+00 : f32
    %380 = vector.broadcast %cst_144 : f32 to vector<1x24xf32>
    %381 = arith.addf %380, %379 : vector<1x24xf32>
    %382 = arith.divf %380, %381 : vector<1x24xf32>
    %c0_145 = arith.constant 0 : index
    %c0_146 = arith.constant 0 : index
    %383 = vector.load %arg5[%c0_145, %c0_146] : memref<1x24xf32, #tpu.memory_space<vmem>>, vector<1x24xf32>
    tpu.vector_store %arg5[%c0_145, %c0_146], %382 {strides = array<i32>} : memref<1x24xf32, #tpu.memory_space<vmem>>, vector<1x24xf32>,
    return
  }
  func.func @transform_0(%arg0: i32) -> (i32, i32) {
    %c0_i32 = arith.constant 0 : i32
    %c0_i32_0 = arith.constant 0 : i32
    %c0_i32_1 = arith.constant 0 : i32
    return %c0_i32, %c0_i32_0 : i32, i32
  }
  func.func @transform_1(%arg0: i32) -> (i32, i32) {
    %c0_i32 = arith.constant 0 : i32
    %c0_i32_0 = arith.constant 0 : i32
    %c0_i32_1 = arith.constant 0 : i32
    return %c0_i32, %c0_i32_0 : i32, i32
  }
  func.func @transform_2(%arg0: i32) -> (i32, i32) {
    %c0_i32 = arith.constant 0 : i32
    %c0_i32_0 = arith.constant 0 : i32
    %c0_i32_1 = arith.constant 0 : i32
    return %c0_i32, %c0_i32_0 : i32, i32
  }
  func.func @transform_3(%arg0: i32) -> (i32, i32) {
    %c0_i32 = arith.constant 0 : i32
    %c0_i32_0 = arith.constant 0 : i32
    %c0_i32_1 = arith.constant 0 : i32
    return %c0_i32, %c0_i32_0 : i32, i32
  }
  func.func @transform_4(%arg0: i32) -> (i32, i32) {
    %c0_i32 = arith.constant 0 : i32
    %c0_i32_0 = arith.constant 0 : i32
    %c0_i32_1 = arith.constant 0 : i32
    return %c0_i32, %c0_i32_0 : i32, i32
  }
}

</mosaic_0001>

<bundles_post_ra>
// kernel: forward.1
= control target key start
LH: loop header
LB: loop body
LE: loop exit
PB: predicated region body
PF: predicated region fallthrough
CT: control target
= control target key end

     0   :  { %vm58_vm0 = vcmask 1042432   ;;  %v2482_v0 = vmov 11   ;;  %vm88_vm4 = vcmask 89088   ;;  %v23_v21 = vlaneseq  ;;  %s2487_s25 = smov 116   ;;  %s2489_s29 = smov 12   ;;  %s3426_s0 = inlined_call_operand.vmem [shape: f32[24,18], index: 0, kind: input, shape index: {}]   ;;  %s3427_s1 = inlined_call_operand.vmem [shape: f32[792,32], index: 1, kind: input, shape index: {}]   ;;  %s3428_s3 = inlined_call_operand.vmem [shape: f32[32,128], index: 3, kind: input, shape index: {}]   ;;  %s3429_s2 = inlined_call_operand.vmem [shape: f32[64,128], index: 2, kind: input, shape index: {}]   ;;  %s3430_s4 = inlined_call_operand.vmem [shape: f32[1,24], index: 4, kind: output, shape index: {}]  }
   0x1   :  { %2338 = vset.pattern.permute.xlu0 %v2482_v0  ;;  %v17_v1 = vld [vmem:[%s3426_s0] sm:$0xff]  ;;  %v18_v2 = vld [vmem:[%s3426_s0 + $0x8] sm:$0xff]  ;;  %2339 = vset.pattern.permute.xlu1 %v2482_v0  ;;  %v19_v3 = vld [vmem:[%s3426_s0 + $0x10] sm:$0xff]  ;;  %vm48_vm5 = vcmask 154624   ;;  %v2483_v24 = vmov 0.0   ;;  %vm137_vm9 = vcmask 261120  }
   0x2   :  { %vm2313_vm1 = vcmp.lt.s32.totalorder %v17_v1, 0  ;;  %v2314_v4 = vceil.f32 %v17_v1  ;;  %v2315_v5 = vfloor.f32 %v17_v1  ;;  %v47_v6 = vld [vmem:[%s3427_s1 + $0x20] sm:$0x7]  ;;  %v46_v7 = vld [vmem:[%s3427_s1 + $0x18] sm:$0xff]  ;;  %vm2323_vm2 = vcmp.lt.s32.totalorder %v19_v3, 0  ;;  %v45_v19 = vld [vmem:[%s3427_s1 + $0x10] sm:$0xff] }
   0x3   :  { %v2324_v8 = vceil.f32 %v19_v3  ;;  %2194 = vmatpush.msk.msra.mxu0 %vm58_vm0, %v47_v6  ;;  %v44_v9 = vld [vmem:[%s3427_s1 + $0x8] sm:$0x7]  ;;  %v2319_v11 = vceil.f32 %v18_v2  ;;  %v2320_v12 = vfloor.f32 %v18_v2  ;;  %v2325_v13 = vfloor.f32 %v19_v3  ;;  %v43_v20 = vld [vmem:[%s3427_s1] sm:$0xff] }
   0x4   :  { %v2316_v10 = vsel %vm2313_vm1, %v2314_v4, %v2315_v5  ;;  %2198 = vmatpush.msk.msra.mxu1 %vm58_vm0, %v44_v9  ;;  %2311 = vmatpush.msk.msra.mxu2 %vm58_vm0, %v44_v9  ;;  %vm2318_vm3 = vcmp.lt.s32.totalorder %v18_v2, 0  ;;  %v2545_v22 = vand.u32 127, %v23_v21  ;;  %v2342_v31 = vld [vmem:[%s3428_s3] ss:$0 sm:$0xff]  ;;  %v2484_v49 = vmov 32.0  }
   0x5   :  { %v2317_v14 = vcvt.f32.s32 %v2316_v10  ;;  %76 = vmatpush.msra.mxu0 %v46_v7  ;;  %v2326_v15 = vsel %vm2323_vm2, %v2324_v8, %v2325_v13  ;;  %v2321_v17 = vsel %vm2318_vm3, %v2319_v11, %v2320_v12  ;;  %2371 = vrcp.f32 %v2484_v49  ;;  %v400_v7 = vld [vmem:[%s3427_s1 + $0xa0] sm:$0xff]  ;;  %v296_v11 = vld [vmem:[%s3427_s1 + $0x38] sm:$0xff] }
   0x6   :  { %v2327_v16 = vcvt.f32.s32 %v2326_v15  ;;  %v2322_v18 = vcvt.f32.s32 %v2321_v17  ;;  %116 = vmatpush.msra.mxu1 %v43_v20  ;;  %2312 = vmatpush.msra.mxu2 %v43_v20  ;;  %v297_v8 = vld [vmem:[%s3427_s1 + $0x40] sm:$0xff]  ;;  %v337_v12 = vld [vmem:[%s3427_s1 + $0x58] sm:$0xff]  ;;  %v295_v15 = vld [vmem:[%s3427_s1 + $0x30] sm:$0xff] }
   0x7   :  { %26 = vperm.xlu0 %2338, %v2317_v14   ;;  %77 = vmatpush.msra.mxu0 %v45_v19  ;;  %v338_v9 = vld [vmem:[%s3427_s1 + $0x60] sm:$0xff]  ;;  %v369_v13 = vld [vmem:[%s3427_s1 + $0x78] sm:$0xff]  ;;  %v368_v17 = vld [vmem:[%s3427_s1 + $0x70] sm:$0xff] }
   0x8   :  { %32 = vperm.xlu1 %2339, %v2327_v16   ;;  %2199 = vmatmul.msk.f32.vlgmr.msra.gmra.mxu1 %vm88_vm4, %v17_v1  ;;  %v370_v10 = vld [vmem:[%s3427_s1 + $0x80] sm:$0xff]  ;;  %v399_v14 = vld [vmem:[%s3427_s1 + $0x98] sm:$0xff]  ;;  %v336_v16 = vld [vmem:[%s3427_s1 + $0x50] sm:$0xff] }
   0x9   :  { %2200 = vmatmul.msk.f32.vlgmr.msra.gmra.mxu2 %vm88_vm4, %v18_v2  ;;  %413 = vmatpush.msrb.mxu0 %v400_v7  ;;  %v294_v19 = vld [vmem:[%s3427_s1 + $0x28] sm:$0xff] }
   0xa   :  { %321 = vmatpush.msrb.mxu2 %v297_v8  ;;  %353 = vmatpush.msra.mxu3 %v338_v9  ;;  %v335_v20 = vld [vmem:[%s3427_s1 + $0x48] sm:$0xff] }
   0xb   :  { %v2372_v50 = vpop.eup %2371  ;;  %383 = vmatpush.msrb.mxu1 %v370_v10  ;;  %414 = vmatpush.msrb.mxu0 %v399_v14 }
   0xc   :  { %v148_v51 = vmul.f32 32.0, %v2372_v50  ;;  %vm152_vm10 = vweird.f32 %v2372_v50  ;;  %322 = vmatpush.msrb.mxu2 %v296_v11  ;;  %354 = vmatpush.msra.mxu3 %v337_v12 }
   0xd   :  { %384 = vmatpush.msrb.mxu1 %v369_v13 }
   0xe   :  { %v149_v52 = vsub.f32 1.0, %v148_v51  ;;  %323 = vmatpush.msrb.mxu2 %v295_v15  ;;  %355 = vmatpush.msra.mxu3 %v336_v16 }
   0xf   :  { %29 = vperm.xlu0 %2338, %v2322_v18   ;;  %v398_v18 = vld [vmem:[%s3427_s1 + $0x90] sm:$0xff]  ;;  %385 = vmatpush.msrb.mxu1 %v368_v17 }
  0x10   :  { %v150_v53 = vmul.f32 %v2372_v50, %v149_v52  ;;  %415 = vmatpush.msrb.mxu0 %v398_v18  ;;  %324 = vmatpush.msrb.mxu2 %v294_v19 }
  0x11   :  { %2201 = vmatmul.msk.f32.gmra.mxu2 %vm88_vm4, %v19_v3  ;;  %356 = vmatpush.msra.mxu3 %v335_v20  ;;  %vm487_vm4 = vcmask 130048  }
  0x12   :  { %v151_v54 = vadd.f32 %v2372_v50, %v150_v53  ;;  %v2344_v53 = vld [vmem:[%s3428_s3 + $0x2] ss:$0 sm:$0xff] }
  0x14   :  { %v2556_v55 = vsel %vm152_vm10, %v2372_v50, %v151_v54  ;;  %v2343_v50 = vld [vmem:[%s3428_s3 + $0x1] ss:$0 sm:$0xff] }
  0x79   :  { %v27_v23 = vpop.permute.xlu0 %26 }
  0x7a   :  { %vm34_vm6 = vcmp.eq.s32.totalorder %v2545_v22, %v27_v23  ;;  %v33_v28 = vpop.permute.xlu1 %32  ;;  %v367_v23 = vld [vmem:[%s3427_s1 + $0x68] sm:$0xff] }
  0x7b   :  { %v2191_v25 = vsel %vm34_vm6, 1.0, %v2483_v24  ;;  %vm36_vm8 = vcmp.eq.s32.totalorder %v2545_v22, %v33_v28  ;;  %386 = vmatpush.msrb.mxu1 %v367_v23  ;;  %vm276_vm6 = vcmp.ge.s32.totalorder %v2545_v22, 24 }
  0x7c   :  { %2195 = vmatmul.msk.f32.vlgmr.msra.gmra.mxu0 %vm48_vm5, %v2191_v25  ;;  %v2193_v29 = vsel %vm36_vm8, 1.0, %v2483_v24 }
  0x81   :  { %v30_v26 = vpop.permute.xlu0 %29 }
  0x82   :  { %vm35_vm7 = vcmp.eq.s32.totalorder %v2545_v22, %v30_v26 }
  0x83   :  { %v2192_v27 = vsel %vm35_vm7, 1.0, %v2483_v24  ;;  %v397_v24 = vld [vmem:[%s3427_s1 + $0x88] sm:$0xff]  ;;  %vm279_vm7 = vcmp.ge.s32.totalorder %v2545_v22, 36 }
  0x84   :  { %2196 = vmatmul.msk.f32.gmra.mxu0 %vm48_vm5, %v2192_v27 }
  0x85   :  { %v118_v30 = vpop.f32.mrf.mxu1  ;;  %416 = vmatpush.msrb.mxu0 %v397_v24 }
  0x8c   :  { %2197 = vmatmul.msk.f32.gmra.mxu0 %vm48_vm5, %v2193_v29  ;;  %v121_v35 = vpop.f32.mrf.mxu2  ;;  %vm274_vm5 = vcmp.ge.s32.totalorder %v2545_v22, 12 }
  0x94   :  { %v124_v42 = vpop.f32.mrf.mxu2 }
  0xf9   :  { %v79_v32 = vpop.f32.mrf.mxu0 }
  0xfa   :  { %v119_v33 = vadd.f32 %v118_v30, %v79_v32 }
  0xfc   :  { %v129_v34 = vadd.f32 %v2342_v31, %v119_v33 }
  0xfe   :  { %v132_v36 = vmax.f32 %v129_v34, 0.0  ;;  %v430_v34 = vld [vmem:[%s3427_s1 + $0xc0] sm:$0xff] }
  0xff   :  { %443 = vmatpush.msra.mxu2 %v430_v34 }
 0x100   :  { %v138_v37 = vsel %vm137_vm9, %v132_v36, 0.0 }
 0x101   :  { %139 = vadd.xlane.f32.xlu1 %v138_v37  ;;  %v82_v38 = vpop.f32.mrf.mxu0  ;;  %v459_v37 = vld [vmem:[%s3427_s1 + $0xd8] sm:$0xff] }
 0x102   :  { %v122_v39 = vadd.f32 %v121_v35, %v82_v38  ;;  %v460_v35 = vld [vmem:[%s3427_s1 + $0xe0] sm:$0xff] }
 0x103   :  { %473 = vmatpush.msrb.mxu3 %v460_v35 }
 0x104   :  { %v130_v40 = vadd.f32 %v2342_v31, %v122_v39 }
 0x105   :  { %474 = vmatpush.msrb.mxu3 %v459_v37 }
 0x106   :  { %v133_v41 = vmax.f32 %v130_v40, 0.0  ;;  %v428_v40 = vld [vmem:[%s3427_s1 + $0xb0] sm:$0xff] }
 0x108   :  { %v141_v43 = vsel %vm137_vm9, %v133_v41, 0.0 }
 0x109   :  { %142 = vadd.xlane.f32.xlu2 %v141_v43  ;;  %v85_v44 = vpop.f32.mrf.mxu0 }
 0x10a   :  { %v125_v45 = vadd.f32 %v124_v42, %v85_v44  ;;  %v427_v44 = vld [vmem:[%s3427_s1 + $0xa8] sm:$0xff] }
 0x10c   :  { %v131_v46 = vadd.f32 %v2342_v31, %v125_v45  ;;  %v457_v45 = vld [vmem:[%s3427_s1 + $0xc8] sm:$0xff] }
 0x10e   :  { %v134_v47 = vmax.f32 %v131_v46, 0.0 }
 0x110   :  { %v144_v48 = vsel %vm137_vm9, %v134_v47, 0.0 }
 0x111   :  { %145 = vadd.xlane.f32.xlu2 %v144_v48 }
 0x174   :  { %v140_v56 = vpop.xlane.xlu1 %139 }
 0x175   :  { %v154_v57 = vmul.f32 %v2556_v55, %v140_v56 }
 0x177   :  { %v2559_v58 = vsub.f32 %v132_v36, %v154_v57  ;;  %v429_v36 = vld [vmem:[%s3427_s1 + $0xb8] sm:$0xff] }
 0x178   :  { %444 = vmatpush.msra.mxu2 %v429_v36  ;;  %v2346_v36 = vld [vmem:[%s3428_s3 + $0x4] ss:$0 sm:$0xff] }
 0x179   :  { %v160_v59 = vmul.f32 %v2559_v58, %v2559_v58 }
 0x17a   :  { %445 = vmatpush.msra.mxu2 %v428_v40 }
 0x17b   :  { %v163_v60 = vsel %vm137_vm9, %v160_v59, 0.0 }
 0x17c   :  { %164 = vadd.xlane.f32.xlu0 %v163_v60  ;;  %v143_v61 = vpop.xlane.xlu2 %142  ;;  %446 = vmatpush.msra.mxu2 %v427_v44  ;;  %v220_v44 = vshrl.u32 %v23_v21, 7 }
 0x17d   :  { %v155_v62 = vmul.f32 %v2556_v55, %v143_v61 }
 0x17f   :  { %v2565_v63 = vsub.f32 %v133_v41, %v155_v62  ;;  %v458_v41 = vld [vmem:[%s3427_s1 + $0xd0] sm:$0xff] }
 0x180   :  { %475 = vmatpush.msrb.mxu3 %v458_v41 }
 0x181   :  { %v161_v0 = vmul.f32 %v2565_v63, %v2565_v63 }
 0x182   :  { %476 = vmatpush.msrb.mxu3 %v457_v45 }
 0x183   :  { %v166_v1 = vsel %vm137_vm9, %v161_v0, 0.0 }
 0x184   :  { %167 = vadd.xlane.f32.xlu2 %v166_v1  ;;  %v146_v2 = vpop.xlane.xlu2 %145 }
 0x185   :  { %v156_v3 = vmul.f32 %v2556_v55, %v146_v2 }
 0x187   :  { %v2571_v4 = vsub.f32 %v134_v47, %v156_v3 }
 0x189   :  { %v162_v5 = vmul.f32 %v2571_v4, %v2571_v4 }
 0x18b   :  { %v169_v6 = vsel %vm137_vm9, %v162_v5, 0.0 }
 0x18c   :  { %170 = vadd.xlane.f32.xlu2 %v169_v6 }
 0x1ef   :  { %v165_v25 = vpop.xlane.xlu0 %164 }
 0x1f0   :  { %v172_v26 = vmul.f32 %v165_v25, %v2556_v55 }
 0x1f2   :  { %v175_v27 = vadd.f32 1e-05, %v172_v26 }
 0x1f4   :  { %2373 = vrsqrt.f32 %v175_v27  ;;  %vm184_vm12 = vweird.f32 %v175_v27 }
 0x1f7   :  { %v168_v28 = vpop.xlane.xlu2 %167 }
 0x1f8   :  { %v173_v29 = vmul.f32 %v168_v28, %v2556_v55 }
 0x1fa   :  { %v2374_v30 = vpop.eup %2373  ;;  %v176_v31 = vadd.f32 1e-05, %v173_v29 }
 0x1fb   :  { %v179_v32 = vmul.f32 %v2374_v30, %v175_v27  ;;  %vm185_vm11 = vweird.f32 %v2374_v30  ;;  %v2345_v27 = vld [vmem:[%s3428_s3 + $0x3] ss:$0 sm:$0xff] }
 0x1fc   :  { %2375 = vrsqrt.f32 %v176_v31  ;;  %vm186_vm13 = vmor %vm184_vm12, %vm185_vm11  ;;  %vm194_vm15 = vweird.f32 %v176_v31  ;;  %vm559_vm11 = vcmask 392192  }
 0x1fd   :  { %v180_v33 = vmul.f32 %v2374_v30, %v179_v32 }
 0x1ff   :  { %v181_v38 = vmul.f32 0.5, %v180_v33  ;;  %v171_v39 = vpop.xlane.xlu2 %170  ;;  %v2485_v33 = vmov 0  }
 0x200   :  { %v174_v42 = vmul.f32 %v171_v39, %v2556_v55  ;;  %2340 = vset.pattern.permute.xlu2 %v2485_v33  ;;  %2341 = vset.pattern.permute.xlu0 %v2485_v33  ;;  %v275_v40 = vsel %vm274_vm5, 1, %v2485_v33  ;;  %v277_v41 = vsel %vm276_vm6, 1, %v2485_v33 }
 0x201   :  { %v182_v43 = vsub.f32 1.5, %v181_v38 }
 0x202   :  { %v2376_v46 = vpop.eup %2375  ;;  %v177_v47 = vadd.f32 1e-05, %v174_v42  ;;  %v278_v42 = vadd.s32 %v277_v41, %v275_v40 }
 0x203   :  { %v183_v48 = vmul.f32 %v2374_v30, %v182_v43  ;;  %v189_v49 = vmul.f32 %v2376_v46, %v176_v31  ;;  %vm195_vm14 = vweird.f32 %v2376_v46  ;;  %v280_v43 = vsel %vm279_vm7, 1, %v2485_v33 }
 0x204   :  { %2377 = vrsqrt.f32 %v177_v47  ;;  %vm196_vm0 = vmor %vm194_vm15, %vm195_vm14  ;;  %vm204_vm2 = vweird.f32 %v177_v47  ;;  %v281_v45 = vadd.s32 %v280_v43, %v278_v42 }
 0x205   :  { %v187_v51 = vsel %vm186_vm13, %v2374_v30, %v183_v48  ;;  %v190_v52 = vmul.f32 %v2376_v46, %v189_v49 }
 0x206   :  { %v208_v54 = vmul.f32 %v187_v51, %v2559_v58  ;;  %vm2202_vm8 = vcmp.eq.s32.totalorder %v281_v45, 0  ;;  %vm2203_vm13 = vcmp.eq.s32.totalorder %v281_v45, 1  ;;  %vm2204_vm15 = vcmp.eq.s32.totalorder %v281_v45, 2 }
 0x207   :  { %v191_v56 = vmul.f32 0.5, %v190_v52 }
 0x208   :  { %v212_v57 = vmul.f32 %v2343_v50, %v208_v54 }
 0x209   :  { %v192_v59 = vsub.f32 1.5, %v191_v56  ;;  %v224_v56 = vadd.s32 32, %v220_v44 }
 0x20a   :  { %v2378_v60 = vpop.eup %2377  ;;  %v2658_v61 = vadd.f32 %v2344_v53, %v212_v57 }
 0x20b   :  { %v193_v62 = vmul.f32 %v2376_v46, %v192_v59  ;;  %v199_v0 = vmul.f32 %v2378_v60, %v177_v47  ;;  %vm205_vm1 = vweird.f32 %v2378_v60  ;;  %v2486_v47 = vmov -1e+30  }
 0x20c   :  { %2206 = vmatmul.msk.f32.vlgmr.msrb.gmra.mxu2 %vm137_vm9, %v2658_v61  ;;  %2209 = vmatmul.msk.f32.vlgmr.msra.gmra.mxu3 %vm137_vm9, %v2658_v61  ;;  %vm206_vm3 = vmor %vm204_vm2, %vm205_vm1  ;;  %v2724_v48 = vsel %vm2202_vm8, 0.0, %v2486_v47  ;;  %v2732_v57 = vsel %vm2203_vm13, 0.0, %v2486_v47  ;;  %vm260_vm14 = vcmp.ge.s32.totalorder %v224_v56, 36  ;;  %vm2205_vm1 = vcmp.eq.s32.totalorder %v281_v45, 3 }
 0x20d   :  { %v197_v1 = vsel %vm196_vm0, %v2376_v46, %v193_v62  ;;  %v200_v2 = vmul.f32 %v2378_v60, %v199_v0  ;;  %2212 = vmatmul.msk.f32.vlgmr.msrb.gmra.mxu1 %vm137_vm9, %v2658_v61  ;;  %2215 = vmatmul.msk.f32.vlgmr.msrb.gmra.mxu0 %vm137_vm9, %v2658_v61  ;;  %v221_v46 = vadd.s32 8, %v220_v44  ;;  %v266_v0 = vsel %vm260_vm14, 1, %v2485_v33 }
 0x20e   :  { %v209_v58 = vmul.f32 %v197_v1, %v2565_v63  ;;  %v2736_v1 = vsel %vm2204_vm15, 0.0, %v2486_v47 }
 0x20f   :  { %v201_v3 = vmul.f32 0.5, %v200_v2  ;;  %vm227_vm10 = vcmp.ge.s32.totalorder %v221_v46, 12  ;;  %v272_v2 = vadd.s32 2, %v266_v0 }
 0x210   :  { %v213_v5 = vmul.f32 %v2343_v50, %v209_v58 }
 0x211   :  { %v202_v6 = vsub.f32 1.5, %v201_v3  ;;  %vm286_vm0 = vcmp.eq.s32.totalorder %v272_v2, %v281_v45 }
 0x212   :  { %v2669_v7 = vadd.f32 %v2344_v53, %v213_v5 }
 0x213   :  { %v203_v8 = vmul.f32 %v2378_v60, %v202_v6  ;;  %v2740_v6 = vsel %vm286_vm0, 0.0, %v2486_v47 }
 0x214   :  { %2207 = vmatmul.msk.f32.gmra.mxu2 %vm137_vm9, %v2669_v7  ;;  %2210 = vmatmul.msk.f32.gmra.mxu3 %vm137_vm9, %v2669_v7 }
 0x215   :  { %v207_v9 = vsel %vm206_vm3, %v2378_v60, %v203_v8  ;;  %2213 = vmatmul.msk.f32.gmra.mxu1 %vm137_vm9, %v2669_v7  ;;  %2216 = vmatmul.msk.f32.gmra.mxu0 %vm137_vm9, %v2669_v7 }
 0x216   :  { %v210_v63 = vmul.f32 %v207_v9, %v2571_v4 }
 0x218   :  { %v214_v10 = vmul.f32 %v2343_v50, %v210_v63  ;;  %v233_v50 = vsel %vm227_vm10, 1, %v2485_v33 }
 0x219   :  { %vm283_vm12 = vcmp.eq.s32.totalorder %v233_v50, %v281_v45 }
 0x21a   :  { %v2680_v11 = vadd.f32 %v2344_v53, %v214_v10  ;;  %v2728_v22 = vsel %vm283_vm12, 0.0, %v2486_v47  ;;  %v2744_v10 = vsel %vm2205_vm1, 0.0, %v2486_v47 }
 0x21c   :  { %2208 = vmatmul.msk.f32.gmra.mxu2 %vm137_vm9, %v2680_v11  ;;  %2211 = vmatmul.msk.f32.gmra.mxu3 %vm137_vm9, %v2680_v11 }
 0x21d   :  { %2214 = vmatmul.msk.f32.gmra.mxu1 %vm137_vm9, %v2680_v11  ;;  %2217 = vmatmul.msk.f32.gmra.mxu0 %vm137_vm9, %v2680_v11 }
 0x224   :  { %2218 = vmatmul.msk.f32.vlgmr.msra.gmra.mxu2 %vm137_vm9, %v2658_v61  ;;  %2221 = vmatmul.msk.f32.vlgmr.msrb.gmra.mxu3 %vm137_vm9, %v2658_v61 }
 0x22c   :  { %2219 = vmatmul.msk.f32.gmra.mxu2 %vm137_vm9, %v2669_v7  ;;  %2222 = vmatmul.msk.f32.gmra.mxu3 %vm137_vm9, %v2669_v7 }
 0x234   :  { %2220 = vmatmul.msk.f32.gmra.mxu2 %vm137_vm9, %v2680_v11  ;;  %2223 = vmatmul.msk.f32.gmra.mxu3 %vm137_vm9, %v2680_v11 }
 0x28a   :  { %v418_v4 = vpop.f32.mrf.mxu0  ;;  %v388_v14 = vpop.f32.mrf.mxu1 }
 0x28f   :  { %v326_v12 = vpop.f32.mrf.mxu2  ;;  %v358_v13 = vpop.f32.mrf.mxu3 }
 0x290   :  { %v327_v29 = vadd.f32 %v2345_v27, %v326_v12  ;;  %v359_v37 = vadd.f32 %v2346_v36, %v358_v13 }
 0x292   :  { %v421_v15 = vpop.f32.mrf.mxu0  ;;  %v391_v19 = vpop.f32.mrf.mxu1 }
 0x297   :  { %v329_v16 = vpop.f32.mrf.mxu2  ;;  %v361_v17 = vpop.f32.mrf.mxu3 }
 0x298   :  { %v330_v32 = vadd.f32 %v2345_v27, %v329_v16  ;;  %v362_v38 = vadd.f32 %v2346_v36, %v361_v17 }
 0x29a   :  { %v424_v18 = vpop.f32.mrf.mxu0  ;;  %v394_v24 = vpop.f32.mrf.mxu1 }
 0x29b   :  { %2224 = vmatpush.xpose.msk.msra.mxu1 %vm487_vm4, %v424_v18 }
 0x29f   :  { %2225 = vmatpush.xpose.msk.msra.mxu1 %vm487_vm4, %v421_v15  ;;  %v332_v20 = vpop.f32.mrf.mxu2  ;;  %v364_v23 = vpop.f32.mrf.mxu3 }
 0x2a0   :  { %v333_v35 = vadd.f32 %v2345_v27, %v332_v20  ;;  %v365_v39 = vadd.f32 %v2346_v36, %v364_v23 }
 0x2a3   :  { %2226 = vmatpush.xpose.msk.msra.mxu1 %vm487_vm4, %v418_v4 }
 0x2a7   :  { %2227 = vmatpush.xpose.msk.msra.mxu1 %vm487_vm4, %v394_v24  ;;  %v478_v25 = vpop.f32.mrf.mxu3  ;;  %v448_v26 = vpop.f32.mrf.mxu2 }
 0x2ab   :  { %2228 = vmatpush.xpose.msk.msra.mxu1 %vm487_vm4, %v391_v19 }
 0x2af   :  { %2229 = vmatpush.xpose.msk.msra.mxu1 %vm487_vm4, %v388_v14  ;;  %v481_v28 = vpop.f32.mrf.mxu3  ;;  %v451_v30 = vpop.f32.mrf.mxu2 }
 0x2b2   :  { %2230 = vmatmul.msk.f32.vlgmr.msra.gmra.mxu1 %vm487_vm4, %v327_v29 }
 0x2b7   :  { %v484_v31 = vpop.f32.mrf.mxu3  ;;  %v454_v34 = vpop.f32.mrf.mxu2 }
 0x2b8   :  { %654 = vmatpush.msra.mxu0 %v484_v31 }
 0x2ba   :  { %2231 = vmatmul.msk.f32.gmra.mxu1 %vm487_vm4, %v330_v32  ;;  %655 = vmatpush.msra.mxu0 %v481_v28 }
 0x2bc   :  { %656 = vmatpush.msra.mxu0 %v478_v25 }
 0x2be   :  { %657 = vmatpush.msra.mxu0 %v454_v34 }
 0x2c0   :  { %658 = vmatpush.msra.mxu0 %v451_v30 }
 0x2c2   :  { %2232 = vmatmul.msk.f32.gmra.mxu1 %vm487_vm4, %v333_v35  ;;  %659 = vmatpush.msra.mxu0 %v448_v26 }
 0x2ca   :  { %2233 = vmatmul.msk.f32.gmra.mxu1 %vm487_vm4, %v359_v37 }
 0x2d2   :  { %2234 = vmatmul.msk.f32.gmra.mxu1 %vm487_vm4, %v362_v38 }
 0x2da   :  { %2235 = vmatmul.msk.f32.gmra.mxu1 %vm487_vm4, %v365_v39 }
 0x32f   :  { %v541_v49 = vpop.f32.mrf.mxu1 }
 0x330   :  { %v542_v51 = vadd.f32 %v541_v49, %v2724_v48 }
 0x332   :  { %v560_v52 = vsel %vm559_vm11, %v542_v51, -inf }
 0x333   :  { %561 = vmax.xlane.f32.xlu2 %v560_v52 }
 0x337   :  { %v544_v53 = vpop.f32.mrf.mxu1 }
 0x338   :  { %v545_v21 = vadd.f32 %v544_v53, %v2728_v22 }
 0x33a   :  { %v563_v54 = vsel %vm559_vm11, %v545_v21, -inf }
 0x33b   :  { %564 = vmax.xlane.f32.xlu2 %v563_v54 }
 0x33f   :  { %v547_v59 = vpop.f32.mrf.mxu1 }
 0x340   :  { %v548_v60 = vadd.f32 %v547_v59, %v2732_v57 }
 0x342   :  { %v566_v62 = vsel %vm559_vm11, %v548_v60, -inf }
 0x343   :  { %567 = vmax.xlane.f32.xlu2 %v566_v62 }
 0x347   :  { %v550_v58 = vpop.f32.mrf.mxu1 }
 0x348   :  { %v551_v3 = vadd.f32 %v550_v58, %v2736_v1 }
 0x34a   :  { %v569_v5 = vsel %vm559_vm11, %v551_v3, -inf }
 0x34b   :  { %570 = vmax.xlane.f32.xlu1 %v569_v5 }
 0x34f   :  { %v553_v8 = vpop.f32.mrf.mxu1 }
 0x350   :  { %v554_v9 = vadd.f32 %v553_v8, %v2740_v6 }
 0x352   :  { %v572_v63 = vsel %vm559_vm11, %v554_v9, -inf }
 0x353   :  { %573 = vmax.xlane.f32.xlu2 %v572_v63  ;;  %v682_v63 = vld [vmem:[%s3427_s1 + $0x100] sm:$0xff] }
 0x354   :  { %706 = vmatpush.msrb.mxu2 %v682_v63  ;;  %v894_v63 = vld [vmem:[%s3427_s1 + $0x170] sm:$0xff] }
 0x357   :  { %v556_v4 = vpop.f32.mrf.mxu1 }
 0x358   :  { %v557_v12 = vadd.f32 %v556_v4, %v2744_v10  ;;  %v681_v4 = vld [vmem:[%s3427_s1 + $0xf8] sm:$0xff] }
 0x359   :  { %707 = vmatpush.msrb.mxu2 %v681_v4 }
 0x35a   :  { %v575_v13 = vsel %vm559_vm11, %v557_v12, -inf }
 0x35b   :  { %576 = vmax.xlane.f32.xlu0 %v575_v13 }
 0x3a6   :  { %v562_v14 = vpop.xlane.xlu2 %561 }
 0x3a7   :  { %v578_v15 = vsub.f32 %v542_v51, %v562_v14 }
 0x3a9   :  { %v584_v16 = vmul.f32 1.442695, %v578_v15 }
 0x3ab   :  { %2379 = vpow2.f32 %v584_v16 }
 0x3ae   :  { %v565_v17 = vpop.xlane.xlu2 %564 }
 0x3af   :  { %v579_v18 = vsub.f32 %v545_v21, %v565_v17  ;;  %v680_v21 = vld [vmem:[%s3427_s1 + $0xf0] sm:$0xff] }
 0x3b0   :  { %741 = vmatpush.msra.mxu3 %v680_v21  ;;  %v838_v21 = vld [vmem:[%s3429_s2 + $0x8] sm:$0xff] }
 0x3b1   :  { %v2380_v19 = vpop.eup %2379  ;;  %v586_v20 = vmul.f32 1.442695, %v579_v18 }
 0x3b2   :  { %v596_v23 = vsel %vm559_vm11, %v2380_v19, 0.0 }
 0x3b3   :  { %2381 = vpow2.f32 %v586_v20  ;;  %597 = vadd.xlane.f32.xlu1 %v596_v23 }
 0x3b6   :  { %v568_v24 = vpop.xlane.xlu2 %567 }
 0x3b7   :  { %v580_v25 = vsub.f32 %v548_v60, %v568_v24 }
 0x3b9   :  { %v2382_v26 = vpop.eup %2381  ;;  %v588_v27 = vmul.f32 1.442695, %v580_v25 }
 0x3ba   :  { %v599_v28 = vsel %vm559_vm11, %v2382_v26, 0.0 }
 0x3bb   :  { %2383 = vpow2.f32 %v588_v27  ;;  %600 = vadd.xlane.f32.xlu2 %v599_v28 }
 0x3be   :  { %v571_v29 = vpop.xlane.xlu1 %570 }
 0x3bf   :  { %v581_v30 = vsub.f32 %v551_v3, %v571_v29 }
 0x3c1   :  { %v2384_v31 = vpop.eup %2383  ;;  %v590_v32 = vmul.f32 1.442695, %v581_v30 }
 0x3c2   :  { %v602_v33 = vsel %vm559_vm11, %v2384_v31, 0.0 }
 0x3c3   :  { %2385 = vpow2.f32 %v590_v32  ;;  %603 = vadd.xlane.f32.xlu0 %v602_v33 }
 0x3c6   :  { %v574_v34 = vpop.xlane.xlu2 %573 }
 0x3c7   :  { %v582_v35 = vsub.f32 %v554_v9, %v574_v34  ;;  %v679_v9 = vld [vmem:[%s3427_s1 + $0xe8] sm:$0xff] }
 0x3c8   :  { %742 = vmatpush.msra.mxu3 %v679_v9 }
 0x3c9   :  { %v2386_v36 = vpop.eup %2385  ;;  %v592_v37 = vmul.f32 1.442695, %v582_v35 }
 0x3ca   :  { %v605_v38 = vsel %vm559_vm11, %v2386_v36, 0.0 }
 0x3cb   :  { %2387 = vpow2.f32 %v592_v37  ;;  %606 = vadd.xlane.f32.xlu1 %v605_v38 }
 0x3ce   :  { %v577_v39 = vpop.xlane.xlu0 %576 }
 0x3cf   :  { %v583_v40 = vsub.f32 %v557_v12, %v577_v39 }
 0x3d1   :  { %v2388_v41 = vpop.eup %2387  ;;  %v594_v42 = vmul.f32 1.442695, %v583_v40 }
 0x3d2   :  { %v608_v43 = vsel %vm559_vm11, %v2388_v41, 0.0 }
 0x3d3   :  { %2389 = vpow2.f32 %v594_v42  ;;  %609 = vadd.xlane.f32.xlu2 %v608_v43 }
 0x3d9   :  { %v2390_v44 = vpop.eup %2389 }
 0x3da   :  { %v611_v45 = vsel %vm559_vm11, %v2390_v44, 0.0 }
 0x3db   :  { %612 = vadd.xlane.f32.xlu0 %v611_v45 }
 0x426   :  { %v598_v46 = vpop.xlane.xlu1 %597 }
 0x427   :  { %2391 = vrcp.f32 %v598_v46 }
 0x42d   :  { %v2392_v47 = vpop.eup %2391 }
 0x42e   :  { %v620_v49 = vmul.f32 %v2392_v47, %v2380_v19  ;;  %v601_v50 = vpop.xlane.xlu2 %600  ;;  %v2347_v19 = vld [vmem:[%s3428_s3 + $0x5] ss:$0 sm:$0xff] }
 0x42f   :  { %2393 = vrcp.f32 %v601_v50 }
 0x430   :  { %2236 = vmatmul.msk.f32.vlgmr.msra.gmra.mxu0 %vm559_vm11, %v620_v49 }
 0x435   :  { %v2394_v51 = vpop.eup %2393 }
 0x436   :  { %v604_v52 = vpop.xlane.xlu0 %603  ;;  %v621_v53 = vmul.f32 %v2394_v51, %v2382_v26 }
 0x437   :  { %2395 = vrcp.f32 %v604_v52  ;;  %v840_v52 = vld [vmem:[%s3429_s2 + $0x18] sm:$0xff] }
 0x438   :  { %2237 = vmatmul.msk.f32.gmra.mxu0 %vm559_vm11, %v621_v53  ;;  %864 = vmatpush.msra.mxu2 %v840_v52  ;;  %v839_v53 = vld [vmem:[%s3429_s2 + $0x10] sm:$0xff] }
 0x43a   :  { %865 = vmatpush.msra.mxu2 %v839_v53 }
 0x43c   :  { %866 = vmatpush.msra.mxu2 %v838_v21  ;;  %v883_v21 = vld [vmem:[%s3427_s1 + $0x118] sm:$0xff] }
 0x43d   :  { %v2396_v54 = vpop.eup %2395 }
 0x43e   :  { %v607_v56 = vpop.xlane.xlu1 %606  ;;  %v622_v59 = vmul.f32 %v2396_v54, %v2384_v31  ;;  %v837_v54 = vld [vmem:[%s3429_s2] sm:$0xff] }
 0x43f   :  { %2397 = vrcp.f32 %v607_v56  ;;  %867 = vmatpush.msra.mxu2 %v837_v54  ;;  %v882_v54 = vld [vmem:[%s3427_s1 + $0x110] sm:$0xff] }
 0x440   :  { %2238 = vmatmul.msk.f32.gmra.mxu0 %vm559_vm11, %v622_v59 }
 0x445   :  { %v2398_v60 = vpop.eup %2397 }
 0x446   :  { %v610_v62 = vpop.xlane.xlu2 %609  ;;  %v623_v0 = vmul.f32 %v2398_v60, %v2386_v36 }
 0x447   :  { %2399 = vrcp.f32 %v610_v62 }
 0x448   :  { %2239 = vmatmul.msk.f32.gmra.mxu0 %vm559_vm11, %v623_v0 }
 0x44d   :  { %v2400_v2 = vpop.eup %2399 }
 0x44e   :  { %v613_v58 = vpop.xlane.xlu0 %612  ;;  %v624_v3 = vmul.f32 %v2400_v2, %v2388_v41 }
 0x44f   :  { %2401 = vrcp.f32 %v613_v58 }
 0x450   :  { %2240 = vmatmul.msk.f32.gmra.mxu0 %vm559_vm11, %v624_v3 }
 0x455   :  { %v2402_v5 = vpop.eup %2401 }
 0x456   :  { %v625_v8 = vmul.f32 %v2402_v5, %v2390_v44  ;;  %v896_v5 = vld [vmem:[%s3427_s1 + $0x180] sm:$0xff] }
 0x457   :  { %899 = vmatpush.msrb.mxu3 %v896_v5 }
 0x458   :  { %2241 = vmatmul.msk.f32.gmra.mxu0 %vm559_vm11, %v625_v8  ;;  %v895_v8 = vld [vmem:[%s3427_s1 + $0x178] sm:$0xff] }
 0x459   :  { %900 = vmatpush.msrb.mxu3 %v895_v8 }
 0x45b   :  { %901 = vmatpush.msrb.mxu3 %v894_v63 }
 0x4ad   :  { %v661_v12 = vpop.f32.mrf.mxu0 }
 0x4ae   :  { %2245 = vmatmul.msk.f32.vlgmr.msra.gmra.mxu3 %vm487_vm4, %v661_v12 }
 0x4b5   :  { %v664_v13 = vpop.f32.mrf.mxu0 }
 0x4b6   :  { %2246 = vmatmul.msk.f32.gmra.mxu3 %vm487_vm4, %v664_v13 }
 0x4bd   :  { %v667_v14 = vpop.f32.mrf.mxu0 }
 0x4be   :  { %2247 = vmatmul.msk.f32.gmra.mxu3 %vm487_vm4, %v667_v14  ;;  %v893_v14 = vld [vmem:[%s3427_s1 + $0x168] sm:$0xff] }
 0x4bf   :  { %902 = vmatpush.msrb.mxu3 %v893_v14 }
 0x4c5   :  { %v670_v15 = vpop.f32.mrf.mxu0 }
 0x4c6   :  { %2242 = vmatmul.msk.f32.vlgmr.msrb.gmra.mxu2 %vm487_vm4, %v670_v15 }
 0x4cd   :  { %v673_v16 = vpop.f32.mrf.mxu0 }
 0x4ce   :  { %2243 = vmatmul.msk.f32.gmra.mxu2 %vm487_vm4, %v673_v16 }
 0x4d5   :  { %v676_v17 = vpop.f32.mrf.mxu0 }
 0x4d6   :  { %2244 = vmatmul.msk.f32.gmra.mxu2 %vm487_vm4, %v676_v17 }
 0x531   :  { %v744_v18 = vpop.f32.mrf.mxu3 }
 0x539   :  { %v747_v26 = vpop.f32.mrf.mxu3 }
 0x541   :  { %v750_v33 = vpop.f32.mrf.mxu3 }
 0x549   :  { %v709_v20 = vpop.f32.mrf.mxu2 }
 0x54a   :  { %v745_v23 = vadd.f32 %v744_v18, %v709_v20  ;;  %v892_v18 = vld [vmem:[%s3427_s1 + $0x160] sm:$0xff] }
 0x54b   :  { %903 = vmatpush.msrb.mxu3 %v892_v18 }
 0x54c   :  { %v755_v24 = vadd.f32 %v2347_v19, %v745_v23  ;;  %v2348_v23 = vld [vmem:[%s3428_s3 + $0x6] ss:$0 sm:$0xff] }
 0x54e   :  { %v758_v25 = vadd.f32 %v755_v24, %v2658_v61  ;;  %v891_v24 = vld [vmem:[%s3427_s1 + $0x158] sm:$0xff] }
 0x54f   :  { %904 = vmatpush.msrb.mxu3 %v891_v24 }
 0x550   :  { %v763_v27 = vsel %vm137_vm9, %v758_v25, 0.0 }
 0x551   :  { %764 = vadd.xlane.f32.xlu1 %v763_v27  ;;  %v712_v28 = vpop.f32.mrf.mxu2 }
 0x552   :  { %v748_v29 = vadd.f32 %v747_v26, %v712_v28  ;;  %v2349_v28 = vld [vmem:[%s3428_s3 + $0x7] ss:$0 sm:$0xff] }
 0x554   :  { %v756_v30 = vadd.f32 %v2347_v19, %v748_v29  ;;  %v890_v29 = vld [vmem:[%s3427_s1 + $0x150] sm:$0xff] }
 0x555   :  { %905 = vmatpush.msrb.mxu3 %v890_v29 }
 0x556   :  { %v759_v31 = vadd.f32 %v756_v30, %v2669_v7 }
 0x558   :  { %v766_v32 = vsel %vm137_vm9, %v759_v31, 0.0 }
 0x559   :  { %767 = vadd.xlane.f32.xlu2 %v766_v32  ;;  %v715_v34 = vpop.f32.mrf.mxu2  ;;  %v889_v32 = vld [vmem:[%s3427_s1 + $0x148] sm:$0xff] }
 0x55a   :  { %v751_v35 = vadd.f32 %v750_v33, %v715_v34  ;;  %906 = vmatpush.msrb.mxu3 %v889_v32 }
 0x55c   :  { %v757_v36 = vadd.f32 %v2347_v19, %v751_v35 }
 0x55e   :  { %v760_v37 = vadd.f32 %v757_v36, %v2680_v11  ;;  %v888_v36 = vld [vmem:[%s3427_s1 + $0x140] sm:$0xff] }
 0x55f   :  { %907 = vmatpush.msrb.mxu3 %v888_v36 }
 0x560   :  { %v769_v61 = vsel %vm137_vm9, %v760_v37, 0.0 }
 0x561   :  { %770 = vadd.xlane.f32.xlu0 %v769_v61 }
 0x5c4   :  { %v765_v38 = vpop.xlane.xlu1 %764 }
 0x5c5   :  { %v772_v39 = vmul.f32 %v765_v38, %v2556_v55  ;;  %v887_v38 = vld [vmem:[%s3427_s1 + $0x138] sm:$0xff] }
 0x5c6   :  { %908 = vmatpush.msrb.mxu3 %v887_v38  ;;  %v1110_v38 = vld [vmem:[%s3427_s1 + $0x200] sm:$0xff] }
 0x5c7   :  { %v775_v40 = vsub.f32 %v758_v25, %v772_v39 }
 0x5c9   :  { %v778_v41 = vmul.f32 %v775_v40, %v775_v40 }
 0x5cb   :  { %v781_v42 = vsel %vm137_vm9, %v778_v41, 0.0 }
 0x5cc   :  { %782 = vadd.xlane.f32.xlu1 %v781_v42  ;;  %v768_v7 = vpop.xlane.xlu2 %767  ;;  %v886_v42 = vld [vmem:[%s3427_s1 + $0x130] sm:$0xff] }
 0x5cd   :  { %v773_v43 = vmul.f32 %v768_v7, %v2556_v55  ;;  %909 = vmatpush.msrb.mxu3 %v886_v42  ;;  %v1006_v42 = vld [vmem:[%s3427_s1 + $0x198] sm:$0xff] }
 0x5cf   :  { %v2790_v44 = vsub.f32 %v759_v31, %v773_v43 }
 0x5d1   :  { %v779_v45 = vmul.f32 %v2790_v44, %v2790_v44 }
 0x5d3   :  { %v784_v11 = vsel %vm137_vm9, %v779_v45, 0.0  ;;  %v885_v45 = vld [vmem:[%s3427_s1 + $0x128] sm:$0xff] }
 0x5d4   :  { %785 = vadd.xlane.f32.xlu2 %v784_v11  ;;  %v771_v46 = vpop.xlane.xlu0 %770  ;;  %910 = vmatpush.msrb.mxu3 %v885_v45  ;;  %v1109_v45 = vld [vmem:[%s3427_s1 + $0x1f8] sm:$0xff] }
 0x5d5   :  { %v774_v47 = vmul.f32 %v771_v46, %v2556_v55 }
 0x5d7   :  { %v2796_v49 = vsub.f32 %v760_v37, %v774_v47  ;;  %v884_v47 = vld [vmem:[%s3427_s1 + $0x120] sm:$0xff] }
 0x5d8   :  { %911 = vmatpush.msrb.mxu3 %v884_v47  ;;  %v1078_v47 = vld [vmem:[%s3427_s1 + $0x1d0] sm:$0xff] }
 0x5d9   :  { %v780_v50 = vmul.f32 %v2796_v49, %v2796_v49 }
 0x5da   :  { %912 = vmatpush.msrb.mxu3 %v883_v21 }
 0x5db   :  { %v787_v51 = vsel %vm137_vm9, %v780_v50, 0.0 }
 0x5dc   :  { %788 = vadd.xlane.f32.xlu0 %v787_v51  ;;  %913 = vmatpush.msrb.mxu3 %v882_v54 }
 0x63f   :  { %v783_v56 = vpop.xlane.xlu1 %782 }
 0x640   :  { %v790_v59 = vmul.f32 %v783_v56, %v2556_v55  ;;  %v881_v56 = vld [vmem:[%s3427_s1 + $0x108] sm:$0xff] }
 0x641   :  { %914 = vmatpush.msrb.mxu3 %v881_v56 }
 0x642   :  { %v793_v60 = vadd.f32 1e-05, %v790_v59 }
 0x643   :  { %1123 = vmatpush.msra.mxu3 %v1110_v38 }
 0x644   :  { %2403 = vrsqrt.f32 %v793_v60  ;;  %vm802_vm3 = vweird.f32 %v793_v60 }
 0x645   :  { %1124 = vmatpush.msra.mxu3 %v1109_v45 }
 0x647   :  { %v786_v62 = vpop.xlane.xlu2 %785 }
 0x648   :  { %v791_v0 = vmul.f32 %v786_v62, %v2556_v55 }
 0x64a   :  { %v2404_v2 = vpop.eup %2403  ;;  %v794_v58 = vadd.f32 1e-05, %v791_v0 }
 0x64b   :  { %v797_v3 = vmul.f32 %v2404_v2, %v793_v60  ;;  %vm803_vm2 = vweird.f32 %v2404_v2 }
 0x64c   :  { %2405 = vrsqrt.f32 %v794_v58  ;;  %vm804_vm5 = vmor %vm802_vm3, %vm803_vm2  ;;  %vm812_vm7 = vweird.f32 %v794_v58 }
 0x64d   :  { %v798_v9 = vmul.f32 %v2404_v2, %v797_v3 }
 0x64f   :  { %v799_v4 = vmul.f32 0.5, %v798_v9  ;;  %v789_v12 = vpop.xlane.xlu0 %788  ;;  %v2351_v9 = vld [vmem:[%s3428_s3 + $0x9] ss:$0 sm:$0xff] }
 0x650   :  { %v792_v13 = vmul.f32 %v789_v12, %v2556_v55 }
 0x651   :  { %v800_v15 = vsub.f32 1.5, %v799_v4 }
 0x652   :  { %v2406_v16 = vpop.eup %2405  ;;  %v795_v17 = vadd.f32 1e-05, %v792_v13 }
 0x653   :  { %v801_v19 = vmul.f32 %v2404_v2, %v800_v15  ;;  %v807_v20 = vmul.f32 %v2406_v16, %v794_v58  ;;  %vm813_vm6 = vweird.f32 %v2406_v16 }
 0x654   :  { %2407 = vrsqrt.f32 %v795_v17  ;;  %vm814_vm8 = vmor %vm812_vm7, %vm813_vm6  ;;  %vm822_vm12 = vweird.f32 %v795_v17 }
 0x655   :  { %v805_v25 = vsel %vm804_vm5, %v2404_v2, %v801_v19  ;;  %v808_v26 = vmul.f32 %v2406_v16, %v807_v20 }
 0x656   :  { %v826_v27 = vmul.f32 %v805_v25, %v775_v40 }
 0x657   :  { %v809_v30 = vmul.f32 0.5, %v808_v26 }
 0x658   :  { %v830_v31 = vmul.f32 %v2348_v23, %v826_v27 }
 0x659   :  { %v810_v33 = vsub.f32 1.5, %v809_v30 }
 0x65a   :  { %v2408_v34 = vpop.eup %2407  ;;  %v834_v35 = vadd.f32 %v2349_v28, %v830_v31 }
 0x65b   :  { %v811_v37 = vmul.f32 %v2406_v16, %v810_v33  ;;  %v817_v61 = vmul.f32 %v2408_v34, %v795_v17  ;;  %vm823_vm10 = vweird.f32 %v2408_v34 }
 0x65c   :  { %2248 = vmatmul.msk.f32.vlgmr.msra.gmra.mxu2 %vm137_vm9, %v834_v35  ;;  %vm824_vm13 = vmor %vm822_vm12, %vm823_vm10 }
 0x65d   :  { %v815_v39 = vsel %vm814_vm8, %v2406_v16, %v811_v37  ;;  %v818_v40 = vmul.f32 %v2408_v34, %v817_v61 }
 0x65e   :  { %v827_v41 = vmul.f32 %v815_v39, %v2790_v44  ;;  %v1007_v39 = vld [vmem:[%s3427_s1 + $0x1a0] sm:$0xff] }
 0x65f   :  { %v819_v7 = vmul.f32 0.5, %v818_v40  ;;  %v1048_v40 = vld [vmem:[%s3427_s1 + $0x1c0] sm:$0xff]  ;;  %1031 = vmatpush.msrb.mxu1 %v1007_v39 }
 0x660   :  { %v831_v43 = vmul.f32 %v2348_v23, %v827_v41  ;;  %v1080_v41 = vld [vmem:[%s3427_s1 + $0x1e0] sm:$0xff]  ;;  %1063 = vmatpush.msrb.mxu0 %v1048_v40 }
 0x661   :  { %v820_v11 = vsub.f32 1.5, %v819_v7  ;;  %1093 = vmatpush.msrb.mxu2 %v1080_v41  ;;  %v1047_v7 = vld [vmem:[%s3427_s1 + $0x1b8] sm:$0xff]  ;;  %1032 = vmatpush.msrb.mxu1 %v1006_v42 }
 0x662   :  { %v835_v46 = vadd.f32 %v2349_v28, %v831_v43  ;;  %v1079_v43 = vld [vmem:[%s3427_s1 + $0x1d8] sm:$0xff]  ;;  %1064 = vmatpush.msrb.mxu0 %v1047_v7 }
 0x663   :  { %v821_v44 = vmul.f32 %v2408_v34, %v820_v11  ;;  %1094 = vmatpush.msrb.mxu2 %v1079_v43  ;;  %v1005_v11 = vld [vmem:[%s3427_s1 + $0x190] sm:$0xff] }
 0x664   :  { %2249 = vmatmul.msk.f32.gmra.mxu2 %vm137_vm9, %v835_v46  ;;  %1033 = vmatpush.msrb.mxu1 %v1005_v11 }
 0x665   :  { %v825_v50 = vsel %vm824_vm13, %v2408_v34, %v821_v44  ;;  %v1108_v44 = vld [vmem:[%s3427_s1 + $0x1f0] sm:$0xff]  ;;  %1095 = vmatpush.msrb.mxu2 %v1078_v47 }
 0x666   :  { %v828_v51 = vmul.f32 %v825_v50, %v2796_v49  ;;  %v2350_v49 = vld [vmem:[%s3428_s3 + $0x8] ss:$0 sm:$0xff]  ;;  %1125 = vmatpush.msra.mxu3 %v1108_v44 }
 0x667   :  { %v1004_v50 = vld [vmem:[%s3427_s1 + $0x188] sm:$0xff] }
 0x668   :  { %v832_v52 = vmul.f32 %v2348_v23, %v828_v51  ;;  %v1045_v51 = vld [vmem:[%s3427_s1 + $0x1a8] sm:$0xff]  ;;  %1034 = vmatpush.msrb.mxu1 %v1004_v50 }
 0x66a   :  { %v836_v53 = vadd.f32 %v2349_v28, %v832_v52  ;;  %v1077_v52 = vld [vmem:[%s3427_s1 + $0x1c8] sm:$0xff] }
 0x66b   :  { %1096 = vmatpush.msrb.mxu2 %v1077_v52 }
 0x66c   :  { %2250 = vmatmul.msk.f32.gmra.mxu2 %vm137_vm9, %v836_v53 }
 0x6df   :  { %v869_v59 = vpop.f32.mrf.mxu2 }
 0x6e0   :  { %v870_v60 = vadd.f32 %v2350_v49, %v869_v59 }
 0x6e2   :  { %v878_v62 = vmax.f32 %v870_v60, 0.0 }
 0x6e4   :  { %915 = vmatmul.f32.vlgmr.msrb.gmra.mxu3 %v878_v62 }
 0x6e7   :  { %v872_v0 = vpop.f32.mrf.mxu2 }
 0x6e8   :  { %v873_v2 = vadd.f32 %v2350_v49, %v872_v0 }
 0x6ea   :  { %v879_v58 = vmax.f32 %v873_v2, 0.0 }
 0x6ec   :  { %918 = vmatmul.f32.gmra.mxu3 %v879_v58  ;;  %v1140_v58 = vld [vmem:[%s3427_s1 + $0x220] sm:$0xff] }
 0x6ed   :  { %1153 = vmatpush.msra.mxu1 %v1140_v58  ;;  %v2354_v58 = vld [vmem:[%s3428_s3 + $0xc] ss:$0 sm:$0xff] }
 0x6ef   :  { %v875_v3 = vpop.f32.mrf.mxu2 }
 0x6f0   :  { %v876_v5 = vadd.f32 %v2350_v49, %v875_v3  ;;  %v1170_v3 = vld [vmem:[%s3427_s1 + $0x240] sm:$0xff] }
 0x6f2   :  { %v880_v8 = vmax.f32 %v876_v5, 0.0  ;;  %v1139_v5 = vld [vmem:[%s3427_s1 + $0x218] sm:$0xff] }
 0x6f3   :  { %1154 = vmatpush.msra.mxu1 %v1139_v5 }
 0x6f4   :  { %921 = vmatmul.f32.gmra.mxu3 %v880_v8  ;;  %v1169_v8 = vld [vmem:[%s3427_s1 + $0x238] sm:$0xff] }
 0x767   :  { %v916_v63 = vpop.f32.mrf.mxu3 }
 0x768   :  { %v917_v4 = vadd.f32 %v2351_v9, %v916_v63 }
 0x76a   :  { %v925_v12 = vadd.f32 %v917_v4, %v834_v35  ;;  %v1138_v4 = vld [vmem:[%s3427_s1 + $0x210] sm:$0xff] }
 0x76b   :  { %1155 = vmatpush.msra.mxu1 %v1138_v4 }
 0x76c   :  { %v930_v13 = vsel %vm137_vm9, %v925_v12, 0.0 }
 0x76d   :  { %931 = vadd.xlane.f32.xlu1 %v930_v13 }
 0x76f   :  { %v919_v14 = vpop.f32.mrf.mxu3 }
 0x770   :  { %v920_v15 = vadd.f32 %v2351_v9, %v919_v14 }
 0x772   :  { %v926_v16 = vadd.f32 %v920_v15, %v835_v46  ;;  %v1046_v46 = vld [vmem:[%s3427_s1 + $0x1b0] sm:$0xff]  ;;  %v1137_v15 = vld [vmem:[%s3427_s1 + $0x208] sm:$0xff] }
 0x773   :  { %1065 = vmatpush.msrb.mxu0 %v1046_v46  ;;  %1156 = vmatpush.msra.mxu1 %v1137_v15 }
 0x774   :  { %v933_v17 = vsel %vm137_vm9, %v926_v16, 0.0 }
 0x775   :  { %934 = vadd.xlane.f32.xlu2 %v933_v17  ;;  %1066 = vmatpush.msrb.mxu0 %v1045_v51 }
 0x777   :  { %v922_v18 = vpop.f32.mrf.mxu3  ;;  %1183 = vmatpush.msra.mxu0 %v1170_v3 }
 0x778   :  { %v923_v19 = vadd.f32 %v2351_v9, %v922_v18 }
 0x779   :  { %1184 = vmatpush.msra.mxu0 %v1169_v8 }
 0x77a   :  { %v927_v20 = vadd.f32 %v923_v19, %v836_v53  ;;  %v1107_v53 = vld [vmem:[%s3427_s1 + $0x1e8] sm:$0xff] }
 0x77b   :  { %1126 = vmatpush.msra.mxu3 %v1107_v53 }
 0x77c   :  { %v936_v23 = vsel %vm137_vm9, %v927_v20, 0.0 }
 0x77d   :  { %937 = vadd.xlane.f32.xlu0 %v936_v23  ;;  %v2352_v23 = vld [vmem:[%s3428_s3 + $0xa] ss:$0 sm:$0xff] }
 0x7e0   :  { %v932_v24 = vpop.xlane.xlu1 %931 }
 0x7e1   :  { %v939_v25 = vmul.f32 %v932_v24, %v2556_v55 }
 0x7e3   :  { %v2885_v26 = vsub.f32 %v925_v12, %v939_v25  ;;  %v1168_v12 = vld [vmem:[%s3427_s1 + $0x230] sm:$0xff] }
 0x7e4   :  { %1185 = vmatpush.msra.mxu0 %v1168_v12 }
 0x7e5   :  { %v945_v27 = vmul.f32 %v2885_v26, %v2885_v26 }
 0x7e7   :  { %v948_v28 = vsel %vm137_vm9, %v945_v27, 0.0  ;;  %v2353_v27 = vld [vmem:[%s3428_s3 + $0xb] ss:$0 sm:$0xff] }
 0x7e8   :  { %v935_v29 = vpop.xlane.xlu2 %934  ;;  %949 = vadd.xlane.f32.xlu1 %v948_v28 }
 0x7e9   :  { %v940_v30 = vmul.f32 %v935_v29, %v2556_v55 }
 0x7eb   :  { %v2891_v31 = vsub.f32 %v926_v16, %v940_v30  ;;  %v1167_v16 = vld [vmem:[%s3427_s1 + $0x228] sm:$0xff] }
 0x7ec   :  { %1186 = vmatpush.msra.mxu0 %v1167_v16 }
 0x7ed   :  { %v946_v32 = vmul.f32 %v2891_v31, %v2891_v31 }
 0x7ef   :  { %v951_v33 = vsel %vm137_vm9, %v946_v32, 0.0 }
 0x7f0   :  { %952 = vadd.xlane.f32.xlu2 %v951_v33  ;;  %v938_v34 = vpop.xlane.xlu0 %937 }
 0x7f1   :  { %v941_v35 = vmul.f32 %v938_v34, %v2556_v55 }
 0x7f3   :  { %v2897_v36 = vsub.f32 %v927_v20, %v941_v35 }
 0x7f5   :  { %v947_v37 = vmul.f32 %v2897_v36, %v2897_v36 }
 0x7f7   :  { %v954_v61 = vsel %vm137_vm9, %v947_v37, 0.0 }
 0x7f8   :  { %955 = vadd.xlane.f32.xlu0 %v954_v61 }
 0x85b   :  { %v950_v21 = vpop.xlane.xlu1 %949 }
 0x85c   :  { %v957_v54 = vmul.f32 %v950_v21, %v2556_v55 }
 0x85e   :  { %v960_v56 = vadd.f32 1e-05, %v957_v54 }
 0x860   :  { %2409 = vrsqrt.f32 %v960_v56  ;;  %vm969_vm15 = vweird.f32 %v960_v56 }
 0x863   :  { %v953_v49 = vpop.xlane.xlu2 %952 }
 0x864   :  { %v958_v59 = vmul.f32 %v953_v49, %v2556_v55 }
 0x866   :  { %v2410_v60 = vpop.eup %2409  ;;  %v961_v62 = vadd.f32 1e-05, %v958_v59 }
 0x867   :  { %v964_v0 = vmul.f32 %v2410_v60, %v960_v56  ;;  %vm970_vm14 = vweird.f32 %v2410_v60 }
 0x868   :  { %2411 = vrsqrt.f32 %v961_v62  ;;  %vm971_vm0 = vmor %vm969_vm15, %vm970_vm14  ;;  %vm979_vm2 = vweird.f32 %v961_v62 }
 0x869   :  { %v965_v2 = vmul.f32 %v2410_v60, %v964_v0 }
 0x86b   :  { %v966_v9 = vmul.f32 0.5, %v965_v2  ;;  %v956_v63 = vpop.xlane.xlu0 %955 }
 0x86c   :  { %v959_v13 = vmul.f32 %v956_v63, %v2556_v55  ;;  %v2355_v63 = vld [vmem:[%s3428_s3 + $0xd] ss:$0 sm:$0xff] }
 0x86d   :  { %v967_v14 = vsub.f32 1.5, %v966_v9 }
 0x86e   :  { %v2412_v17 = vpop.eup %2411  ;;  %v962_v18 = vadd.f32 1e-05, %v959_v13 }
 0x86f   :  { %v968_v19 = vmul.f32 %v2410_v60, %v967_v14  ;;  %v974_v20 = vmul.f32 %v2412_v17, %v961_v62  ;;  %vm980_vm1 = vweird.f32 %v2412_v17 }
 0x870   :  { %2413 = vrsqrt.f32 %v962_v18  ;;  %vm981_vm3 = vmor %vm979_vm2, %vm980_vm1  ;;  %vm989_vm6 = vweird.f32 %v962_v18 }
 0x871   :  { %v972_v24 = vsel %vm971_vm0, %v2410_v60, %v968_v19  ;;  %v975_v25 = vmul.f32 %v2412_v17, %v974_v20 }
 0x872   :  { %v993_v28 = vmul.f32 %v972_v24, %v2885_v26 }
 0x873   :  { %v976_v29 = vmul.f32 0.5, %v975_v25 }
 0x874   :  { %v997_v30 = vmul.f32 %v2352_v23, %v993_v28 }
 0x875   :  { %v977_v32 = vsub.f32 1.5, %v976_v29 }
 0x876   :  { %v2414_v33 = vpop.eup %2413  ;;  %v2984_v34 = vadd.f32 %v2353_v27, %v997_v30 }
 0x877   :  { %v978_v35 = vmul.f32 %v2412_v17, %v977_v32  ;;  %v984_v37 = vmul.f32 %v2414_v33, %v962_v18  ;;  %vm990_vm5 = vweird.f32 %v2414_v33 }
 0x878   :  { %2251 = vmatmul.msk.f32.vlgmr.msrb.gmra.mxu1 %vm137_vm9, %v2984_v34  ;;  %2254 = vmatmul.msk.f32.vlgmr.msrb.gmra.mxu0 %vm137_vm9, %v2984_v34  ;;  %vm991_vm7 = vmor %vm989_vm6, %vm990_vm5 }
 0x879   :  { %v982_v61 = vsel %vm981_vm3, %v2412_v17, %v978_v35  ;;  %v985_v38 = vmul.f32 %v2414_v33, %v984_v37  ;;  %2257 = vmatmul.msk.f32.vlgmr.msrb.gmra.mxu2 %vm137_vm9, %v2984_v34  ;;  %2260 = vmatmul.msk.f32.vlgmr.msra.gmra.mxu3 %vm137_vm9, %v2984_v34 }
 0x87a   :  { %v994_v26 = vmul.f32 %v982_v61, %v2891_v31 }
 0x87b   :  { %v986_v39 = vmul.f32 0.5, %v985_v38 }
 0x87c   :  { %v998_v40 = vmul.f32 %v2352_v23, %v994_v26 }
 0x87d   :  { %v987_v41 = vsub.f32 1.5, %v986_v39 }
 0x87e   :  { %v2995_v42 = vadd.f32 %v2353_v27, %v998_v40 }
 0x87f   :  { %v988_v7 = vmul.f32 %v2414_v33, %v987_v41 }
 0x880   :  { %2252 = vmatmul.msk.f32.gmra.mxu1 %vm137_vm9, %v2995_v42  ;;  %2255 = vmatmul.msk.f32.gmra.mxu0 %vm137_vm9, %v2995_v42 }
 0x881   :  { %v992_v43 = vsel %vm991_vm7, %v2414_v33, %v988_v7  ;;  %2258 = vmatmul.msk.f32.gmra.mxu2 %vm137_vm9, %v2995_v42  ;;  %2261 = vmatmul.msk.f32.gmra.mxu3 %vm137_vm9, %v2995_v42 }
 0x882   :  { %v995_v31 = vmul.f32 %v992_v43, %v2897_v36 }
 0x884   :  { %v999_v45 = vmul.f32 %v2352_v23, %v995_v31 }
 0x886   :  { %v3006_v11 = vadd.f32 %v2353_v27, %v999_v45 }
 0x888   :  { %2253 = vmatmul.msk.f32.gmra.mxu1 %vm137_vm9, %v3006_v11  ;;  %2256 = vmatmul.msk.f32.gmra.mxu0 %vm137_vm9, %v3006_v11 }
 0x889   :  { %2259 = vmatmul.msk.f32.gmra.mxu2 %vm137_vm9, %v3006_v11  ;;  %2262 = vmatmul.msk.f32.gmra.mxu3 %vm137_vm9, %v3006_v11 }
 0x890   :  { %2263 = vmatmul.msk.f32.vlgmr.msra.gmra.mxu1 %vm137_vm9, %v2984_v34  ;;  %2266 = vmatmul.msk.f32.vlgmr.msra.gmra.mxu0 %vm137_vm9, %v2984_v34 }
 0x898   :  { %2264 = vmatmul.msk.f32.gmra.mxu1 %vm137_vm9, %v2995_v42  ;;  %2267 = vmatmul.msk.f32.gmra.mxu0 %vm137_vm9, %v2995_v42 }
 0x8a0   :  { %2265 = vmatmul.msk.f32.gmra.mxu1 %vm137_vm9, %v3006_v11  ;;  %2268 = vmatmul.msk.f32.gmra.mxu0 %vm137_vm9, %v3006_v11 }
 0x8f5   :  { %v1036_v36 = vpop.f32.mrf.mxu1  ;;  %v1068_v46 = vpop.f32.mrf.mxu0 }
 0x8f6   :  { %v1037_v3 = vadd.f32 %v2354_v58, %v1036_v36  ;;  %v1069_v4 = vadd.f32 %v2355_v63, %v1068_v46 }
 0x8fc   :  { %v1128_v47 = vpop.f32.mrf.mxu3  ;;  %v1098_v51 = vpop.f32.mrf.mxu2 }
 0x8fd   :  { %v1039_v44 = vpop.f32.mrf.mxu1  ;;  %v1071_v50 = vpop.f32.mrf.mxu0 }
 0x8fe   :  { %v1040_v8 = vadd.f32 %v2354_v58, %v1039_v44  ;;  %v1072_v12 = vadd.f32 %v2355_v63, %v1071_v50 }
 0x904   :  { %v1131_v52 = vpop.f32.mrf.mxu3  ;;  %v1101_v49 = vpop.f32.mrf.mxu2 }
 0x905   :  { %v1042_v53 = vpop.f32.mrf.mxu1  ;;  %v1074_v21 = vpop.f32.mrf.mxu0 }
 0x906   :  { %v1043_v9 = vadd.f32 %v2354_v58, %v1042_v53  ;;  %v1075_v13 = vadd.f32 %v2355_v63, %v1074_v21 }
 0x90c   :  { %v1134_v54 = vpop.f32.mrf.mxu3  ;;  %v1104_v62 = vpop.f32.mrf.mxu2 }
 0x90d   :  { %2269 = vmatpush.xpose.msk.msra.mxu2 %vm487_vm4, %v1134_v54  ;;  %v1188_v56 = vpop.f32.mrf.mxu0  ;;  %v1158_v59 = vpop.f32.mrf.mxu1 }
 0x911   :  { %2270 = vmatpush.xpose.msk.msra.mxu2 %vm487_vm4, %v1131_v52 }
 0x915   :  { %2271 = vmatpush.xpose.msk.msra.mxu2 %vm487_vm4, %v1128_v47  ;;  %v1191_v60 = vpop.f32.mrf.mxu0  ;;  %v1161_v0 = vpop.f32.mrf.mxu1 }
 0x919   :  { %2272 = vmatpush.xpose.msk.msra.mxu2 %vm487_vm4, %v1104_v62 }
 0x91d   :  { %2273 = vmatpush.xpose.msk.msra.mxu2 %vm487_vm4, %v1101_v49  ;;  %v1194_v2 = vpop.f32.mrf.mxu0  ;;  %v1164_v5 = vpop.f32.mrf.mxu1 }
 0x91e   :  { %1362 = vmatpush.msrb.mxu3 %v1194_v2 }
 0x920   :  { %1363 = vmatpush.msrb.mxu3 %v1191_v60 }
 0x921   :  { %2274 = vmatpush.xpose.msk.msra.mxu2 %vm487_vm4, %v1098_v51 }
 0x922   :  { %1364 = vmatpush.msrb.mxu3 %v1188_v56 }
 0x924   :  { %2275 = vmatmul.msk.f32.vlgmr.msra.gmra.mxu2 %vm487_vm4, %v1037_v3  ;;  %1365 = vmatpush.msrb.mxu3 %v1164_v5 }
 0x926   :  { %1366 = vmatpush.msrb.mxu3 %v1161_v0 }
 0x928   :  { %1367 = vmatpush.msrb.mxu3 %v1158_v59 }
 0x92c   :  { %2276 = vmatmul.msk.f32.gmra.mxu2 %vm487_vm4, %v1040_v8 }
 0x934   :  { %2277 = vmatmul.msk.f32.gmra.mxu2 %vm487_vm4, %v1043_v9  ;;  %v1388_v9 = vld [vmem:[%s3427_s1 + $0x250] sm:$0xff] }
 0x935   :  { %1449 = vmatpush.msrb.mxu0 %v1388_v9 }
 0x93c   :  { %2278 = vmatmul.msk.f32.gmra.mxu2 %vm487_vm4, %v1069_v4 }
 0x944   :  { %2279 = vmatmul.msk.f32.gmra.mxu2 %vm487_vm4, %v1072_v12 }
 0x94c   :  { %2280 = vmatmul.msk.f32.gmra.mxu2 %vm487_vm4, %v1075_v13 }
 0x9a7   :  { %v1250_v14 = vpop.f32.mrf.mxu2 }
 0x9a8   :  { %v1251_v15 = vadd.f32 %v1250_v14, %v2724_v48 }
 0x9aa   :  { %v1268_v16 = vsel %vm559_vm11, %v1251_v15, -inf }
 0x9ab   :  { %1269 = vmax.xlane.f32.xlu1 %v1268_v16 }
 0x9af   :  { %v1253_v17 = vpop.f32.mrf.mxu2 }
 0x9b0   :  { %v1254_v18 = vadd.f32 %v1253_v17, %v2728_v22 }
 0x9b2   :  { %v1271_v19 = vsel %vm559_vm11, %v1254_v18, -inf }
 0x9b3   :  { %1272 = vmax.xlane.f32.xlu2 %v1271_v19 }
 0x9b7   :  { %v1256_v20 = vpop.f32.mrf.mxu2 }
 0x9b8   :  { %v1257_v23 = vadd.f32 %v1256_v20, %v2732_v57 }
 0x9ba   :  { %v1274_v24 = vsel %vm559_vm11, %v1257_v23, -inf }
 0x9bb   :  { %1275 = vmax.xlane.f32.xlu0 %v1274_v24  ;;  %v1387_v24 = vld [vmem:[%s3427_s1 + $0x248] sm:$0xff] }
 0x9bc   :  { %1450 = vmatpush.msrb.mxu0 %v1387_v24  ;;  %v1548_v24 = vld [vmem:[%s3429_s2 + $0x38] sm:$0xff] }
 0x9bf   :  { %v1259_v25 = vpop.f32.mrf.mxu2 }
 0x9c0   :  { %v1260_v27 = vadd.f32 %v1259_v25, %v2736_v1  ;;  %v1390_v25 = vld [vmem:[%s3427_s1 + $0x260] sm:$0xff] }
 0x9c1   :  { %1414 = vmatpush.msrb.mxu1 %v1390_v25  ;;  %v1547_v25 = vld [vmem:[%s3429_s2 + $0x30] sm:$0xff] }
 0x9c2   :  { %v1277_v48 = vsel %vm559_vm11, %v1260_v27, -inf }
 0x9c3   :  { %1278 = vmax.xlane.f32.xlu1 %v1277_v48 }
 0x9c7   :  { %v1262_v28 = vpop.f32.mrf.mxu2 }
 0x9c8   :  { %v1263_v29 = vadd.f32 %v1262_v28, %v2740_v6 }
 0x9ca   :  { %v1280_v22 = vsel %vm559_vm11, %v1263_v29, -inf }
 0x9cb   :  { %1281 = vmax.xlane.f32.xlu2 %v1280_v22 }
 0x9cf   :  { %v1265_v30 = vpop.f32.mrf.mxu2 }
 0x9d0   :  { %v1266_v32 = vadd.f32 %v1265_v30, %v2744_v10 }
 0x9d2   :  { %v1283_v57 = vsel %vm559_vm11, %v1266_v32, -inf }
 0x9d3   :  { %1284 = vmax.xlane.f32.xlu0 %v1283_v57 }
 0xa1e   :  { %v1270_v33 = vpop.xlane.xlu1 %1269 }
 0xa1f   :  { %v1286_v35 = vsub.f32 %v1251_v15, %v1270_v33  ;;  %v2356_v33 = vld [vmem:[%s3428_s3 + $0xe] ss:$0 sm:$0xff] }
 0xa21   :  { %v1292_v37 = vmul.f32 1.442695, %v1286_v35 }
 0xa23   :  { %2415 = vpow2.f32 %v1292_v37 }
 0xa26   :  { %v1273_v1 = vpop.xlane.xlu2 %1272 }
 0xa27   :  { %v1287_v61 = vsub.f32 %v1254_v18, %v1273_v1 }
 0xa29   :  { %v2416_v38 = vpop.eup %2415  ;;  %v1294_v26 = vmul.f32 1.442695, %v1287_v61 }
 0xa2a   :  { %v1304_v39 = vsel %vm559_vm11, %v2416_v38, 0.0 }
 0xa2b   :  { %2417 = vpow2.f32 %v1294_v26  ;;  %1305 = vadd.xlane.f32.xlu1 %v1304_v39 }
 0xa2e   :  { %v1276_v6 = vpop.xlane.xlu0 %1275 }
 0xa2f   :  { %v1288_v40 = vsub.f32 %v1257_v23, %v1276_v6  ;;  %v3076_v23 = vld [vmem:[%s3426_s0] sm:$0xff] }
 0xa31   :  { %v2418_v41 = vpop.eup %2417  ;;  %v1296_v7 = vmul.f32 1.442695, %v1288_v40 }
 0xa32   :  { %v1307_v10 = vsel %vm559_vm11, %v2418_v41, 0.0 }
 0xa33   :  { %2419 = vpow2.f32 %v1296_v7  ;;  %1308 = vadd.xlane.f32.xlu2 %v1307_v10 }
 0xa36   :  { %v1279_v43 = vpop.xlane.xlu1 %1278 }
 0xa37   :  { %v1289_v31 = vsub.f32 %v1260_v27, %v1279_v43  ;;  %v1389_v27 = vld [vmem:[%s3427_s1 + $0x258] sm:$0xff] }
 0xa38   :  { %1415 = vmatpush.msrb.mxu1 %v1389_v27  ;;  %v1545_v27 = vld [vmem:[%s3429_s2 + $0x20] sm:$0xff] }
 0xa39   :  { %v2420_v45 = vpop.eup %2419  ;;  %v1298_v36 = vmul.f32 1.442695, %v1289_v31 }
 0xa3a   :  { %v1310_v46 = vsel %vm559_vm11, %v2420_v45, 0.0  ;;  %1572 = vmatpush.msra.mxu1 %v1548_v24  ;;  %v1599_v24 = vld [vmem:[%s3427_s1 + $0x2b8] sm:$0xff] }
 0xa3b   :  { %2421 = vpow2.f32 %v1298_v36  ;;  %1311 = vadd.xlane.f32.xlu0 %v1310_v46  ;;  %v3107_v46 = vld [vmem:[%s3426_s0 + $0x8] sm:$0xff] }
 0xa3c   :  { %1573 = vmatpush.msra.mxu1 %v1547_v25  ;;  %v1598_v25 = vld [vmem:[%s3427_s1 + $0x2b0] sm:$0xff] }
 0xa3e   :  { %v1282_v47 = vpop.xlane.xlu2 %1281 }
 0xa3f   :  { %v1290_v44 = vsub.f32 %v1263_v29, %v1282_v47 }
 0xa41   :  { %v2422_v50 = vpop.eup %2421  ;;  %v1300_v51 = vmul.f32 1.442695, %v1290_v44 }
 0xa42   :  { %v1313_v52 = vsel %vm559_vm11, %v2422_v50, 0.0 }
 0xa43   :  { %2423 = vpow2.f32 %v1300_v51  ;;  %1314 = vadd.xlane.f32.xlu1 %v1313_v52 }
 0xa46   :  { %v1285_v53 = vpop.xlane.xlu0 %1284 }
 0xa47   :  { %v1291_v21 = vsub.f32 %v1266_v32, %v1285_v53 }
 0xa49   :  { %v2424_v54 = vpop.eup %2423  ;;  %v1302_v56 = vmul.f32 1.442695, %v1291_v21 }
 0xa4a   :  { %v1316_v49 = vsel %vm559_vm11, %v2424_v54, 0.0 }
 0xa4b   :  { %2425 = vpow2.f32 %v1302_v56  ;;  %1317 = vadd.xlane.f32.xlu2 %v1316_v49 }
 0xa51   :  { %v2426_v59 = vpop.eup %2425 }
 0xa52   :  { %v1319_v60 = vsel %vm559_vm11, %v2426_v59, 0.0 }
 0xa53   :  { %1320 = vadd.xlane.f32.xlu0 %v1319_v60 }
 0xa67   :  { %1714 = vrot.lane.b32.xlu0 %v3076_v23, %s2487_s25 }
 0xa9e   :  { %v1306_v62 = vpop.xlane.xlu1 %1305 }
 0xa9f   :  { %2427 = vrcp.f32 %v1306_v62 }
 0xaa5   :  { %v2428_v0 = vpop.eup %2427 }
 0xaa6   :  { %v1328_v2 = vmul.f32 %v2428_v0, %v2416_v38  ;;  %v1309_v58 = vpop.xlane.xlu2 %1308 }
 0xaa7   :  { %2429 = vrcp.f32 %v1309_v58 }
 0xaa8   :  { %2281 = vmatmul.msk.f32.vlgmr.msrb.gmra.mxu3 %vm559_vm11, %v1328_v2 }
 0xaad   :  { %v2430_v3 = vpop.eup %2429 }
 0xaae   :  { %v1312_v5 = vpop.xlane.xlu0 %1311  ;;  %v1329_v8 = vmul.f32 %v2430_v3, %v2418_v41 }
 0xaaf   :  { %2431 = vrcp.f32 %v1312_v5 }
 0xab0   :  { %2282 = vmatmul.msk.f32.gmra.mxu3 %vm559_vm11, %v1329_v8 }
 0xab5   :  { %v2432_v63 = vpop.eup %2431 }
 0xab6   :  { %v1315_v4 = vpop.xlane.xlu1 %1314  ;;  %v1330_v12 = vmul.f32 %v2432_v63, %v2420_v45  ;;  %v2488_v63 = vmov 6.0  }
 0xab7   :  { %2433 = vrcp.f32 %v1315_v4 }
 0xab8   :  { %2283 = vmatmul.msk.f32.gmra.mxu3 %vm559_vm11, %v1330_v12 }
 0xabd   :  { %v2434_v13 = vpop.eup %2433 }
 0xabe   :  { %v1318_v14 = vpop.xlane.xlu2 %1317  ;;  %v1331_v15 = vmul.f32 %v2434_v13, %v2422_v50 }
 0xabf   :  { %2435 = vrcp.f32 %v1318_v14 }
 0xac0   :  { %2284 = vmatmul.msk.f32.gmra.mxu3 %vm559_vm11, %v1331_v15 }
 0xac5   :  { %v2436_v16 = vpop.eup %2435 }
 0xac6   :  { %v1321_v17 = vpop.xlane.xlu0 %1320  ;;  %v1332_v18 = vmul.f32 %v2436_v16, %v2424_v54 }
 0xac7   :  { %2437 = vrcp.f32 %v1321_v17 }
 0xac8   :  { %2285 = vmatmul.msk.f32.gmra.mxu3 %vm559_vm11, %v1332_v18  ;;  %2439 = vrcp.f32 %v2488_v63 }
 0xacd   :  { %v2438_v19 = vpop.eup %2437 }
 0xace   :  { %v1333_v20 = vmul.f32 %v2438_v19, %v2426_v59  ;;  %v2440_v4 = vpop.eup %2439 }
 0xacf   :  { %v1734_v12 = vmul.f32 6.0, %v2440_v4 }
 0xad0   :  { %2286 = vmatmul.msk.f32.gmra.mxu3 %vm559_vm11, %v1333_v20  ;;  %vm1738_vm11 = vweird.f32 %v2440_v4 }
 0xad1   :  { %v1735_v13 = vsub.f32 1.0, %v1734_v12 }
 0xad3   :  { %v1736_v14 = vmul.f32 %v2440_v4, %v1735_v13  ;;  %v1603_v13 = vld [vmem:[%s3427_s1 + $0x2d8] sm:$0xff] }
 0xad5   :  { %v1737_v15 = vadd.f32 %v2440_v4, %v1736_v14 }
 0xad7   :  { %v3139_v16 = vsel %vm1738_vm11, %v2440_v4, %v1737_v15 }
 0xb2b   :  { %v1369_v48 = vpop.f32.mrf.mxu3 }
 0xb2c   :  { %2290 = vmatmul.msk.f32.vlgmr.msrb.gmra.mxu0 %vm487_vm4, %v1369_v48 }
 0xb33   :  { %v1372_v28 = vpop.f32.mrf.mxu3 }
 0xb34   :  { %2291 = vmatmul.msk.f32.gmra.mxu0 %vm487_vm4, %v1372_v28 }
 0xb3b   :  { %v1375_v29 = vpop.f32.mrf.mxu3 }
 0xb3c   :  { %2292 = vmatmul.msk.f32.gmra.mxu0 %vm487_vm4, %v1375_v29 }
 0xb43   :  { %v1378_v22 = vpop.f32.mrf.mxu3 }
 0xb44   :  { %2287 = vmatmul.msk.f32.vlgmr.msrb.gmra.mxu1 %vm487_vm4, %v1378_v22 }
 0xb4b   :  { %v1381_v30 = vpop.f32.mrf.mxu3 }
 0xb4c   :  { %2288 = vmatmul.msk.f32.gmra.mxu1 %vm487_vm4, %v1381_v30 }
 0xb53   :  { %v1384_v32 = vpop.f32.mrf.mxu3 }
 0xb54   :  { %2289 = vmatmul.msk.f32.gmra.mxu1 %vm487_vm4, %v1384_v32  ;;  %vm1723_vm4 = vcmask 48128  }
 0xba9   :  { %v1452_v57 = vpop.f32.mrf.mxu0 }
 0xbb1   :  { %v1455_v38 = vpop.f32.mrf.mxu0 }
 0xbb9   :  { %v1458_v10 = vpop.f32.mrf.mxu0 }
 0xbc1   :  { %v1417_v35 = vpop.f32.mrf.mxu1 }
 0xbc2   :  { %v1453_v37 = vadd.f32 %v1452_v57, %v1417_v35 }
 0xbc4   :  { %v1463_v1 = vadd.f32 %v2356_v33, %v1453_v37 }
 0xbc6   :  { %v1466_v61 = vadd.f32 %v1463_v1, %v2984_v34 }
 0xbc8   :  { %v1471_v26 = vsel %vm137_vm9, %v1466_v61, 0.0 }
 0xbc9   :  { %1472 = vadd.xlane.f32.xlu1 %v1471_v26  ;;  %v1420_v39 = vpop.f32.mrf.mxu1 }
 0xbca   :  { %v1456_v6 = vadd.f32 %v1455_v38, %v1420_v39 }
 0xbcc   :  { %v1464_v40 = vadd.f32 %v2356_v33, %v1456_v6 }
 0xbce   :  { %v1467_v41 = vadd.f32 %v1464_v40, %v2995_v42  ;;  %v3114_v42 = vld [vmem:[%s3426_s0 + $0x10] sm:$0xff] }
 0xbd0   :  { %v1474_v7 = vsel %vm137_vm9, %v1467_v41, 0.0 }
 0xbd1   :  { %1475 = vadd.xlane.f32.xlu2 %v1474_v7  ;;  %v1423_v43 = vpop.f32.mrf.mxu1 }
 0xbd2   :  { %v1459_v31 = vadd.f32 %v1458_v10, %v1423_v43  ;;  %v2357_v43 = vld [vmem:[%s3428_s3 + $0xf] ss:$0 sm:$0xff] }
 0xbd4   :  { %v1465_v45 = vadd.f32 %v2356_v33, %v1459_v31 }
 0xbd6   :  { %v1468_v36 = vadd.f32 %v1465_v45, %v3006_v11  ;;  %v1715_v11 = vpop.permute.xlu0 %1714 }
 0xbd7   :  { %v1724_v47 = vsel %vm1723_vm4, %v1715_v11, 0.0 }
 0xbd8   :  { %v1477_v34 = vsel %vm137_vm9, %v1468_v36, 0.0 }
 0xbd9   :  { %1478 = vadd.xlane.f32.xlu1 %v1477_v34 }
 0xbe9   :  { %1716 = vrot.lane.b32.xlu2 %v3107_v46, %s2487_s25 }
 0xbf2   :  { %1718 = vrot.lane.b32.xlu1 %v3114_v42, %s2487_s25 }
 0xc12   :  { %1725 = vadd.xlane.f32.xlu2 %v1724_v47 }
 0xc3c   :  { %v1473_v44 = vpop.xlane.xlu1 %1472 }
 0xc3d   :  { %v1480_v50 = vmul.f32 %v1473_v44, %v2556_v55 }
 0xc3f   :  { %v3120_v51 = vsub.f32 %v1466_v61, %v1480_v50 }
 0xc41   :  { %v1486_v52 = vmul.f32 %v3120_v51, %v3120_v51 }
 0xc43   :  { %v1489_v53 = vsel %vm137_vm9, %v1486_v52, 0.0 }
 0xc44   :  { %1490 = vadd.xlane.f32.xlu0 %v1489_v53  ;;  %v1476_v21 = vpop.xlane.xlu2 %1475 }
 0xc45   :  { %v1481_v54 = vmul.f32 %v1476_v21, %v2556_v55 }
 0xc47   :  { %v3126_v56 = vsub.f32 %v1467_v41, %v1481_v54 }
 0xc49   :  { %v1487_v49 = vmul.f32 %v3126_v56, %v3126_v56 }
 0xc4b   :  { %v1492_v59 = vsel %vm137_vm9, %v1487_v49, 0.0 }
 0xc4c   :  { %v1717_v60 = vpop.permute.xlu2 %1716  ;;  %1493 = vadd.xlane.f32.xlu1 %v1492_v59  ;;  %v1479_v62 = vpop.xlane.xlu1 %1478 }
 0xc4d   :  { %v1482_v0 = vmul.f32 %v1479_v62, %v2556_v55  ;;  %v1727_v2 = vsel %vm1723_vm4, %v1717_v60, 0.0 }
 0xc4e   :  { %1728 = vadd.xlane.f32.xlu0 %v1727_v2 }
 0xc4f   :  { %v3133_v58 = vsub.f32 %v1468_v36, %v1482_v0 }
 0xc51   :  { %v1488_v3 = vmul.f32 %v3133_v58, %v3133_v58 }
 0xc53   :  { %v1495_v5 = vsel %vm137_vm9, %v1488_v3, 0.0 }
 0xc56   :  { %1496 = vadd.xlane.f32.xlu0 %v1495_v5 }
 0xc64   :  { %v1719_v8 = vpop.permute.xlu1 %1718 }
 0xc65   :  { %v1730_v9 = vsel %vm1723_vm4, %v1719_v8, 0.0 }
 0xc66   :  { %1731 = vadd.xlane.f32.xlu2 %v1730_v9 }
 0xc85   :  { %v1726_v17 = vpop.xlane.xlu2 %1725 }
 0xc86   :  { %v1740_v18 = vmul.f32 %v3139_v16, %v1726_v17  ;;  %v1602_v17 = vld [vmem:[%s3427_s1 + $0x2d0] sm:$0xff] }
 0xc88   :  { %v3143_v19 = vsub.f32 %v3076_v23, %v1740_v18  ;;  %v1546_v23 = vld [vmem:[%s3429_s2 + $0x28] sm:$0xff] }
 0xc89   :  { %1574 = vmatpush.msra.mxu1 %v1546_v23  ;;  %v1601_v18 = vld [vmem:[%s3427_s1 + $0x2c8] sm:$0xff] }
 0xc8a   :  { %v1746_v20 = vmul.f32 %v3143_v19, %v3143_v19  ;;  %v1597_v23 = vld [vmem:[%s3427_s1 + $0x2a8] sm:$0xff] }
 0xc8b   :  { %1575 = vmatpush.msra.mxu1 %v1545_v27  ;;  %v1596_v27 = vld [vmem:[%s3427_s1 + $0x2a0] sm:$0xff] }
 0xc8c   :  { %1752 = vrot.lane.b32.xlu1 %v1746_v20, %s2487_s25  ;;  %v1600_v20 = vld [vmem:[%s3427_s1 + $0x2c0] sm:$0xff] }
 0xcb7   :  { %v1491_v48 = vpop.xlane.xlu0 %1490 }
 0xcb8   :  { %v1498_v28 = vmul.f32 %v1491_v48, %v2556_v55  ;;  %v1595_v48 = vld [vmem:[%s3427_s1 + $0x298] sm:$0xff] }
 0xcba   :  { %v1501_v29 = vadd.f32 1e-05, %v1498_v28  ;;  %v1594_v28 = vld [vmem:[%s3427_s1 + $0x290] sm:$0xff] }
 0xcbc   :  { %2441 = vrsqrt.f32 %v1501_v29  ;;  %vm1510_vm10 = vweird.f32 %v1501_v29 }
 0xcbf   :  { %v1494_v22 = vpop.xlane.xlu1 %1493 }
 0xcc0   :  { %v1499_v30 = vmul.f32 %v1494_v22, %v2556_v55  ;;  %v1592_v22 = vld [vmem:[%s3427_s1 + $0x280] sm:$0xff] }
 0xcc1   :  { %v1729_v32 = vpop.xlane.xlu0 %1728 }
 0xcc2   :  { %v2442_v57 = vpop.eup %2441  ;;  %v1502_v33 = vadd.f32 1e-05, %v1499_v30  ;;  %v1741_v35 = vmul.f32 %v3139_v16, %v1729_v32  ;;  %v1591_v30 = vld [vmem:[%s3427_s1 + $0x278] sm:$0xff]  ;;  %v1590_v32 = vld [vmem:[%s3427_s1 + $0x270] sm:$0xff] }
 0xcc3   :  { %v1505_v37 = vmul.f32 %v2442_v57, %v1501_v29  ;;  %vm1511_vm8 = vweird.f32 %v2442_v57  ;;  %v1593_v29 = vld [vmem:[%s3427_s1 + $0x288] sm:$0xff] }
 0xcc4   :  { %2443 = vrsqrt.f32 %v1502_v33  ;;  %v3164_v1 = vsub.f32 %v3107_v46, %v1741_v35  ;;  %vm1512_vm12 = vmor %vm1510_vm10, %vm1511_vm8  ;;  %v2358_v46 = vld [vmem:[%s3428_s3 + $0x10] ss:$0 sm:$0xff]  ;;  %vm1520_vm14 = vweird.f32 %v1502_v33 }
 0xcc5   :  { %v1506_v61 = vmul.f32 %v2442_v57, %v1505_v37 }
 0xcc6   :  { %v1747_v38 = vmul.f32 %v3164_v1, %v3164_v1 }
 0xcc7   :  { %v1507_v26 = vmul.f32 0.5, %v1506_v61 }
 0xcc8   :  { %1754 = vrot.lane.b32.xlu0 %v1747_v38, %s2487_s25  ;;  %v2360_v38 = vld [vmem:[%s3428_s3 + $0x11] ss:$0 sm:$0xff] }
 0xcc9   :  { %v1508_v39 = vsub.f32 1.5, %v1507_v26  ;;  %v1497_v6 = vpop.xlane.xlu0 %1496 }
 0xcca   :  { %v2444_v40 = vpop.eup %2443  ;;  %v1500_v41 = vmul.f32 %v1497_v6, %v2556_v55 }
 0xccb   :  { %v1509_v7 = vmul.f32 %v2442_v57, %v1508_v39  ;;  %v1515_v10 = vmul.f32 %v2444_v40, %v1502_v33  ;;  %vm1521_vm13 = vweird.f32 %v2444_v40  ;;  %v2361_v39 = vld [vmem:[%s3428_s3 + $0x16] ss:$0 sm:$0xff] }
 0xccc   :  { %v1503_v31 = vadd.f32 1e-05, %v1500_v41  ;;  %vm1522_vm15 = vmor %vm1520_vm14, %vm1521_vm13  ;;  %vm1843_vm14 = vcmask 1045504  }
 0xccd   :  { %v1513_v45 = vsel %vm1512_vm12, %v2442_v57, %v1509_v7  ;;  %v1516_v36 = vmul.f32 %v2444_v40, %v1515_v10  ;;  %v1589_v57 = vld [vmem:[%s3427_s1 + $0x268] sm:$0xff] }
 0xcce   :  { %v1534_v34 = vmul.f32 %v1513_v45, %v3120_v51  ;;  %2445 = vrsqrt.f32 %v1503_v31  ;;  %vm1530_vm1 = vweird.f32 %v1503_v31 }
 0xccf   :  { %v1517_v11 = vmul.f32 0.5, %v1516_v36 }
 0xcd0   :  { %v1538_v47 = vmul.f32 %v2357_v43, %v1534_v34 }
 0xcd1   :  { %v1518_v44 = vsub.f32 1.5, %v1517_v11 }
 0xcd2   :  { %v3177_v50 = vadd.f32 %v2358_v46, %v1538_v47 }
 0xcd3   :  { %v1519_v52 = vmul.f32 %v2444_v40, %v1518_v44 }
 0xcd4   :  { %v2446_v53 = vpop.eup %2445  ;;  %2293 = vmatmul.msk.f32.vlgmr.msra.gmra.mxu1 %vm137_vm9, %v3177_v50 }
 0xcd5   :  { %v1523_v21 = vsel %vm1522_vm15, %v2444_v40, %v1519_v52  ;;  %v1525_v51 = vmul.f32 %v2446_v53, %v1503_v31  ;;  %vm1531_vm0 = vweird.f32 %v2446_v53  ;;  %vm1878_vm15 = vcmask 64512  }
 0xcd6   :  { %v1535_v54 = vmul.f32 %v1523_v21, %v3126_v56  ;;  %vm1532_vm2 = vmor %vm1530_vm1, %vm1531_vm0 }
 0xcd7   :  { %v1526_v49 = vmul.f32 %v2446_v53, %v1525_v51 }
 0xcd8   :  { %v1539_v59 = vmul.f32 %v2357_v43, %v1535_v54 }
 0xcd9   :  { %v1527_v60 = vmul.f32 0.5, %v1526_v49  ;;  %v1732_v62 = vpop.xlane.xlu2 %1731 }
 0xcda   :  { %v1742_v0 = vmul.f32 %v3139_v16, %v1732_v62  ;;  %v3183_v2 = vadd.f32 %v2358_v46, %v1539_v59 }
 0xcdb   :  { %v1528_v3 = vsub.f32 1.5, %v1527_v60 }
 0xcdc   :  { %v3186_v5 = vsub.f32 %v3114_v42, %v1742_v0  ;;  %2294 = vmatmul.msk.f32.gmra.mxu1 %vm137_vm9, %v3183_v2  ;;  %v1604_v42 = vld [vmem:[%s3427_s1 + $0x2e0] sm:$0xff] }
 0xcdd   :  { %v1529_v8 = vmul.f32 %v2446_v53, %v1528_v3  ;;  %1607 = vmatpush.msrb.mxu2 %v1604_v42 }
 0xcde   :  { %v1748_v56 = vmul.f32 %v3186_v5, %v3186_v5 }
 0xcdf   :  { %v1533_v9 = vsel %vm1532_vm2, %v2446_v53, %v1529_v8  ;;  %1608 = vmatpush.msrb.mxu2 %v1603_v13 }
 0xce0   :  { %1756 = vrot.lane.b32.xlu2 %v1748_v56, %s2487_s25  ;;  %v1536_v63 = vmul.f32 %v1533_v9, %v3133_v58  ;;  %v2359_v58 = vld [vmem:[%s3428_s3 + $0x15] ss:$0 sm:$0xff] }
 0xce1   :  { %1609 = vmatpush.msrb.mxu2 %v1602_v17 }
 0xce2   :  { %v1540_v4 = vmul.f32 %v2357_v43, %v1536_v63 }
 0xce3   :  { %1610 = vmatpush.msrb.mxu2 %v1601_v18 }
 0xce4   :  { %v3194_v12 = vadd.f32 %v2358_v46, %v1540_v4 }
 0xce5   :  { %1611 = vmatpush.msrb.mxu2 %v1600_v20 }
 0xce6   :  { %2295 = vmatmul.msk.f32.gmra.mxu1 %vm137_vm9, %v3194_v12 }
 0xce7   :  { %1612 = vmatpush.msrb.mxu2 %v1599_v24 }
 0xce9   :  { %1613 = vmatpush.msrb.mxu2 %v1598_v25 }
 0xceb   :  { %1614 = vmatpush.msrb.mxu2 %v1597_v23 }
 0xced   :  { %1615 = vmatpush.msrb.mxu2 %v1596_v27 }
 0xcef   :  { %1616 = vmatpush.msrb.mxu2 %v1595_v48 }
 0xcf1   :  { %1617 = vmatpush.msrb.mxu2 %v1594_v28 }
 0xcf3   :  { %1618 = vmatpush.msrb.mxu2 %v1593_v29 }
 0xcf5   :  { %1619 = vmatpush.msrb.mxu2 %v1592_v22 }
 0xcf7   :  { %1620 = vmatpush.msrb.mxu2 %v1591_v30 }
 0xcf9   :  { %1621 = vmatpush.msrb.mxu2 %v1590_v32  ;;  %v1825_v32 = vld [vmem:[%s3427_s1 + $0x2e8] sm:$0x3f] }
 0xcfa   :  { %2296 = vmatpush.msk.msra.mxu0 %vm1843_vm14, %v1825_v32  ;;  %v1961_v32 = vld [vmem:[%s3427_s1 + $0x2f8] sm:$0xff] }
 0xcfb   :  { %1622 = vmatpush.msrb.mxu2 %v1589_v57 }
 0xcfe   :  { %v1753_v14 = vpop.permute.xlu1 %1752 }
 0xcff   :  { %v1761_v15 = vsel %vm1723_vm4, %v1753_v14, 0.0 }
 0xd00   :  { %1762 = vadd.xlane.f32.xlu0 %v1761_v15 }
 0xd14   :  { %1811 = vrot.lane.b32.xlu0 %v2359_v58, %s2489_s29 }
 0xd3a   :  { %v1757_v33 = vpop.permute.xlu2 %1756  ;;  %v1755_v35 = vpop.permute.xlu0 %1754 }
 0xd3b   :  { %v1767_v37 = vsel %vm1723_vm4, %v1757_v33, 0.0  ;;  %v1764_v61 = vsel %vm1723_vm4, %v1755_v35, 0.0 }
 0xd3c   :  { %1768 = vadd.xlane.f32.xlu2 %v1767_v37  ;;  %1765 = vadd.xlane.f32.xlu1 %v1764_v61 }
 0xd51   :  { %v1577_v26 = vpop.f32.mrf.mxu1 }
 0xd52   :  { %v1578_v6 = vadd.f32 %v2360_v38, %v1577_v26 }
 0xd54   :  { %v1586_v40 = vmax.f32 %v1578_v6, 0.0 }
 0xd55   :  { %1819 = vrot.lane.b32.xlu1 %v2361_v39, %s2489_s29 }
 0xd56   :  { %1623 = vmatmul.f32.vlgmr.msrb.gmra.mxu2 %v1586_v40 }
 0xd59   :  { %v1580_v41 = vpop.f32.mrf.mxu1 }
 0xd5a   :  { %v1581_v7 = vadd.f32 %v2360_v38, %v1580_v41 }
 0xd5c   :  { %v1587_v10 = vmax.f32 %v1581_v7, 0.0 }
 0xd5e   :  { %1626 = vmatmul.f32.gmra.mxu2 %v1587_v10 }
 0xd63   :  { %v1583_v43 = vpop.f32.mrf.mxu1 }
 0xd64   :  { %v1584_v31 = vadd.f32 %v2360_v38, %v1583_v43 }
 0xd66   :  { %v1588_v45 = vmax.f32 %v1584_v31, 0.0 }
 0xd68   :  { %1629 = vmatmul.f32.gmra.mxu2 %v1588_v45 }
 0xd73   :  { %v1763_v36 = vpop.xlane.xlu0 %1762 }
 0xd74   :  { %v1770_v34 = vmul.f32 %v1763_v36, %v3139_v16 }
 0xd76   :  { %v1773_v46 = vadd.f32 1e-05, %v1770_v34 }
 0xd78   :  { %2447 = vrsqrt.f32 %v1773_v46  ;;  %vm1782_vm3 = vweird.f32 %v1773_v46 }
 0xd7e   :  { %v2448_v11 = vpop.eup %2447 }
 0xd7f   :  { %v1777_v47 = vmul.f32 %v2448_v11, %v1773_v46  ;;  %vm1783_vm5 = vweird.f32 %v2448_v11 }
 0xd80   :  { %vm1784_vm6 = vmor %vm1782_vm3, %vm1783_vm5 }
 0xd81   :  { %v1778_v44 = vmul.f32 %v2448_v11, %v1777_v47 }
 0xd83   :  { %v1779_v59 = vmul.f32 0.5, %v1778_v44 }
 0xd85   :  { %v1780_v60 = vsub.f32 1.5, %v1779_v59 }
 0xd86   :  { %v1812_v58 = vpop.permute.xlu0 %1811 }
 0xd87   :  { %v1781_v3 = vmul.f32 %v2448_v11, %v1780_v60 }
 0xd89   :  { %v1785_v4 = vsel %vm1784_vm6, %v2448_v11, %v1781_v3 }
 0xd8a   :  { %v1806_v14 = vmul.f32 %v1785_v4, %v3143_v19 }
 0xd8c   :  { %v1814_v24 = vmul.f32 %v1812_v58, %v1806_v14 }
 0xdaf   :  { %v1769_v52 = vpop.xlane.xlu2 %1768  ;;  %v1766_v53 = vpop.xlane.xlu1 %1765 }
 0xdb0   :  { %v1772_v21 = vmul.f32 %v1769_v52, %v3139_v16  ;;  %v1771_v51 = vmul.f32 %v1766_v53, %v3139_v16 }
 0xdb2   :  { %v1775_v54 = vadd.f32 1e-05, %v1772_v21  ;;  %v1774_v49 = vadd.f32 1e-05, %v1771_v51 }
 0xdb4   :  { %2449 = vrsqrt.f32 %v1775_v54  ;;  %vm1802_vm7 = vweird.f32 %v1775_v54  ;;  %vm1792_vm12 = vweird.f32 %v1774_v49 }
 0xdb5   :  { %2451 = vrsqrt.f32 %v1774_v49 }
 0xdba   :  { %v2450_v62 = vpop.eup %2449 }
 0xdbb   :  { %v2452_v0 = vpop.eup %2451  ;;  %v1797_v8 = vmul.f32 %v2450_v62, %v1775_v54  ;;  %vm1803_vm11 = vweird.f32 %v2450_v62 }
 0xdbc   :  { %v1787_v56 = vmul.f32 %v2452_v0, %v1774_v49  ;;  %vm1793_vm8 = vweird.f32 %v2452_v0  ;;  %vm1804_vm10 = vmor %vm1802_vm7, %vm1803_vm11 }
 0xdbd   :  { %v1798_v9 = vmul.f32 %v2450_v62, %v1797_v8  ;;  %vm1794_vm13 = vmor %vm1792_vm12, %vm1793_vm8 }
 0xdbe   :  { %v1788_v63 = vmul.f32 %v2452_v0, %v1787_v56 }
 0xdbf   :  { %v1799_v42 = vmul.f32 0.5, %v1798_v9 }
 0xdc0   :  { %v1789_v13 = vmul.f32 0.5, %v1788_v63 }
 0xdc1   :  { %v1800_v16 = vsub.f32 1.5, %v1799_v42 }
 0xdc2   :  { %v1790_v15 = vsub.f32 1.5, %v1789_v13 }
 0xdc3   :  { %v1801_v17 = vmul.f32 %v2450_v62, %v1800_v16 }
 0xdc4   :  { %v1791_v18 = vmul.f32 %v2452_v0, %v1790_v15 }
 0xdc5   :  { %v1805_v20 = vsel %vm1804_vm10, %v2450_v62, %v1801_v17  ;;  %v2490_v62 = vmov 8.0  }
 0xdc6   :  { %v1795_v25 = vsel %vm1794_vm13, %v2452_v0, %v1791_v18  ;;  %v1808_v23 = vmul.f32 %v1805_v20, %v3186_v5  ;;  %2453 = vrcp.f32 %v2490_v62 }
 0xdc7   :  { %v1807_v27 = vmul.f32 %v1795_v25, %v3164_v1  ;;  %v1820_v48 = vpop.permute.xlu1 %1819  ;;  %v2362_v1 = vld [vmem:[%s3428_s3 + $0x12] ss:$0 sm:$0xff] }
 0xdc8   :  { %v1816_v28 = vmul.f32 %v1812_v58, %v1808_v23  ;;  %v1822_v29 = vadd.f32 %v1820_v48, %v1814_v24 }
 0xdc9   :  { %v1815_v22 = vmul.f32 %v1812_v58, %v1807_v27  ;;  %v1963_v27 = vld [vmem:[%s3427_s1 + $0x308] sm:$0xff] }
 0xdca   :  { %v1824_v19 = vadd.f32 %v1820_v48, %v1816_v28  ;;  %1831 = vrot.lane.b32.xlu2 %v1822_v29, %s2487_s25  ;;  %2021 = vmatpush.msrb.mxu1 %v1963_v27  ;;  %v1962_v28 = vld [vmem:[%s3427_s1 + $0x300] sm:$0xff] }
 0xdcb   :  { %v1823_v30 = vadd.f32 %v1820_v48, %v1815_v22 }
 0xdcc   :  { %1835 = vrot.lane.b32.xlu1 %v1824_v19, %s2487_s25  ;;  %v2454_v0 = vpop.eup %2453  ;;  %2022 = vmatpush.msrb.mxu1 %v1962_v28 }
 0xdcd   :  { %1833 = vrot.lane.b32.xlu0 %v1823_v30, %s2487_s25  ;;  %v1889_v3 = vmul.f32 8.0, %v2454_v0 }
 0xdce   :  { %2023 = vmatpush.msrb.mxu1 %v1961_v32 }
 0xdd9   :  { %v1624_v5 = vpop.f32.mrf.mxu2 }
 0xdda   :  { %v1625_v57 = vadd.f32 %v2362_v1, %v1624_v5  ;;  %v1960_v5 = vld [vmem:[%s3427_s1 + $0x2f0] sm:$0xff] }
 0xddb   :  { %2024 = vmatpush.msrb.mxu1 %v1960_v5 }
 0xddc   :  { %v1633_v33 = vadd.f32 %v1625_v57, %v3177_v50  ;;  %v2363_v50 = vld [vmem:[%s3428_s3 + $0x17] ss:$0 sm:$0xff] }
 0xdde   :  { %v1638_v61 = vsel %vm137_vm9, %v1633_v33, 0.0 }
 0xde1   :  { %v1627_v35 = vpop.f32.mrf.mxu2 }
 0xde2   :  { %v1628_v37 = vadd.f32 %v2362_v1, %v1627_v35 }
 0xde4   :  { %v1634_v38 = vadd.f32 %v1628_v37, %v3183_v2 }
 0xde6   :  { %v1641_v26 = vsel %vm137_vm9, %v1634_v38, 0.0 }
 0xdeb   :  { %v1630_v45 = vpop.f32.mrf.mxu2 }
 0xdec   :  { %v1631_v34 = vadd.f32 %v2362_v1, %v1630_v45  ;;  %v3350_v45 = vld [vmem:[%s3428_s3 + $0x14] ss:$0 sm:$0xff] }
 0xdee   :  { %v1635_v53 = vadd.f32 %v1631_v34, %v3194_v12  ;;  %v1890_v12 = vsub.f32 1.0, %v1889_v3 }
 0xdf0   :  { %v1644_v54 = vsel %vm137_vm9, %v1635_v53, 0.0  ;;  %v1891_v8 = vmul.f32 %v2454_v0, %v1890_v12  ;;  %v3363_v12 = vld [vmem:[%s3428_s3 + $0x18] ss:$0 sm:$0xff] }
 0xdf2   :  { %v1892_v56 = vadd.f32 %v2454_v0, %v1891_v8 }
 0xdf3   :  { %1639 = vadd.xlane.f32.xlu2 %v1638_v61 }
 0xdfb   :  { %1642 = vadd.xlane.f32.xlu2 %v1641_v26 }
 0xe24   :  { %v1832_v39 = vpop.permute.xlu2 %1831 }
 0xe25   :  { %2297 = vmatmul.msk.f32.vlgmr.msra.gmra.mxu0 %vm1723_vm4, %v1832_v39 }
 0xe3e   :  { %v1836_v40 = vpop.permute.xlu1 %1835 }
 0xe3f   :  { %v1834_v6 = vpop.permute.xlu0 %1833 }
 0xe40   :  { %2298 = vmatmul.msk.f32.gmra.mxu0 %vm1723_vm4, %v1834_v6 }
 0xe48   :  { %2299 = vmatmul.msk.f32.gmra.mxu0 %vm1723_vm4, %v1836_v40  ;;  %vm1893_vm4 = vweird.f32 %v2454_v0 }
 0xe49   :  { %v3296_v9 = vsel %vm1893_vm4, %v2454_v0, %v1892_v56 }
 0xe66   :  { %v1640_v11 = vpop.xlane.xlu2 %1639 }
 0xe67   :  { %v1647_v44 = vmul.f32 %v1640_v11, %v2556_v55 }
 0xe69   :  { %v3289_v51 = vsub.f32 %v1633_v33, %v1647_v44 }
 0xe6b   :  { %v1653_v59 = vmul.f32 %v3289_v51, %v3289_v51 }
 0xe6d   :  { %v1656_v60 = vsel %vm137_vm9, %v1653_v59, 0.0 }
 0xe6e   :  { %v1643_v63 = vpop.xlane.xlu2 %1642 }
 0xe6f   :  { %v1648_v13 = vmul.f32 %v1643_v63, %v2556_v55 }
 0xe71   :  { %v3304_v15 = vsub.f32 %v1634_v38, %v1648_v13 }
 0xe73   :  { %v1654_v17 = vmul.f32 %v3304_v15, %v3304_v15 }
 0xe75   :  { %v1659_v18 = vsel %vm137_vm9, %v1654_v17, 0.0 }
 0xea2   :  { %v1864_v41 = vpop.f32.mrf.mxu0 }
 0xea3   :  { %v1865_v7 = vadd.f32 %v2363_v50, %v1864_v41 }
 0xea5   :  { %v1873_v2 = vmax.f32 %v1865_v7, 0.0 }
 0xea7   :  { %v1879_v10 = vsel %vm1878_vm15, %v1873_v2, 0.0 }
 0xea8   :  { %1880 = vadd.xlane.f32.xlu0 %v1879_v10  ;;  %v3344_v10 = vld [vmem:[%s3428_s3 + $0x13] ss:$0 sm:$0xff] }
 0xebd   :  { %v1867_v43 = vpop.f32.mrf.mxu0 }
 0xebe   :  { %v1868_v31 = vadd.f32 %v2363_v50, %v1867_v43 }
 0xec0   :  { %v1874_v36 = vmax.f32 %v1868_v31, 0.0 }
 0xec2   :  { %v1882_v46 = vsel %vm1878_vm15, %v1874_v36, 0.0 }
 0xec3   :  { %1883 = vadd.xlane.f32.xlu1 %v1882_v46  ;;  %v1964_v46 = vld [vmem:[%s3427_s1 + $0x310] sm:$0xff] }
 0xec4   :  { %1989 = vmatpush.msra.mxu3 %v1964_v46 }
 0xec5   :  { %v1870_v47 = vpop.f32.mrf.mxu0 }
 0xec6   :  { %v1871_v52 = vadd.f32 %v2363_v50, %v1870_v47 }
 0xec8   :  { %v1875_v21 = vmax.f32 %v1871_v52, 0.0 }
 0xeca   :  { %v1885_v49 = vsel %vm1878_vm15, %v1875_v21, 0.0 }
 0xecb   :  { %1645 = vadd.xlane.f32.xlu1 %v1644_v54  ;;  %1886 = vadd.xlane.f32.xlu0 %v1885_v49 }
 0xed3   :  { %1657 = vadd.xlane.f32.xlu0 %v1656_v60 }
 0xf1b   :  { %v1881_v4 = vpop.xlane.xlu0 %1880 }
 0xf1c   :  { %v1895_v42 = vmul.f32 %v3296_v9, %v1881_v4  ;;  %v3369_v4 = vld [vmem:[%s3428_s3 + $0x19] ss:$0 sm:$0xff] }
 0xf1e   :  { %v3300_v16 = vsub.f32 %v1873_v2, %v1895_v42 }
 0xf20   :  { %v1901_v14 = vmul.f32 %v3300_v16, %v3300_v16 }
 0xf22   :  { %v1904_v58 = vsel %vm1878_vm15, %v1901_v14, 0.0 }
 0xf23   :  { %1905 = vadd.xlane.f32.xlu2 %v1904_v58 }
 0xf2b   :  { %1660 = vadd.xlane.f32.xlu2 %v1659_v18 }
 0xf36   :  { %v1884_v20 = vpop.xlane.xlu1 %1883 }
 0xf37   :  { %v1896_v24 = vmul.f32 %v3296_v9, %v1884_v20 }
 0xf39   :  { %v3311_v25 = vsub.f32 %v1874_v36, %v1896_v24 }
 0xf3b   :  { %v1902_v23 = vmul.f32 %v3311_v25, %v3311_v25 }
 0xf3d   :  { %v1907_v48 = vsel %vm1878_vm15, %v1902_v23, 0.0 }
 0xf3e   :  { %1908 = vadd.xlane.f32.xlu1 %v1907_v48  ;;  %v1646_v29 = vpop.xlane.xlu1 %1645  ;;  %v1887_v22 = vpop.xlane.xlu0 %1886 }
 0xf3f   :  { %v1649_v19 = vmul.f32 %v1646_v29, %v2556_v55  ;;  %v1897_v30 = vmul.f32 %v3296_v9, %v1887_v22 }
 0xf41   :  { %v3330_v1 = vsub.f32 %v1635_v53, %v1649_v19  ;;  %v3332_v57 = vsub.f32 %v1875_v21, %v1897_v30 }
 0xf43   :  { %v1655_v33 = vmul.f32 %v3330_v1, %v3330_v1  ;;  %v1903_v35 = vmul.f32 %v3332_v57, %v3332_v57 }
 0xf45   :  { %v1662_v37 = vsel %vm137_vm9, %v1655_v33, 0.0  ;;  %v1910_v61 = vsel %vm1878_vm15, %v1903_v35, 0.0 }
 0xf46   :  { %1663 = vadd.xlane.f32.xlu1 %v1662_v37  ;;  %1911 = vadd.xlane.f32.xlu0 %v1910_v61  ;;  %v1658_v38 = vpop.xlane.xlu0 %1657 }
 0xf47   :  { %v1665_v26 = vmul.f32 %v1658_v38, %v2556_v55 }
 0xf49   :  { %v1668_v39 = vadd.f32 1e-05, %v1665_v26 }
 0xf4b   :  { %2455 = vrsqrt.f32 %v1668_v39  ;;  %vm1677_vm1 = vweird.f32 %v1668_v39 }
 0xf51   :  { %v2456_v6 = vpop.eup %2455 }
 0xf52   :  { %v1672_v40 = vmul.f32 %v2456_v6, %v1668_v39  ;;  %vm1678_vm0 = vweird.f32 %v2456_v6 }
 0xf53   :  { %vm1679_vm2 = vmor %vm1677_vm1, %vm1678_vm0 }
 0xf54   :  { %v1673_v50 = vmul.f32 %v2456_v6, %v1672_v40 }
 0xf56   :  { %v1674_v41 = vmul.f32 0.5, %v1673_v50 }
 0xf58   :  { %v1675_v7 = vsub.f32 1.5, %v1674_v41 }
 0xf5a   :  { %v1676_v2 = vmul.f32 %v2456_v6, %v1675_v7 }
 0xf5c   :  { %v1680_v43 = vsel %vm1679_vm2, %v2456_v6, %v1676_v2 }
 0xf5d   :  { %v1701_v31 = vmul.f32 %v1680_v43, %v3289_v51 }
 0xf5f   :  { %v1705_v36 = vmul.f32 %v3344_v10, %v1701_v31 }
 0xf61   :  { %v1709_v34 = vadd.f32 %v3350_v45, %v1705_v36 }
 0xf63   :  { %2303 = vmatmul.msk.f32.vlgmr.msrb.gmra.mxu1 %vm137_vm9, %v1709_v34 }
 0xf96   :  { %v1906_v11 = vpop.xlane.xlu2 %1905 }
 0xf97   :  { %v1913_v47 = vmul.f32 %v1906_v11, %v3296_v9 }
 0xf99   :  { %v1916_v44 = vadd.f32 1e-05, %v1913_v47 }
 0xf9b   :  { %2457 = vrsqrt.f32 %v1916_v44  ;;  %vm1925_vm5 = vweird.f32 %v1916_v44 }
 0xf9e   :  { %v1661_v52 = vpop.xlane.xlu2 %1660 }
 0xf9f   :  { %v1666_v53 = vmul.f32 %v1661_v52, %v2556_v55 }
 0xfa1   :  { %v2458_v21 = vpop.eup %2457  ;;  %v1669_v51 = vadd.f32 1e-05, %v1666_v53 }
 0xfa2   :  { %v1920_v54 = vmul.f32 %v2458_v21, %v1916_v44  ;;  %vm1926_vm3 = vweird.f32 %v2458_v21 }
 0xfa3   :  { %2459 = vrsqrt.f32 %v1669_v51  ;;  %vm1927_vm6 = vmor %vm1925_vm5, %vm1926_vm3  ;;  %vm1687_vm11 = vweird.f32 %v1669_v51  ;;  %vm2045_vm5 = vcmask 80896  }
 0xfa4   :  { %v1921_v49 = vmul.f32 %v2458_v21, %v1920_v54  ;;  %v2368_v54 = vld [vmem:[%s3428_s3 + $0x1a] ss:$0 sm:$0xff] }
 0xfa6   :  { %v1922_v59 = vmul.f32 0.5, %v1921_v49 }
 0xfa8   :  { %v1923_v60 = vsub.f32 1.5, %v1922_v59 }
 0xfa9   :  { %v2460_v62 = vpop.eup %2459 }
 0xfaa   :  { %v1924_v0 = vmul.f32 %v2458_v21, %v1923_v60  ;;  %v1682_v3 = vmul.f32 %v2460_v62, %v1669_v51  ;;  %vm1688_vm7 = vweird.f32 %v2460_v62 }
 0xfab   :  { %vm1689_vm8 = vmor %vm1687_vm11, %vm1688_vm7 }
 0xfac   :  { %v1928_v8 = vsel %vm1927_vm6, %v2458_v21, %v1924_v0  ;;  %v1683_v56 = vmul.f32 %v2460_v62, %v1682_v3 }
 0xfad   :  { %v1949_v63 = vmul.f32 %v1928_v8, %v3300_v16 }
 0xfae   :  { %v1684_v42 = vmul.f32 0.5, %v1683_v56 }
 0xfaf   :  { %v1953_v13 = vmul.f32 %v3363_v12, %v1949_v63 }
 0xfb0   :  { %v1685_v14 = vsub.f32 1.5, %v1684_v42 }
 0xfb1   :  { %v1909_v58 = vpop.xlane.xlu1 %1908  ;;  %v1957_v17 = vadd.f32 %v3369_v4, %v1953_v13 }
 0xfb2   :  { %v1686_v18 = vmul.f32 %v2460_v62, %v1685_v14  ;;  %v1914_v20 = vmul.f32 %v1909_v58, %v3296_v9  ;;  %v2491_v58 = vmov 10.0  }
 0xfb3   :  { %2300 = vmatmul.msk.f32.vlgmr.msra.gmra.mxu3 %vm1878_vm15, %v1957_v17 }
 0xfb4   :  { %v1690_v16 = vsel %vm1689_vm8, %v2460_v62, %v1686_v18  ;;  %v1917_v24 = vadd.f32 1e-05, %v1914_v20 }
 0xfb5   :  { %v1702_v23 = vmul.f32 %v1690_v16, %v3304_v15 }
 0xfb6   :  { %2461 = vrsqrt.f32 %v1917_v24  ;;  %vm1935_vm12 = vweird.f32 %v1917_v24 }
 0xfb7   :  { %v1706_v27 = vmul.f32 %v3344_v10, %v1702_v23 }
 0xfb9   :  { %v1664_v48 = vpop.xlane.xlu1 %1663  ;;  %v1912_v28 = vpop.xlane.xlu0 %1911  ;;  %v1710_v29 = vadd.f32 %v3350_v45, %v1706_v27 }
 0xfba   :  { %v1667_v22 = vmul.f32 %v1664_v48, %v2556_v55  ;;  %v1915_v19 = vmul.f32 %v1912_v28, %v3296_v9 }
 0xfbb   :  { %2304 = vmatmul.msk.f32.gmra.mxu1 %vm137_vm9, %v1710_v29 }
 0xfbc   :  { %v2462_v30 = vpop.eup %2461  ;;  %v1670_v32 = vadd.f32 1e-05, %v1667_v22  ;;  %v1918_v5 = vadd.f32 1e-05, %v1915_v19 }
 0xfbd   :  { %v1930_v33 = vmul.f32 %v2462_v30, %v1917_v24  ;;  %vm1936_vm10 = vweird.f32 %v2462_v30 }
 0xfbe   :  { %2463 = vrsqrt.f32 %v1670_v32  ;;  %vm1937_vm13 = vmor %vm1935_vm12, %vm1936_vm10  ;;  %vm1697_vm0 = vweird.f32 %v1670_v32  ;;  %vm1945_vm2 = vweird.f32 %v1918_v5 }
 0xfbf   :  { %v1931_v35 = vmul.f32 %v2462_v30, %v1930_v33  ;;  %2465 = vrsqrt.f32 %v1918_v5 }
 0xfc0   :  { %2467 = vrcp.f32 %v2491_v58  ;;  %v2127_v58 = vld [vmem:[%s3428_s3 + $0x1d] sm:$0x1] }
 0xfc1   :  { %v1932_v15 = vmul.f32 0.5, %v1931_v35 }
 0xfc3   :  { %v1933_v37 = vsub.f32 1.5, %v1932_v15 }
 0xfc4   :  { %v2464_v61 = vpop.eup %2463 }
 0xfc5   :  { %v2466_v38 = vpop.eup %2465  ;;  %v1934_v26 = vmul.f32 %v2462_v30, %v1933_v37  ;;  %v1692_v39 = vmul.f32 %v2464_v61, %v1670_v32  ;;  %vm1698_vm14 = vweird.f32 %v2464_v61 }
 0xfc6   :  { %v1940_v55 = vmul.f32 %v2466_v38, %v1918_v5  ;;  %vm1946_vm4 = vweird.f32 %v2466_v38  ;;  %vm1699_vm1 = vmor %vm1697_vm0, %vm1698_vm14  ;;  %v2468_v17 = vpop.eup %2467 }
 0xfc7   :  { %v1938_v9 = vsel %vm1937_vm13, %v2462_v30, %v1934_v26  ;;  %v1693_v6 = vmul.f32 %v2464_v61, %v1692_v39  ;;  %vm1947_vm3 = vmor %vm1945_vm2, %vm1946_vm4  ;;  %v2056_v18 = vmul.f32 10.0, %v2468_v17  ;;  %vm2185_vm2 = vcmask 188416  }
 0xfc8   :  { %v1941_v40 = vmul.f32 %v2466_v38, %v1940_v55  ;;  %v1950_v50 = vmul.f32 %v1938_v9, %v3311_v25 }
 0xfc9   :  { %v1694_v41 = vmul.f32 0.5, %v1693_v6  ;;  %v2057_v20 = vsub.f32 1.0, %v2056_v18 }
 0xfca   :  { %v1942_v7 = vmul.f32 0.5, %v1941_v40  ;;  %v1954_v2 = vmul.f32 %v3363_v12, %v1950_v50 }
 0xfcb   :  { %v1695_v43 = vsub.f32 1.5, %v1694_v41  ;;  %v2058_v16 = vmul.f32 %v2468_v17, %v2057_v20 }
 0xfcc   :  { %v1943_v31 = vsub.f32 1.5, %v1942_v7  ;;  %v1958_v36 = vadd.f32 %v3369_v4, %v1954_v2 }
 0xfcd   :  { %v1696_v34 = vmul.f32 %v2464_v61, %v1695_v43  ;;  %v2059_v24 = vadd.f32 %v2468_v17, %v2058_v16 }
 0xfce   :  { %v1944_v46 = vmul.f32 %v2466_v38, %v1943_v31  ;;  %2301 = vmatmul.msk.f32.gmra.mxu3 %vm1878_vm15, %v1958_v36 }
 0xfcf   :  { %v1700_v11 = vsel %vm1699_vm1, %v2464_v61, %v1696_v34 }
 0xfd0   :  { %v1703_v25 = vmul.f32 %v1700_v11, %v3330_v1  ;;  %v1948_v47 = vsel %vm1947_vm3, %v2466_v38, %v1944_v46 }
 0xfd1   :  { %v1951_v44 = vmul.f32 %v1948_v47, %v3332_v57 }
 0xfd2   :  { %v1707_v52 = vmul.f32 %v3344_v10, %v1703_v25  ;;  %v2128_v25 = vld [vmem:[%s3428_s3 + $0x1e] sm:$0x1] }
 0xfd3   :  { %v1955_v53 = vmul.f32 %v3363_v12, %v1951_v44 }
 0xfd4   :  { %v1711_v21 = vadd.f32 %v3350_v45, %v1707_v52 }
 0xfd5   :  { %v1959_v51 = vadd.f32 %v3369_v4, %v1955_v53 }
 0xfd6   :  { %2305 = vmatmul.msk.f32.gmra.mxu1 %vm137_vm9, %v1711_v21  ;;  %vm2060_vm9 = vweird.f32 %v2468_v17 }
 0xfd7   :  { %2302 = vmatmul.msk.f32.gmra.mxu3 %vm1878_vm15, %v1959_v51  ;;  %v2061_v23 = vsel %vm2060_vm9, %v2468_v17, %v2059_v24 }
 0xfe0   :  { %v2026_v1 = vpop.f32.mrf.mxu1 }
0x1036   :  { %v1991_v49 = vpop.f32.mrf.mxu3 }
0x1037   :  { %v2027_v59 = vadd.f32 %v2026_v1, %v1991_v49 }
0x1038   :  { %v2029_v45 = vpop.f32.mrf.mxu1 }
0x1039   :  { %v2037_v57 = vadd.f32 %v2368_v54, %v2027_v59 }
0x103b   :  { %v2040_v10 = vmax.f32 %v2037_v57, 0.0 }
0x103d   :  { %v2046_v60 = vsel %vm2045_vm5, %v2040_v10, 0.0 }
0x103e   :  { %2047 = vadd.xlane.f32.xlu1 %v2046_v60 }
0x1051   :  { %v1994_v62 = vpop.f32.mrf.mxu3 }
0x1052   :  { %v2030_v0 = vadd.f32 %v2029_v45, %v1994_v62  ;;  %v2369_v62 = vld [vmem:[%s3428_s3 + $0x1b] ss:$0 sm:$0xff] }
0x1053   :  { %v2032_v56 = vpop.f32.mrf.mxu1 }
0x1054   :  { %v2038_v3 = vadd.f32 %v2368_v54, %v2030_v0 }
0x1056   :  { %v2041_v12 = vmax.f32 %v2038_v3, 0.0 }
0x1058   :  { %v2049_v8 = vsel %vm2045_vm5, %v2041_v12, 0.0 }
0x1059   :  { %2050 = vadd.xlane.f32.xlu0 %v2049_v8  ;;  %v2370_v8 = vld [vmem:[%s3428_s3 + $0x1c] ss:$0 sm:$0xff] }
0x105a   :  { %v1997_v63 = vpop.f32.mrf.mxu3 }
0x105b   :  { %v2033_v4 = vadd.f32 %v2032_v56, %v1997_v63 }
0x105d   :  { %v2039_v42 = vadd.f32 %v2368_v54, %v2033_v4 }
0x105f   :  { %v2042_v13 = vmax.f32 %v2039_v42, 0.0 }
0x1061   :  { %v2052_v14 = vsel %vm2045_vm5, %v2042_v13, 0.0 }
0x1062   :  { %2053 = vadd.xlane.f32.xlu2 %v2052_v14 }
0x10b1   :  { %v2048_v27 = vpop.xlane.xlu1 %2047 }
0x10b2   :  { %v2062_v48 = vmul.f32 %v2061_v23, %v2048_v27 }
0x10b4   :  { %v3399_v28 = vsub.f32 %v2040_v10, %v2062_v48 }
0x10b6   :  { %v2068_v29 = vmul.f32 %v3399_v28, %v3399_v28 }
0x10b8   :  { %v2071_v22 = vsel %vm2045_vm5, %v2068_v29, 0.0 }
0x10b9   :  { %2072 = vadd.xlane.f32.xlu1 %v2071_v22 }
0x10cc   :  { %v2051_v19 = vpop.xlane.xlu0 %2050 }
0x10cd   :  { %v2063_v30 = vmul.f32 %v2061_v23, %v2051_v19 }
0x10cf   :  { %v2066_v32 = vsub.f32 %v2041_v12, %v2063_v30 }
0x10d1   :  { %v2069_v5 = vmul.f32 %v2066_v32, %v2066_v32 }
0x10d3   :  { %v2074_v33 = vsel %vm2045_vm5, %v2069_v5, 0.0 }
0x10d4   :  { %2075 = vadd.xlane.f32.xlu0 %v2074_v33 }
0x10d5   :  { %v2054_v35 = vpop.xlane.xlu2 %2053 }
0x10d6   :  { %v2064_v15 = vmul.f32 %v2061_v23, %v2054_v35 }
0x10d8   :  { %v2067_v37 = vsub.f32 %v2042_v13, %v2064_v15 }
0x10da   :  { %v2070_v61 = vmul.f32 %v2067_v37, %v2067_v37 }
0x10dc   :  { %v2077_v38 = vsel %vm2045_vm5, %v2070_v61, 0.0 }
0x10dd   :  { %2078 = vadd.xlane.f32.xlu2 %v2077_v38 }
0x10f5   :  { %2131 = vperm.xlu2 %2340, %v2128_v25  }
0x112c   :  { %v2073_v26 = vpop.xlane.xlu1 %2072 }
0x112d   :  { %v2080_v39 = vmul.f32 %v2073_v26, %v2061_v23 }
0x112f   :  { %v2083_v55 = vadd.f32 1e-05, %v2080_v39 }
0x1131   :  { %2469 = vrsqrt.f32 %v2083_v55  ;;  %vm2092_vm13 = vweird.f32 %v2083_v55 }
0x1137   :  { %v2470_v41 = vpop.eup %2469 }
0x1138   :  { %v2087_v36 = vmul.f32 %v2470_v41, %v2083_v55  ;;  %vm2093_vm11 = vweird.f32 %v2470_v41 }
0x1139   :  { %vm2094_vm14 = vmor %vm2092_vm13, %vm2093_vm11 }
0x113a   :  { %v2088_v46 = vmul.f32 %v2470_v41, %v2087_v36 }
0x113c   :  { %v2089_v44 = vmul.f32 0.5, %v2088_v46 }
0x113e   :  { %v2090_v51 = vsub.f32 1.5, %v2089_v44 }
0x1140   :  { %v2091_v59 = vmul.f32 %v2470_v41, %v2090_v51 }
0x1142   :  { %v2095_v3 = vsel %vm2094_vm14, %v2470_v41, %v2091_v59 }
0x1143   :  { %v2116_v56 = vmul.f32 %v2095_v3, %v3399_v28 }
0x1145   :  { %v2120_v13 = vmul.f32 %v2369_v62, %v2116_v56 }
0x1147   :  { %v2076_v9 = vpop.xlane.xlu0 %2075  ;;  %v2124_v14 = vadd.f32 %v2370_v8, %v2120_v13 }
0x1148   :  { %v2081_v6 = vmul.f32 %v2076_v9, %v2061_v23 }
0x114a   :  { %v2084_v40 = vadd.f32 1e-05, %v2081_v6 }
0x114c   :  { %2471 = vrsqrt.f32 %v2084_v40  ;;  %vm2102_vm6 = vweird.f32 %v2084_v40 }
0x1150   :  { %v2079_v50 = vpop.xlane.xlu2 %2078 }
0x1151   :  { %v2082_v7 = vmul.f32 %v2079_v50, %v2061_v23 }
0x1152   :  { %v2472_v2 = vpop.eup %2471 }
0x1153   :  { %v2097_v43 = vmul.f32 %v2472_v2, %v2084_v40  ;;  %v2085_v31 = vadd.f32 1e-05, %v2082_v7  ;;  %vm2103_vm15 = vweird.f32 %v2472_v2 }
0x1154   :  { %vm2104_vm8 = vmor %vm2102_vm6, %vm2103_vm15 }
0x1155   :  { %v2098_v34 = vmul.f32 %v2472_v2, %v2097_v43  ;;  %2473 = vrsqrt.f32 %v2085_v31  ;;  %vm2112_vm10 = vweird.f32 %v2085_v31 }
0x1157   :  { %v2099_v11 = vmul.f32 0.5, %v2098_v34 }
0x1158   :  { %v2132_v17 = vpop.permute.xlu2 %2131 }
0x1159   :  { %v2100_v52 = vsub.f32 1.5, %v2099_v11 }
0x115b   :  { %v2474_v47 = vpop.eup %2473  ;;  %v2101_v54 = vmul.f32 %v2472_v2, %v2100_v52 }
0x115c   :  { %v2107_v53 = vmul.f32 %v2474_v47, %v2085_v31  ;;  %vm2113_vm7 = vweird.f32 %v2474_v47 }
0x115d   :  { %v2105_v57 = vsel %vm2104_vm8, %v2472_v2, %v2101_v54  ;;  %vm2114_vm12 = vmor %vm2112_vm10, %vm2113_vm7 }
0x115e   :  { %v2108_v21 = vmul.f32 %v2474_v47, %v2107_v53  ;;  %v2117_v45 = vmul.f32 %v2105_v57, %v2066_v32 }
0x1160   :  { %v2109_v1 = vmul.f32 0.5, %v2108_v21  ;;  %v2121_v4 = vmul.f32 %v2369_v62, %v2117_v45 }
0x1162   :  { %v2110_v49 = vsub.f32 1.5, %v2109_v1  ;;  %v2125_v42 = vadd.f32 %v2370_v8, %v2121_v4 }
0x1164   :  { %v2111_v10 = vmul.f32 %v2474_v47, %v2110_v49 }
0x1166   :  { %v2115_v60 = vsel %vm2114_vm12, %v2474_v47, %v2111_v10 }
0x1167   :  { %v2118_v0 = vmul.f32 %v2115_v60, %v2067_v37 }
0x1169   :  { %v2122_v12 = vmul.f32 %v2369_v62, %v2118_v0 }
0x116b   :  { %v2126_v63 = vadd.f32 %v2370_v8, %v2122_v12 }
0x116d   :  { %2306 = vmatpush.xpose.msk.msrb.mxu0 %vm2045_vm5, %v2126_v63 }
0x1171   :  { %2307 = vmatpush.xpose.msk.msrb.mxu0 %vm2045_vm5, %v2125_v42 }
0x1175   :  { %2308 = vmatpush.xpose.msk.msrb.mxu0 %vm2045_vm5, %v2124_v14 }
0x1178   :  { %2309 = vmatmul.msk.f32.vlgmr.msrb.gmra.mxu0 %vm2045_vm5, %v2127_v58 }
0x11f5   :  { %v2163_v18 = vpop.f32.mrf.mxu0 }
0x11f6   :  { %v2164_v20 = vadd.f32 %v2163_v18, %v2132_v17 }
0x11f8   :  { %v2310_v16 = vmul.f32 -1.442695, %v2164_v20 }
0x11fa   :  { %2475 = vpow2.f32 %v2310_v16 }
0x1200   :  { %v2476_v24 = vpop.eup %2475 }
0x1201   :  { %v2169_v23 = vadd.f32 1.0, %v2476_v24 }
0x1203   :  { %2477 = vrcp.f32 %v2169_v23  ;;  %v2181_v29 = vand.u32 2147483648, %v2169_v23  ;;  %v2179_v19 = vand.u32 2147483647, %v2169_v23  ;;  %vm2175_vm0 = vweird.f32 %v2169_v23 }
0x1205   :  { %v2182_v32 = vor.u32 1.1754944e-38, %v2181_v29  ;;  %vm2180_vm3 = vcmp.eq.f32.partialorder %v2179_v19, 8.507059e+37 }
0x1209   :  { %v2478_v27 = vpop.eup %2477 }
0x120a   :  { %v2171_v48 = vmul.f32 %v2478_v27, %v2169_v23  ;;  %vm2176_vm4 = vweird.f32 %v2478_v27 }
0x120b   :  { %vm2177_vm1 = vmor %vm2175_vm0, %vm2176_vm4 }
0x120c   :  { %v2172_v28 = vsub.f32 1.0, %v2171_v48 }
0x120e   :  { %v2173_v22 = vmul.f32 %v2478_v27, %v2172_v28 }
0x1210   :  { %v2174_v30 = vadd.f32 %v2478_v27, %v2173_v22 }
0x1212   :  { %v2178_v5 = vsel %vm2177_vm1, %v2478_v27, %v2174_v30 }
0x1213   :  { %v2183_v33 = vsel %vm2180_vm3, %v2182_v32, %v2178_v5 }
0x1214   :  { %2186 = vst.msk [vmem:[%s3430_s4] sm:$0x1] %vm2185_vm2, %v2183_v33 }

</bundles_post_ra>
